<compile_context>
chip_gen: v6e
topology: v6e:2x2x1
jax: 0.10.0
libtpu: 0.0.40
codegen_flags: <defaults>
</compile_context>

<pallas_src>
import functools

import jax
import jax.numpy as jnp
from jax.experimental import pallas as pl
from jax.experimental.pallas import tpu as pltpu


def _round_up(x, m):
    return (x + m - 1) // m * m


@functools.lru_cache(maxsize=None)
def _vmem_limit_bytes(fraction=0.72):
    """Generation-aware VMEM request: ~72% of physical (v5e/v6e 128 MiB -> ~92 MiB,
    v7x 64 MiB -> ~46 MiB) so pipeline buffers / internal scratch keep headroom."""
    try:
        cap = int(pltpu.get_tpu_info().vmem_capacity_bytes)
    except Exception:
        cap = 64 * 1024 * 1024      # conservative fallback (v7x-sized)
    return int(cap * fraction)


# --------------------------------------------------------------------------- #
# Fused per-layer kernel: input projection (one big MXU matmul per grid step)
# + sequential recurrence with h/c resident in VMEM scratch.
# --------------------------------------------------------------------------- #
def _fused_lstm_layer_kernel(x_ref, wih_ref, whh_ref, b_ref, out_ref,
                             gx_sc, h_sc, c_sc, *, hidden, mxu_dtype,
                             out_batch_major):
    # Zero initial state at the first time block (h0 = c0 = 0 in the module).
    @pl.when(pl.program_id(1) == 0)
    def _():
        h_sc[...] = jnp.zeros_like(h_sc)
        c_sc[...] = jnp.zeros_like(c_sc)

    H = hidden
    t_blk, b_blk, feat = x_ref.shape

    # (1) Time-independent projection for the whole time block: one large
    #     (t_blk*b_blk, F) x (F, 4H) MXU matmul with the fused bias add.
    #     The f32 result is staged in VMEM -> no HBM round trip, no bf16
    #     truncation of gate pre-activations.  The (t,b)->(t*b) reshape is
    #     layout-preserving because b_blk is a multiple of the sublane tile.
    x2d = x_ref[...].astype(mxu_dtype).reshape(t_blk * b_blk, feat)
    gx_sc[...] = (jnp.dot(x2d, wih_ref[...], preferred_element_type=jnp.float32)
                  + b_ref[...])

    # (2) Sequential recurrence: per step only h @ W_hh^T + staged gates_x.
    # TODO(synk): weight-stationary MXU driving (pltpu.matmul_push_rhs /
    # matmul_acc_lhs / matmul_pop) would avoid re-streaming W_hh every step.
    # TODO(synk): pipeline_mode=pl.Buffered(1) on the constant W_ih/W_hh/bias
    # blocks would halve their resident VMEM (matters most on v7x).
    h = h_sc[...]
    c = c_sc[...]
    for i in range(t_blk):                    # static unroll; all indices static
        gates = gx_sc[i * b_blk:(i + 1) * b_blk, :] + jnp.dot(
            h.astype(mxu_dtype), whh_ref[...],
            preferred_element_type=jnp.float32)
        # PyTorch gate order [i, f, g, o]; H is a multiple of 128 so every gate
        # slice is lane-aligned (a free view, no cross-vreg shuffles).
        i_g = jax.nn.sigmoid(gates[:, 0 * H:1 * H])
        f_g = jax.nn.sigmoid(gates[:, 1 * H:2 * H])
        g_g = jnp.tanh(gates[:, 2 * H:3 * H])
        o_g = jax.nn.sigmoid(gates[:, 3 * H:4 * H])
        c = f_g * c + i_g * g_g
        h = o_g * jnp.tanh(c)
        if out_batch_major:
            # Last layer: batch-major slab (b_blk, t_block*H); the per-step
            # store is lane-dense at a 128-aligned lane offset.
            out_ref[:, i * H:(i + 1) * H] = h.astype(out_ref.dtype)
        else:
            out_ref[i] = h.astype(out_ref.dtype)   # time-major (b_blk, H) store
    h_sc[...] = h
    c_sc[...] = c


def lstm_layer(x_seq, w_ih_t, w_hh_t, bias, *, hidden_p, t_block, batch_blocks,
               mxu_dtype, out_dtype, out_batch_major):
    """x_seq: (Sp, Bp, F) time-major.  Returns (Sp, Bp, Hp) time-major, or
    (Bp, Sp*Hp) batch-major slab when out_batch_major=True."""
    Sp, Bp, F = x_seq.shape
    G = w_hh_t.shape[1]
    b_blk = Bp // batch_blocks

    kernel = functools.partial(_fused_lstm_layer_kernel, hidden=hidden_p,
                               mxu_dtype=mxu_dtype,
                               out_batch_major=out_batch_major)
    if out_batch_major:
        out_shape = jax.ShapeDtypeStruct((Bp, Sp * hidden_p), out_dtype)
        out_spec = pl.BlockSpec((b_blk, t_block * hidden_p), lambda b, t: (b, t))
    else:
        out_shape = jax.ShapeDtypeStruct((Sp, Bp, hidden_p), out_dtype)
        out_spec = pl.BlockSpec((t_block, b_blk, hidden_p),
                                lambda b, t: (t, b, 0))

    return pl.pallas_call(
        kernel,
        out_shape=out_shape,
        grid_spec=pltpu.PrefetchScalarGridSpec(
            num_scalar_prefetch=0,
            grid=(batch_blocks, Sp // t_block),
            in_specs=[
                pl.BlockSpec((t_block, b_blk, F), lambda b, t: (t, b, 0)),
                pl.BlockSpec((F, G), lambda b, t: (0, 0)),        # W_ih^T
                pl.BlockSpec((hidden_p, G), lambda b, t: (0, 0)),  # W_hh^T
                pl.BlockSpec((1, G), lambda b, t: (0, 0)),         # fused bias
            ],
            out_specs=out_spec,
            scratch_shapes=[
                pltpu.VMEM((t_block * b_blk, G), jnp.float32),  # staged gates_x
                pltpu.VMEM((b_blk, hidden_p), jnp.float32),     # h state
                pltpu.VMEM((b_blk, hidden_p), jnp.float32),     # c state
            ],
        ),
        compiler_params=pltpu.CompilerParams(
            # batch axis parallel (feeds both v7x cores); time is a recurrence.
            dimension_semantics=("parallel", "arbitrary"),
            vmem_limit_bytes=_vmem_limit_bytes()),
    )(x_seq, w_ih_t, w_hh_t, bias)


# --------------------------------------------------------------------------- #
# Parameters (PyTorch nn.LSTM shapes) + kernel-friendly packing
# --------------------------------------------------------------------------- #
def init_better_lstm_params(key, input_size, num_layers, hidden_size):
    input_sizes = [input_size] + [hidden_size] * (num_layers - 1)
    bound = 1.0 / jnp.sqrt(hidden_size)
    params = []
    for layer in range(num_layers):
        in_dim = input_sizes[layer]
        key, k1, k2, k3, k4 = jax.random.split(key, 5)
        w_ih = jax.random.uniform(k1, (4 * hidden_size, in_dim),
                                  jnp.float32, -bound, bound)
        w_hh = jax.random.uniform(k2, (4 * hidden_size, hidden_size),
                                  jnp.float32, -bound, bound)
        b_ih = jax.random.uniform(k3, (4 * hidden_size,), jnp.float32, -bound, bound)
        b_hh = jax.random.uniform(k4, (4 * hidden_size,), jnp.float32, -bound, bound)
        params.append((w_ih, w_hh, b_ih, b_hh))
    return params


def pack_params_for_kernel(raw_params, hidden_size, *, weight_dtype=jnp.float32):
    """Transpose, fold the two biases, and zero-pad the gate/hidden axes so that
    every gate block is Hp (multiple of 128) wide -> lane-aligned slices."""
    H = hidden_size
    Hp = _round_up(H, 128)
    packed = []
    for layer, (w_ih, w_hh, b_ih, b_hh) in enumerate(raw_params):
        in_dim = w_ih.shape[1]
        in_dim_p = in_dim if layer == 0 else Hp     # later layers eat padded h
        w_ih4 = jnp.pad(w_ih.reshape(4, H, in_dim),
                        ((0, 0), (0, Hp - H), (0, in_dim_p - in_dim)))
        w_ih_t = jnp.transpose(w_ih4, (2, 0, 1)).reshape(in_dim_p, 4 * Hp)
        w_hh4 = jnp.pad(w_hh.reshape(4, H, H),
                        ((0, 0), (0, Hp - H), (0, Hp - H)))
        w_hh_t = jnp.transpose(w_hh4, (2, 0, 1)).reshape(Hp, 4 * Hp)
        bias = jnp.pad((b_ih + b_hh).reshape(4, H),
                       ((0, 0), (0, Hp - H))).reshape(1, 4 * Hp)
        packed.append((w_ih_t.astype(weight_dtype),
                       w_hh_t.astype(weight_dtype),
                       bias.astype(jnp.float32)))
    return packed, Hp


# --------------------------------------------------------------------------- #
# Forward pass (matches BetterLSTM.forward semantics)
# --------------------------------------------------------------------------- #
def better_lstm_forward(x, packed_params, *, hidden_p, hidden_size,
                        train_or_validation="train", t_block=16,
                        batch_blocks=1, mxu_dtype=jnp.float32,
                        act_dtype=None, out_dtype=jnp.float32):
    """x: (batch, seq, features), batch_first like the PyTorch module.
    batch_blocks: set 2 on v7x (2 TensorCores/chip); keep 1 on v5e/v6e.
    act_dtype: inter-layer activation dtype (bf16 on v6e/v7x halves h_seq HBM)."""
    B, S, F = x.shape
    if act_dtype is None:
        act_dtype = mxu_dtype
    if train_or_validation == "train":
        # Teacher-forcing shift: prepend a zero step, drop the last one.
        x = jnp.concatenate([jnp.zeros((B, 1, F), x.dtype), x[:, :-1, :]], axis=1)
    # TODO(synk): 'validation' carry-over of last_h0/last_c0 is host-side module
    # state; every call here starts from zero initial state.
    # nn.LSTM dropout is a no-op for the single-layer LSTMs used here.

    # bf16 activations need a 16-row sublane tile per batch block; f32 needs 8.
    sub = 16 if jnp.dtype(act_dtype).itemsize == 2 else 8
    Bp = _round_up(max(B, sub * batch_blocks), sub * batch_blocks)
    Sp = _round_up(S, t_block)

    # One tiny transpose of the raw input; everything stays time-major after.
    h_seq = jnp.transpose(x, (1, 0, 2))                         # (S, B, F)
    h_seq = jnp.pad(h_seq, ((0, Sp - S), (0, Bp - B), (0, 0)))  # (Sp, Bp, F)

    n_layers = len(packed_params)
    for li, (w_ih_t, w_hh_t, bias) in enumerate(packed_params):
        last = li == n_layers - 1
        h_seq = lstm_layer(h_seq, w_ih_t, w_hh_t, bias,
                           hidden_p=hidden_p, t_block=t_block,
                           batch_blocks=batch_blocks, mxu_dtype=mxu_dtype,
                           out_dtype=(out_dtype if last else act_dtype),
                           out_batch_major=last)

    # Last layer emitted a batch-major (Bp, Sp*Hp) slab -> free reshape, no
    # XLA transpose (saves a full HBM read+write of the output).
    out = h_seq.reshape(Bp, Sp, hidden_p)
    return out[:B, :S, :hidden_size]


# --------------------------------------------------------------------------- #
# Pure-JAX reference (f32, unpadded) of the original module's forward
# --------------------------------------------------------------------------- #
def _reference_forward(x, raw_params, hidden_size, train_or_validation="train"):
    B, S, F = x.shape
    if train_or_validation == "train":
        x = jnp.concatenate([jnp.zeros((B, 1, F), x.dtype), x[:, :-1, :]], axis=1)
    seq = jnp.transpose(x, (1, 0, 2))
    H = hidden_size
    for (w_ih, w_hh, b_ih, b_hh) in raw_params:
        w_ih_t, w_hh_t, bias = w_ih.T, w_hh.T, (b_ih + b_hh)[None, :]

        def step(carry, x_t):
            h, c = carry
            g = x_t @ w_ih_t + h @ w_hh_t + bias
            i = jax.nn.sigmoid(g[:, 0:H])
            f = jax.nn.sigmoid(g[:, H:2 * H])
            gg = jnp.tanh(g[:, 2 * H:3 * H])
            o = jax.nn.sigmoid(g[:, 3 * H:4 * H])
            c = f * c + i * gg
            h = o * jnp.tanh(c)
            return (h, c), h

        init = (jnp.zeros((B, H), jnp.float32), jnp.zeros((B, H), jnp.float32))
        _, seq = jax.lax.scan(step, init, seq)
    return jnp.transpose(seq, (1, 0, 2))


if __name__ == "__main__":
    batch, seq, input_size = 2, 16, 4
    num_layers, hidden_size = 2, 32

    key = jax.random.PRNGKey(0)
    kx, kp = jax.random.split(key)
    x = jax.random.normal(kx, (batch, seq, input_size), dtype=jnp.float32)
    raw_params = init_better_lstm_params(kp, input_size, num_layers, hidden_size)

    ref = jax.block_until_ready(
        _reference_forward(x, raw_params, hidden_size, "train"))

    packed_f32, Hp = pack_params_for_kernel(raw_params, hidden_size,
                                            weight_dtype=jnp.float32)

    # A) f32 path, two time blocks (exercises the h/c carry across grid steps).
    fwd_a = jax.jit(functools.partial(
        better_lstm_forward, hidden_p=Hp, hidden_size=hidden_size,
        train_or_validation="train", t_block=8, batch_blocks=1,
        mxu_dtype=jnp.float32))
    out_a = jax.block_until_ready(fwd_a(x, packed_f32))
    assert out_a.shape == (batch, seq, hidden_size)
    err_a = float(jnp.max(jnp.abs(out_a - ref)))
    assert err_a < 2e-4, err_a

    # B) f32 path, batch split over 2 blocks (v7x: feeds both TensorCores;
    #    on single-TC chips it is just a serial outer loop, still correct).
    fwd_b = jax.jit(functools.partial(
        better_lstm_forward, hidden_p=Hp, hidden_size=hidden_size,
        train_or_validation="train", t_block=8, batch_blocks=2,
        mxu_dtype=jnp.float32))
    out_b = jax.block_until_ready(fwd_b(x, packed_f32))
    err_b = float(jnp.max(jnp.abs(out_b - ref)))
    assert err_b < 2e-4, err_b

    # C) bf16 MXU operands + bf16 inter-layer activations (v6e/v7x path);
    #    gate pre-activations and c/h state stay f32 inside the kernel.
    packed_bf16, _ = pack_params_for_kernel(raw_params, hidden_size,
                                            weight_dtype=jnp.bfloat16)
    fwd_c = jax.jit(functools.partial(
        better_lstm_forward, hidden_p=Hp, hidden_size=hidden_size,
        train_or_validation="train", t_block=16, batch_blocks=1,
        mxu_dtype=jnp.bfloat16, act_dtype=jnp.bfloat16))
    out_c = jax.block_until_ready(fwd_c(x, packed_bf16))
    err_c = float(jnp.max(jnp.abs(out_c - ref)))
    assert err_c < 5e-2, err_c

    print("KERNEL_OK")
</pallas_src>

<mosaic_0001>
module attributes {stable_mosaic.version = 11 : i64} {
  func.func @_fused_lstm_layer_kernel(%arg0: i32, %arg1: i32, %arg2: memref<8x8x4xf32, #tpu.memory_space<vmem>>, %arg3: memref<4x512xf32, #tpu.memory_space<vmem>>, %arg4: memref<128x512xf32, #tpu.memory_space<vmem>>, %arg5: memref<1x512xf32, #tpu.memory_space<vmem>>, %arg6: memref<8x8x128xf32, #tpu.memory_space<vmem>>, %arg7: memref<64x512xf32, #tpu.memory_space<vmem>>, %arg8: memref<8x128xf32, #tpu.memory_space<vmem>>, %arg9: memref<8x128xf32, #tpu.memory_space<vmem>>) attributes {dimension_semantics = [#tpu.dimension_semantics<parallel>, #tpu.dimension_semantics<arbitrary>], iteration_bounds = array<i64: 1, 2>, scalar_prefetch = 0 : i64, scratch_operands = 3 : i64, tpu.core_type = #tpu.core_type<tc>, window_params = [{transform_indices = @transform_0, window_bounds = array<i64: 8, 8, 4>}, {pipeline_mode = #tpu.pipeline_mode<synchronous>, transform_indices = @transform_1, window_bounds = array<i64: 4, 512>}, {pipeline_mode = #tpu.pipeline_mode<synchronous>, transform_indices = @transform_2, window_bounds = array<i64: 128, 512>}, {pipeline_mode = #tpu.pipeline_mode<synchronous>, transform_indices = @transform_3, window_bounds = array<i64: 1, 512>}, {transform_indices = @transform_4, window_bounds = array<i64: 8, 8, 128>}]} {
    %c0_i32 = arith.constant 0 : i32
    %0 = arith.cmpi eq, %arg1, %c0_i32 : i32
    %1 = arith.extui %0 : i1 to i32
    %c0_i32_0 = arith.constant 0 : i32
    %2 = arith.cmpi ne, %1, %c0_i32_0 : i32
    scf.if %2 {
      %cst_91 = arith.constant 0.000000e+00 : f32
      %271 = vector.broadcast %cst_91 : f32 to vector<8x128xf32>
      %c0_92 = arith.constant 0 : index
      %c0_93 = arith.constant 0 : index
      %272 = vector.load %arg8[%c0_92, %c0_93] : memref<8x128xf32, #tpu.memory_space<vmem>>, vector<8x128xf32>
      tpu.vector_store %arg8[%c0_92, %c0_93], %271 {strides = array<i32>} : memref<8x128xf32, #tpu.memory_space<vmem>>, vector<8x128xf32>,
      %cst_94 = arith.constant 0.000000e+00 : f32
      %273 = vector.broadcast %cst_94 : f32 to vector<8x128xf32>
      %c0_95 = arith.constant 0 : index
      %c0_96 = arith.constant 0 : index
      %274 = vector.load %arg9[%c0_95, %c0_96] : memref<8x128xf32, #tpu.memory_space<vmem>>, vector<8x128xf32>
      tpu.vector_store %arg9[%c0_95, %c0_96], %273 {strides = array<i32>} : memref<8x128xf32, #tpu.memory_space<vmem>>, vector<8x128xf32>,
    } else {
    }
    %c0 = arith.constant 0 : index
    %c0_1 = arith.constant 0 : index
    %c0_2 = arith.constant 0 : index
    %3 = vector.load %arg2[%c0, %c0_1, %c0_2] : memref<8x8x4xf32, #tpu.memory_space<vmem>>, vector<8x8x4xf32>
    %4 = vector.shape_cast %3 : vector<8x8x4xf32> to vector<64x4xf32>
    %c0_3 = arith.constant 0 : index
    %c0_4 = arith.constant 0 : index
    %5 = vector.load %arg3[%c0_3, %c0_4] : memref<4x512xf32, #tpu.memory_space<vmem>>, vector<4x512xf32>
    %cst = arith.constant dense<0.000000e+00> : vector<64x512xf32>
    %6 = tpu.matmul %4, %5, %cst {dimension_numbers = #tpu.dot_dimension_numbers<[1], [0], [0], [1], [0, 0, 1, 1], [], []>} : vector<64x4xf32>, vector<4x512xf32>, vector<64x512xf32> -> vector<64x512xf32>
    %c0_5 = arith.constant 0 : index
    %c0_6 = arith.constant 0 : index
    %7 = vector.load %arg5[%c0_5, %c0_6] : memref<1x512xf32, #tpu.memory_space<vmem>>, vector<1x512xf32>
    %8 = vector.broadcast %7 : vector<1x512xf32> to vector<64x512xf32>
    %9 = arith.addf %6, %8 : vector<64x512xf32>
    %c0_7 = arith.constant 0 : index
    %c0_8 = arith.constant 0 : index
    %10 = vector.load %arg7[%c0_7, %c0_8] : memref<64x512xf32, #tpu.memory_space<vmem>>, vector<64x512xf32>
    tpu.vector_store %arg7[%c0_7, %c0_8], %9 {strides = array<i32>} : memref<64x512xf32, #tpu.memory_space<vmem>>, vector<64x512xf32>,
    %c0_9 = arith.constant 0 : index
    %c0_10 = arith.constant 0 : index
    %11 = vector.load %arg8[%c0_9, %c0_10] : memref<8x128xf32, #tpu.memory_space<vmem>>, vector<8x128xf32>
    %c0_11 = arith.constant 0 : index
    %c0_12 = arith.constant 0 : index
    %12 = vector.load %arg9[%c0_11, %c0_12] : memref<8x128xf32, #tpu.memory_space<vmem>>, vector<8x128xf32>
    %c0_13 = arith.constant 0 : index
    %c0_14 = arith.constant 0 : index
    %13 = vector.load %arg7[%c0_13, %c0_14] : memref<64x512xf32, #tpu.memory_space<vmem>>, vector<8x512xf32>
    %c0_15 = arith.constant 0 : index
    %c0_16 = arith.constant 0 : index
    %14 = vector.load %arg4[%c0_15, %c0_16] : memref<128x512xf32, #tpu.memory_space<vmem>>, vector<128x512xf32>
    %cst_17 = arith.constant dense<0.000000e+00> : vector<8x512xf32>
    %15 = tpu.matmul %11, %14, %cst_17 {dimension_numbers = #tpu.dot_dimension_numbers<[1], [0], [0], [1], [0, 0, 1, 1], [], []>} : vector<8x128xf32>, vector<128x512xf32>, vector<8x512xf32> -> vector<8x512xf32>
    %16 = arith.addf %13, %15 : vector<8x512xf32>
    %17 = vector.extract_strided_slice %16 {offsets = [0, 0], sizes = [8, 128], strides = [1, 1]} : vector<8x512xf32> to vector<8x128xf32>
    %18 = arith.negf %17 : vector<8x128xf32>
    %19 = math.exp %18 : vector<8x128xf32>
    %cst_18 = arith.constant 1.000000e+00 : f32
    %20 = vector.broadcast %cst_18 : f32 to vector<8x128xf32>
    %21 = arith.addf %20, %19 : vector<8x128xf32>
    %22 = arith.divf %20, %21 : vector<8x128xf32>
    %23 = vector.extract_strided_slice %16 {offsets = [0, 128], sizes = [8, 128], strides = [1, 1]} : vector<8x512xf32> to vector<8x128xf32>
    %24 = arith.negf %23 : vector<8x128xf32>
    %25 = math.exp %24 : vector<8x128xf32>
    %cst_19 = arith.constant 1.000000e+00 : f32
    %26 = vector.broadcast %cst_19 : f32 to vector<8x128xf32>
    %27 = arith.addf %26, %25 : vector<8x128xf32>
    %28 = arith.divf %26, %27 : vector<8x128xf32>
    %29 = vector.extract_strided_slice %16 {offsets = [0, 256], sizes = [8, 128], strides = [1, 1]} : vector<8x512xf32> to vector<8x128xf32>
    %30 = math.tanh %29 : vector<8x128xf32>
    %31 = vector.extract_strided_slice %16 {offsets = [0, 384], sizes = [8, 128], strides = [1, 1]} : vector<8x512xf32> to vector<8x128xf32>
    %32 = arith.negf %31 : vector<8x128xf32>
    %33 = math.exp %32 : vector<8x128xf32>
    %cst_20 = arith.constant 1.000000e+00 : f32
    %34 = vector.broadcast %cst_20 : f32 to vector<8x128xf32>
    %35 = arith.addf %34, %33 : vector<8x128xf32>
    %36 = arith.divf %34, %35 : vector<8x128xf32>
    %37 = arith.mulf %28, %12 : vector<8x128xf32>
    %38 = arith.mulf %22, %30 : vector<8x128xf32>
    %39 = arith.addf %37, %38 : vector<8x128xf32>
    %40 = math.tanh %39 : vector<8x128xf32>
    %41 = arith.mulf %36, %40 : vector<8x128xf32>
    %c0_21 = arith.constant 0 : index
    %c0_22 = arith.constant 0 : index
    %c0_23 = arith.constant 0 : index
    %42 = vector.load %arg6[%c0_21, %c0_22, %c0_23] : memref<8x8x128xf32, #tpu.memory_space<vmem>>, vector<1x8x128xf32>
    %43 = vector.shape_cast %42 : vector<1x8x128xf32> to vector<8x128xf32>
    %44 = vector.shape_cast %41 : vector<8x128xf32> to vector<1x8x128xf32>
    tpu.vector_store %arg6[%c0_21, %c0_22, %c0_23], %44 {strides = array<i32>} : memref<8x8x128xf32, #tpu.memory_space<vmem>>, vector<1x8x128xf32>,
    %c8 = arith.constant 8 : index
    %c0_24 = arith.constant 0 : index
    %45 = vector.load %arg7[%c8, %c0_24] : memref<64x512xf32, #tpu.memory_space<vmem>>, vector<8x512xf32>
    %c0_25 = arith.constant 0 : index
    %c0_26 = arith.constant 0 : index
    %46 = vector.load %arg4[%c0_25, %c0_26] : memref<128x512xf32, #tpu.memory_space<vmem>>, vector<128x512xf32>
    %cst_27 = arith.constant dense<0.000000e+00> : vector<8x512xf32>
    %47 = tpu.matmul %41, %46, %cst_27 {dimension_numbers = #tpu.dot_dimension_numbers<[1], [0], [0], [1], [0, 0, 1, 1], [], []>} : vector<8x128xf32>, vector<128x512xf32>, vector<8x512xf32> -> vector<8x512xf32>
    %48 = arith.addf %45, %47 : vector<8x512xf32>
    %49 = vector.extract_strided_slice %48 {offsets = [0, 0], sizes = [8, 128], strides = [1, 1]} : vector<8x512xf32> to vector<8x128xf32>
    %50 = arith.negf %49 : vector<8x128xf32>
    %51 = math.exp %50 : vector<8x128xf32>
    %cst_28 = arith.constant 1.000000e+00 : f32
    %52 = vector.broadcast %cst_28 : f32 to vector<8x128xf32>
    %53 = arith.addf %52, %51 : vector<8x128xf32>
    %54 = arith.divf %52, %53 : vector<8x128xf32>
    %55 = vector.extract_strided_slice %48 {offsets = [0, 128], sizes = [8, 128], strides = [1, 1]} : vector<8x512xf32> to vector<8x128xf32>
    %56 = arith.negf %55 : vector<8x128xf32>
    %57 = math.exp %56 : vector<8x128xf32>
    %cst_29 = arith.constant 1.000000e+00 : f32
    %58 = vector.broadcast %cst_29 : f32 to vector<8x128xf32>
    %59 = arith.addf %58, %57 : vector<8x128xf32>
    %60 = arith.divf %58, %59 : vector<8x128xf32>
    %61 = vector.extract_strided_slice %48 {offsets = [0, 256], sizes = [8, 128], strides = [1, 1]} : vector<8x512xf32> to vector<8x128xf32>
    %62 = math.tanh %61 : vector<8x128xf32>
    %63 = vector.extract_strided_slice %48 {offsets = [0, 384], sizes = [8, 128], strides = [1, 1]} : vector<8x512xf32> to vector<8x128xf32>
    %64 = arith.negf %63 : vector<8x128xf32>
    %65 = math.exp %64 : vector<8x128xf32>
    %cst_30 = arith.constant 1.000000e+00 : f32
    %66 = vector.broadcast %cst_30 : f32 to vector<8x128xf32>
    %67 = arith.addf %66, %65 : vector<8x128xf32>
    %68 = arith.divf %66, %67 : vector<8x128xf32>
    %69 = arith.mulf %60, %39 : vector<8x128xf32>
    %70 = arith.mulf %54, %62 : vector<8x128xf32>
    %71 = arith.addf %69, %70 : vector<8x128xf32>
    %72 = math.tanh %71 : vector<8x128xf32>
    %73 = arith.mulf %68, %72 : vector<8x128xf32>
    %c1 = arith.constant 1 : index
    %c0_31 = arith.constant 0 : index
    %c0_32 = arith.constant 0 : index
    %74 = vector.load %arg6[%c1, %c0_31, %c0_32] : memref<8x8x128xf32, #tpu.memory_space<vmem>>, vector<1x8x128xf32>
    %75 = vector.shape_cast %74 : vector<1x8x128xf32> to vector<8x128xf32>
    %76 = vector.shape_cast %73 : vector<8x128xf32> to vector<1x8x128xf32>
    tpu.vector_store %arg6[%c1, %c0_31, %c0_32], %76 {strides = array<i32>} : memref<8x8x128xf32, #tpu.memory_space<vmem>>, vector<1x8x128xf32>,
    %c16 = arith.constant 16 : index
    %c0_33 = arith.constant 0 : index
    %77 = vector.load %arg7[%c16, %c0_33] : memref<64x512xf32, #tpu.memory_space<vmem>>, vector<8x512xf32>
    %c0_34 = arith.constant 0 : index
    %c0_35 = arith.constant 0 : index
    %78 = vector.load %arg4[%c0_34, %c0_35] : memref<128x512xf32, #tpu.memory_space<vmem>>, vector<128x512xf32>
    %cst_36 = arith.constant dense<0.000000e+00> : vector<8x512xf32>
    %79 = tpu.matmul %73, %78, %cst_36 {dimension_numbers = #tpu.dot_dimension_numbers<[1], [0], [0], [1], [0, 0, 1, 1], [], []>} : vector<8x128xf32>, vector<128x512xf32>, vector<8x512xf32> -> vector<8x512xf32>
    %80 = arith.addf %77, %79 : vector<8x512xf32>
    %81 = vector.extract_strided_slice %80 {offsets = [0, 0], sizes = [8, 128], strides = [1, 1]} : vector<8x512xf32> to vector<8x128xf32>
    %82 = arith.negf %81 : vector<8x128xf32>
    %83 = math.exp %82 : vector<8x128xf32>
    %cst_37 = arith.constant 1.000000e+00 : f32
    %84 = vector.broadcast %cst_37 : f32 to vector<8x128xf32>
    %85 = arith.addf %84, %83 : vector<8x128xf32>
    %86 = arith.divf %84, %85 : vector<8x128xf32>
    %87 = vector.extract_strided_slice %80 {offsets = [0, 128], sizes = [8, 128], strides = [1, 1]} : vector<8x512xf32> to vector<8x128xf32>
    %88 = arith.negf %87 : vector<8x128xf32>
    %89 = math.exp %88 : vector<8x128xf32>
    %cst_38 = arith.constant 1.000000e+00 : f32
    %90 = vector.broadcast %cst_38 : f32 to vector<8x128xf32>
    %91 = arith.addf %90, %89 : vector<8x128xf32>
    %92 = arith.divf %90, %91 : vector<8x128xf32>
    %93 = vector.extract_strided_slice %80 {offsets = [0, 256], sizes = [8, 128], strides = [1, 1]} : vector<8x512xf32> to vector<8x128xf32>
    %94 = math.tanh %93 : vector<8x128xf32>
    %95 = vector.extract_strided_slice %80 {offsets = [0, 384], sizes = [8, 128], strides = [1, 1]} : vector<8x512xf32> to vector<8x128xf32>
    %96 = arith.negf %95 : vector<8x128xf32>
    %97 = math.exp %96 : vector<8x128xf32>
    %cst_39 = arith.constant 1.000000e+00 : f32
    %98 = vector.broadcast %cst_39 : f32 to vector<8x128xf32>
    %99 = arith.addf %98, %97 : vector<8x128xf32>
    %100 = arith.divf %98, %99 : vector<8x128xf32>
    %101 = arith.mulf %92, %71 : vector<8x128xf32>
    %102 = arith.mulf %86, %94 : vector<8x128xf32>
    %103 = arith.addf %101, %102 : vector<8x128xf32>
    %104 = math.tanh %103 : vector<8x128xf32>
    %105 = arith.mulf %100, %104 : vector<8x128xf32>
    %c2 = arith.constant 2 : index
    %c0_40 = arith.constant 0 : index
    %c0_41 = arith.constant 0 : index
    %106 = vector.load %arg6[%c2, %c0_40, %c0_41] : memref<8x8x128xf32, #tpu.memory_space<vmem>>, vector<1x8x128xf32>
    %107 = vector.shape_cast %106 : vector<1x8x128xf32> to vector<8x128xf32>
    %108 = vector.shape_cast %105 : vector<8x128xf32> to vector<1x8x128xf32>
    tpu.vector_store %arg6[%c2, %c0_40, %c0_41], %108 {strides = array<i32>} : memref<8x8x128xf32, #tpu.memory_space<vmem>>, vector<1x8x128xf32>,
    %c24 = arith.constant 24 : index
    %c0_42 = arith.constant 0 : index
    %109 = vector.load %arg7[%c24, %c0_42] : memref<64x512xf32, #tpu.memory_space<vmem>>, vector<8x512xf32>
    %c0_43 = arith.constant 0 : index
    %c0_44 = arith.constant 0 : index
    %110 = vector.load %arg4[%c0_43, %c0_44] : memref<128x512xf32, #tpu.memory_space<vmem>>, vector<128x512xf32>
    %cst_45 = arith.constant dense<0.000000e+00> : vector<8x512xf32>
    %111 = tpu.matmul %105, %110, %cst_45 {dimension_numbers = #tpu.dot_dimension_numbers<[1], [0], [0], [1], [0, 0, 1, 1], [], []>} : vector<8x128xf32>, vector<128x512xf32>, vector<8x512xf32> -> vector<8x512xf32>
    %112 = arith.addf %109, %111 : vector<8x512xf32>
    %113 = vector.extract_strided_slice %112 {offsets = [0, 0], sizes = [8, 128], strides = [1, 1]} : vector<8x512xf32> to vector<8x128xf32>
    %114 = arith.negf %113 : vector<8x128xf32>
    %115 = math.exp %114 : vector<8x128xf32>
    %cst_46 = arith.constant 1.000000e+00 : f32
    %116 = vector.broadcast %cst_46 : f32 to vector<8x128xf32>
    %117 = arith.addf %116, %115 : vector<8x128xf32>
    %118 = arith.divf %116, %117 : vector<8x128xf32>
    %119 = vector.extract_strided_slice %112 {offsets = [0, 128], sizes = [8, 128], strides = [1, 1]} : vector<8x512xf32> to vector<8x128xf32>
    %120 = arith.negf %119 : vector<8x128xf32>
    %121 = math.exp %120 : vector<8x128xf32>
    %cst_47 = arith.constant 1.000000e+00 : f32
    %122 = vector.broadcast %cst_47 : f32 to vector<8x128xf32>
    %123 = arith.addf %122, %121 : vector<8x128xf32>
    %124 = arith.divf %122, %123 : vector<8x128xf32>
    %125 = vector.extract_strided_slice %112 {offsets = [0, 256], sizes = [8, 128], strides = [1, 1]} : vector<8x512xf32> to vector<8x128xf32>
    %126 = math.tanh %125 : vector<8x128xf32>
    %127 = vector.extract_strided_slice %112 {offsets = [0, 384], sizes = [8, 128], strides = [1, 1]} : vector<8x512xf32> to vector<8x128xf32>
    %128 = arith.negf %127 : vector<8x128xf32>
    %129 = math.exp %128 : vector<8x128xf32>
    %cst_48 = arith.constant 1.000000e+00 : f32
    %130 = vector.broadcast %cst_48 : f32 to vector<8x128xf32>
    %131 = arith.addf %130, %129 : vector<8x128xf32>
    %132 = arith.divf %130, %131 : vector<8x128xf32>
    %133 = arith.mulf %124, %103 : vector<8x128xf32>
    %134 = arith.mulf %118, %126 : vector<8x128xf32>
    %135 = arith.addf %133, %134 : vector<8x128xf32>
    %136 = math.tanh %135 : vector<8x128xf32>
    %137 = arith.mulf %132, %136 : vector<8x128xf32>
    %c3 = arith.constant 3 : index
    %c0_49 = arith.constant 0 : index
    %c0_50 = arith.constant 0 : index
    %138 = vector.load %arg6[%c3, %c0_49, %c0_50] : memref<8x8x128xf32, #tpu.memory_space<vmem>>, vector<1x8x128xf32>
    %139 = vector.shape_cast %138 : vector<1x8x128xf32> to vector<8x128xf32>
    %140 = vector.shape_cast %137 : vector<8x128xf32> to vector<1x8x128xf32>
    tpu.vector_store %arg6[%c3, %c0_49, %c0_50], %140 {strides = array<i32>} : memref<8x8x128xf32, #tpu.memory_space<vmem>>, vector<1x8x128xf32>,
    %c32 = arith.constant 32 : index
    %c0_51 = arith.constant 0 : index
    %141 = vector.load %arg7[%c32, %c0_51] : memref<64x512xf32, #tpu.memory_space<vmem>>, vector<8x512xf32>
    %c0_52 = arith.constant 0 : index
    %c0_53 = arith.constant 0 : index
    %142 = vector.load %arg4[%c0_52, %c0_53] : memref<128x512xf32, #tpu.memory_space<vmem>>, vector<128x512xf32>
    %cst_54 = arith.constant dense<0.000000e+00> : vector<8x512xf32>
    %143 = tpu.matmul %137, %142, %cst_54 {dimension_numbers = #tpu.dot_dimension_numbers<[1], [0], [0], [1], [0, 0, 1, 1], [], []>} : vector<8x128xf32>, vector<128x512xf32>, vector<8x512xf32> -> vector<8x512xf32>
    %144 = arith.addf %141, %143 : vector<8x512xf32>
    %145 = vector.extract_strided_slice %144 {offsets = [0, 0], sizes = [8, 128], strides = [1, 1]} : vector<8x512xf32> to vector<8x128xf32>
    %146 = arith.negf %145 : vector<8x128xf32>
    %147 = math.exp %146 : vector<8x128xf32>
    %cst_55 = arith.constant 1.000000e+00 : f32
    %148 = vector.broadcast %cst_55 : f32 to vector<8x128xf32>
    %149 = arith.addf %148, %147 : vector<8x128xf32>
    %150 = arith.divf %148, %149 : vector<8x128xf32>
    %151 = vector.extract_strided_slice %144 {offsets = [0, 128], sizes = [8, 128], strides = [1, 1]} : vector<8x512xf32> to vector<8x128xf32>
    %152 = arith.negf %151 : vector<8x128xf32>
    %153 = math.exp %152 : vector<8x128xf32>
    %cst_56 = arith.constant 1.000000e+00 : f32
    %154 = vector.broadcast %cst_56 : f32 to vector<8x128xf32>
    %155 = arith.addf %154, %153 : vector<8x128xf32>
    %156 = arith.divf %154, %155 : vector<8x128xf32>
    %157 = vector.extract_strided_slice %144 {offsets = [0, 256], sizes = [8, 128], strides = [1, 1]} : vector<8x512xf32> to vector<8x128xf32>
    %158 = math.tanh %157 : vector<8x128xf32>
    %159 = vector.extract_strided_slice %144 {offsets = [0, 384], sizes = [8, 128], strides = [1, 1]} : vector<8x512xf32> to vector<8x128xf32>
    %160 = arith.negf %159 : vector<8x128xf32>
    %161 = math.exp %160 : vector<8x128xf32>
    %cst_57 = arith.constant 1.000000e+00 : f32
    %162 = vector.broadcast %cst_57 : f32 to vector<8x128xf32>
    %163 = arith.addf %162, %161 : vector<8x128xf32>
    %164 = arith.divf %162, %163 : vector<8x128xf32>
    %165 = arith.mulf %156, %135 : vector<8x128xf32>
    %166 = arith.mulf %150, %158 : vector<8x128xf32>
    %167 = arith.addf %165, %166 : vector<8x128xf32>
    %168 = math.tanh %167 : vector<8x128xf32>
    %169 = arith.mulf %164, %168 : vector<8x128xf32>
    %c4 = arith.constant 4 : index
    %c0_58 = arith.constant 0 : index
    %c0_59 = arith.constant 0 : index
    %170 = vector.load %arg6[%c4, %c0_58, %c0_59] : memref<8x8x128xf32, #tpu.memory_space<vmem>>, vector<1x8x128xf32>
    %171 = vector.shape_cast %170 : vector<1x8x128xf32> to vector<8x128xf32>
    %172 = vector.shape_cast %169 : vector<8x128xf32> to vector<1x8x128xf32>
    tpu.vector_store %arg6[%c4, %c0_58, %c0_59], %172 {strides = array<i32>} : memref<8x8x128xf32, #tpu.memory_space<vmem>>, vector<1x8x128xf32>,
    %c40 = arith.constant 40 : index
    %c0_60 = arith.constant 0 : index
    %173 = vector.load %arg7[%c40, %c0_60] : memref<64x512xf32, #tpu.memory_space<vmem>>, vector<8x512xf32>
    %c0_61 = arith.constant 0 : index
    %c0_62 = arith.constant 0 : index
    %174 = vector.load %arg4[%c0_61, %c0_62] : memref<128x512xf32, #tpu.memory_space<vmem>>, vector<128x512xf32>
    %cst_63 = arith.constant dense<0.000000e+00> : vector<8x512xf32>
    %175 = tpu.matmul %169, %174, %cst_63 {dimension_numbers = #tpu.dot_dimension_numbers<[1], [0], [0], [1], [0, 0, 1, 1], [], []>} : vector<8x128xf32>, vector<128x512xf32>, vector<8x512xf32> -> vector<8x512xf32>
    %176 = arith.addf %173, %175 : vector<8x512xf32>
    %177 = vector.extract_strided_slice %176 {offsets = [0, 0], sizes = [8, 128], strides = [1, 1]} : vector<8x512xf32> to vector<8x128xf32>
    %178 = arith.negf %177 : vector<8x128xf32>
    %179 = math.exp %178 : vector<8x128xf32>
    %cst_64 = arith.constant 1.000000e+00 : f32
    %180 = vector.broadcast %cst_64 : f32 to vector<8x128xf32>
    %181 = arith.addf %180, %179 : vector<8x128xf32>
    %182 = arith.divf %180, %181 : vector<8x128xf32>
    %183 = vector.extract_strided_slice %176 {offsets = [0, 128], sizes = [8, 128], strides = [1, 1]} : vector<8x512xf32> to vector<8x128xf32>
    %184 = arith.negf %183 : vector<8x128xf32>
    %185 = math.exp %184 : vector<8x128xf32>
    %cst_65 = arith.constant 1.000000e+00 : f32
    %186 = vector.broadcast %cst_65 : f32 to vector<8x128xf32>
    %187 = arith.addf %186, %185 : vector<8x128xf32>
    %188 = arith.divf %186, %187 : vector<8x128xf32>
    %189 = vector.extract_strided_slice %176 {offsets = [0, 256], sizes = [8, 128], strides = [1, 1]} : vector<8x512xf32> to vector<8x128xf32>
    %190 = math.tanh %189 : vector<8x128xf32>
    %191 = vector.extract_strided_slice %176 {offsets = [0, 384], sizes = [8, 128], strides = [1, 1]} : vector<8x512xf32> to vector<8x128xf32>
    %192 = arith.negf %191 : vector<8x128xf32>
    %193 = math.exp %192 : vector<8x128xf32>
    %cst_66 = arith.constant 1.000000e+00 : f32
    %194 = vector.broadcast %cst_66 : f32 to vector<8x128xf32>
    %195 = arith.addf %194, %193 : vector<8x128xf32>
    %196 = arith.divf %194, %195 : vector<8x128xf32>
    %197 = arith.mulf %188, %167 : vector<8x128xf32>
    %198 = arith.mulf %182, %190 : vector<8x128xf32>
    %199 = arith.addf %197, %198 : vector<8x128xf32>
    %200 = math.tanh %199 : vector<8x128xf32>
    %201 = arith.mulf %196, %200 : vector<8x128xf32>
    %c5 = arith.constant 5 : index
    %c0_67 = arith.constant 0 : index
    %c0_68 = arith.constant 0 : index
    %202 = vector.load %arg6[%c5, %c0_67, %c0_68] : memref<8x8x128xf32, #tpu.memory_space<vmem>>, vector<1x8x128xf32>
    %203 = vector.shape_cast %202 : vector<1x8x128xf32> to vector<8x128xf32>
    %204 = vector.shape_cast %201 : vector<8x128xf32> to vector<1x8x128xf32>
    tpu.vector_store %arg6[%c5, %c0_67, %c0_68], %204 {strides = array<i32>} : memref<8x8x128xf32, #tpu.memory_space<vmem>>, vector<1x8x128xf32>,
    %c48 = arith.constant 48 : index
    %c0_69 = arith.constant 0 : index
    %205 = vector.load %arg7[%c48, %c0_69] : memref<64x512xf32, #tpu.memory_space<vmem>>, vector<8x512xf32>
    %c0_70 = arith.constant 0 : index
    %c0_71 = arith.constant 0 : index
    %206 = vector.load %arg4[%c0_70, %c0_71] : memref<128x512xf32, #tpu.memory_space<vmem>>, vector<128x512xf32>
    %cst_72 = arith.constant dense<0.000000e+00> : vector<8x512xf32>
    %207 = tpu.matmul %201, %206, %cst_72 {dimension_numbers = #tpu.dot_dimension_numbers<[1], [0], [0], [1], [0, 0, 1, 1], [], []>} : vector<8x128xf32>, vector<128x512xf32>, vector<8x512xf32> -> vector<8x512xf32>
    %208 = arith.addf %205, %207 : vector<8x512xf32>
    %209 = vector.extract_strided_slice %208 {offsets = [0, 0], sizes = [8, 128], strides = [1, 1]} : vector<8x512xf32> to vector<8x128xf32>
    %210 = arith.negf %209 : vector<8x128xf32>
    %211 = math.exp %210 : vector<8x128xf32>
    %cst_73 = arith.constant 1.000000e+00 : f32
    %212 = vector.broadcast %cst_73 : f32 to vector<8x128xf32>
    %213 = arith.addf %212, %211 : vector<8x128xf32>
    %214 = arith.divf %212, %213 : vector<8x128xf32>
    %215 = vector.extract_strided_slice %208 {offsets = [0, 128], sizes = [8, 128], strides = [1, 1]} : vector<8x512xf32> to vector<8x128xf32>
    %216 = arith.negf %215 : vector<8x128xf32>
    %217 = math.exp %216 : vector<8x128xf32>
    %cst_74 = arith.constant 1.000000e+00 : f32
    %218 = vector.broadcast %cst_74 : f32 to vector<8x128xf32>
    %219 = arith.addf %218, %217 : vector<8x128xf32>
    %220 = arith.divf %218, %219 : vector<8x128xf32>
    %221 = vector.extract_strided_slice %208 {offsets = [0, 256], sizes = [8, 128], strides = [1, 1]} : vector<8x512xf32> to vector<8x128xf32>
    %222 = math.tanh %221 : vector<8x128xf32>
    %223 = vector.extract_strided_slice %208 {offsets = [0, 384], sizes = [8, 128], strides = [1, 1]} : vector<8x512xf32> to vector<8x128xf32>
    %224 = arith.negf %223 : vector<8x128xf32>
    %225 = math.exp %224 : vector<8x128xf32>
    %cst_75 = arith.constant 1.000000e+00 : f32
    %226 = vector.broadcast %cst_75 : f32 to vector<8x128xf32>
    %227 = arith.addf %226, %225 : vector<8x128xf32>
    %228 = arith.divf %226, %227 : vector<8x128xf32>
    %229 = arith.mulf %220, %199 : vector<8x128xf32>
    %230 = arith.mulf %214, %222 : vector<8x128xf32>
    %231 = arith.addf %229, %230 : vector<8x128xf32>
    %232 = math.tanh %231 : vector<8x128xf32>
    %233 = arith.mulf %228, %232 : vector<8x128xf32>
    %c6 = arith.constant 6 : index
    %c0_76 = arith.constant 0 : index
    %c0_77 = arith.constant 0 : index
    %234 = vector.load %arg6[%c6, %c0_76, %c0_77] : memref<8x8x128xf32, #tpu.memory_space<vmem>>, vector<1x8x128xf32>
    %235 = vector.shape_cast %234 : vector<1x8x128xf32> to vector<8x128xf32>
    %236 = vector.shape_cast %233 : vector<8x128xf32> to vector<1x8x128xf32>
    tpu.vector_store %arg6[%c6, %c0_76, %c0_77], %236 {strides = array<i32>} : memref<8x8x128xf32, #tpu.memory_space<vmem>>, vector<1x8x128xf32>,
    %c56 = arith.constant 56 : index
    %c0_78 = arith.constant 0 : index
    %237 = vector.load %arg7[%c56, %c0_78] : memref<64x512xf32, #tpu.memory_space<vmem>>, vector<8x512xf32>
    %c0_79 = arith.constant 0 : index
    %c0_80 = arith.constant 0 : index
    %238 = vector.load %arg4[%c0_79, %c0_80] : memref<128x512xf32, #tpu.memory_space<vmem>>, vector<128x512xf32>
    %cst_81 = arith.constant dense<0.000000e+00> : vector<8x512xf32>
    %239 = tpu.matmul %233, %238, %cst_81 {dimension_numbers = #tpu.dot_dimension_numbers<[1], [0], [0], [1], [0, 0, 1, 1], [], []>} : vector<8x128xf32>, vector<128x512xf32>, vector<8x512xf32> -> vector<8x512xf32>
    %240 = arith.addf %237, %239 : vector<8x512xf32>
    %241 = vector.extract_strided_slice %240 {offsets = [0, 0], sizes = [8, 128], strides = [1, 1]} : vector<8x512xf32> to vector<8x128xf32>
    %242 = arith.negf %241 : vector<8x128xf32>
    %243 = math.exp %242 : vector<8x128xf32>
    %cst_82 = arith.constant 1.000000e+00 : f32
    %244 = vector.broadcast %cst_82 : f32 to vector<8x128xf32>
    %245 = arith.addf %244, %243 : vector<8x128xf32>
    %246 = arith.divf %244, %245 : vector<8x128xf32>
    %247 = vector.extract_strided_slice %240 {offsets = [0, 128], sizes = [8, 128], strides = [1, 1]} : vector<8x512xf32> to vector<8x128xf32>
    %248 = arith.negf %247 : vector<8x128xf32>
    %249 = math.exp %248 : vector<8x128xf32>
    %cst_83 = arith.constant 1.000000e+00 : f32
    %250 = vector.broadcast %cst_83 : f32 to vector<8x128xf32>
    %251 = arith.addf %250, %249 : vector<8x128xf32>
    %252 = arith.divf %250, %251 : vector<8x128xf32>
    %253 = vector.extract_strided_slice %240 {offsets = [0, 256], sizes = [8, 128], strides = [1, 1]} : vector<8x512xf32> to vector<8x128xf32>
    %254 = math.tanh %253 : vector<8x128xf32>
    %255 = vector.extract_strided_slice %240 {offsets = [0, 384], sizes = [8, 128], strides = [1, 1]} : vector<8x512xf32> to vector<8x128xf32>
    %256 = arith.negf %255 : vector<8x128xf32>
    %257 = math.exp %256 : vector<8x128xf32>
    %cst_84 = arith.constant 1.000000e+00 : f32
    %258 = vector.broadcast %cst_84 : f32 to vector<8x128xf32>
    %259 = arith.addf %258, %257 : vector<8x128xf32>
    %260 = arith.divf %258, %259 : vector<8x128xf32>
    %261 = arith.mulf %252, %231 : vector<8x128xf32>
    %262 = arith.mulf %246, %254 : vector<8x128xf32>
    %263 = arith.addf %261, %262 : vector<8x128xf32>
    %264 = math.tanh %263 : vector<8x128xf32>
    %265 = arith.mulf %260, %264 : vector<8x128xf32>
    %c7 = arith.constant 7 : index
    %c0_85 = arith.constant 0 : index
    %c0_86 = arith.constant 0 : index
    %266 = vector.load %arg6[%c7, %c0_85, %c0_86] : memref<8x8x128xf32, #tpu.memory_space<vmem>>, vector<1x8x128xf32>
    %267 = vector.shape_cast %266 : vector<1x8x128xf32> to vector<8x128xf32>
    %268 = vector.shape_cast %265 : vector<8x128xf32> to vector<1x8x128xf32>
    tpu.vector_store %arg6[%c7, %c0_85, %c0_86], %268 {strides = array<i32>} : memref<8x8x128xf32, #tpu.memory_space<vmem>>, vector<1x8x128xf32>,
    %c0_87 = arith.constant 0 : index
    %c0_88 = arith.constant 0 : index
    %269 = vector.load %arg8[%c0_87, %c0_88] : memref<8x128xf32, #tpu.memory_space<vmem>>, vector<8x128xf32>
    tpu.vector_store %arg8[%c0_87, %c0_88], %265 {strides = array<i32>} : memref<8x128xf32, #tpu.memory_space<vmem>>, vector<8x128xf32>,
    %c0_89 = arith.constant 0 : index
    %c0_90 = arith.constant 0 : index
    %270 = vector.load %arg9[%c0_89, %c0_90] : memref<8x128xf32, #tpu.memory_space<vmem>>, vector<8x128xf32>
    tpu.vector_store %arg9[%c0_89, %c0_90], %263 {strides = array<i32>} : memref<8x128xf32, #tpu.memory_space<vmem>>, vector<8x128xf32>,
    return
  }
  func.func @transform_0(%arg0: i32, %arg1: i32) -> (i32, i32, i32) {
    %c0_i32 = arith.constant 0 : i32
    %c0_i32_0 = arith.constant 0 : i32
    return %arg1, %arg0, %c0_i32 : i32, i32, i32
  }
  func.func @transform_1(%arg0: i32, %arg1: i32) -> (i32, i32) {
    %c0_i32 = arith.constant 0 : i32
    %c0_i32_0 = arith.constant 0 : i32
    %c0_i32_1 = arith.constant 0 : i32
    return %c0_i32, %c0_i32_0 : i32, i32
  }
  func.func @transform_2(%arg0: i32, %arg1: i32) -> (i32, i32) {
    %c0_i32 = arith.constant 0 : i32
    %c0_i32_0 = arith.constant 0 : i32
    %c0_i32_1 = arith.constant 0 : i32
    return %c0_i32, %c0_i32_0 : i32, i32
  }
  func.func @transform_3(%arg0: i32, %arg1: i32) -> (i32, i32) {
    %c0_i32 = arith.constant 0 : i32
    %c0_i32_0 = arith.constant 0 : i32
    %c0_i32_1 = arith.constant 0 : i32
    return %c0_i32, %c0_i32_0 : i32, i32
  }
  func.func @transform_4(%arg0: i32, %arg1: i32) -> (i32, i32, i32) {
    %c0_i32 = arith.constant 0 : i32
    %c0_i32_0 = arith.constant 0 : i32
    return %arg1, %arg0, %c0_i32 : i32, i32, i32
  }
}

module attributes {stable_mosaic.version = 11 : i64} {
  func.func @_fused_lstm_layer_kernel(%arg0: i32, %arg1: i32, %arg2: memref<8x8x128xf32, #tpu.memory_space<vmem>>, %arg3: memref<128x512xf32, #tpu.memory_space<vmem>>, %arg4: memref<128x512xf32, #tpu.memory_space<vmem>>, %arg5: memref<1x512xf32, #tpu.memory_space<vmem>>, %arg6: memref<8x1024xf32, #tpu.memory_space<vmem>>, %arg7: memref<64x512xf32, #tpu.memory_space<vmem>>, %arg8: memref<8x128xf32, #tpu.memory_space<vmem>>, %arg9: memref<8x128xf32, #tpu.memory_space<vmem>>) attributes {dimension_semantics = [#tpu.dimension_semantics<parallel>, #tpu.dimension_semantics<arbitrary>], iteration_bounds = array<i64: 1, 2>, scalar_prefetch = 0 : i64, scratch_operands = 3 : i64, tpu.core_type = #tpu.core_type<tc>, window_params = [{transform_indices = @transform_0, window_bounds = array<i64: 8, 8, 128>}, {pipeline_mode = #tpu.pipeline_mode<synchronous>, transform_indices = @transform_1, window_bounds = array<i64: 128, 512>}, {pipeline_mode = #tpu.pipeline_mode<synchronous>, transform_indices = @transform_2, window_bounds = array<i64: 128, 512>}, {pipeline_mode = #tpu.pipeline_mode<synchronous>, transform_indices = @transform_3, window_bounds = array<i64: 1, 512>}, {transform_indices = @transform_4, window_bounds = array<i64: 8, 1024>}]} {
    %c0_i32 = arith.constant 0 : i32
    %0 = arith.cmpi eq, %arg1, %c0_i32 : i32
    %1 = arith.extui %0 : i1 to i32
    %c0_i32_0 = arith.constant 0 : i32
    %2 = arith.cmpi ne, %1, %c0_i32_0 : i32
    scf.if %2 {
      %cst_83 = arith.constant 0.000000e+00 : f32
      %255 = vector.broadcast %cst_83 : f32 to vector<8x128xf32>
      %c0_84 = arith.constant 0 : index
      %c0_85 = arith.constant 0 : index
      %256 = vector.load %arg8[%c0_84, %c0_85] : memref<8x128xf32, #tpu.memory_space<vmem>>, vector<8x128xf32>
      tpu.vector_store %arg8[%c0_84, %c0_85], %255 {strides = array<i32>} : memref<8x128xf32, #tpu.memory_space<vmem>>, vector<8x128xf32>,
      %cst_86 = arith.constant 0.000000e+00 : f32
      %257 = vector.broadcast %cst_86 : f32 to vector<8x128xf32>
      %c0_87 = arith.constant 0 : index
      %c0_88 = arith.constant 0 : index
      %258 = vector.load %arg9[%c0_87, %c0_88] : memref<8x128xf32, #tpu.memory_space<vmem>>, vector<8x128xf32>
      tpu.vector_store %arg9[%c0_87, %c0_88], %257 {strides = array<i32>} : memref<8x128xf32, #tpu.memory_space<vmem>>, vector<8x128xf32>,
    } else {
    }
    %c0 = arith.constant 0 : index
    %c0_1 = arith.constant 0 : index
    %c0_2 = arith.constant 0 : index
    %3 = vector.load %arg2[%c0, %c0_1, %c0_2] : memref<8x8x128xf32, #tpu.memory_space<vmem>>, vector<8x8x128xf32>
    %4 = vector.shape_cast %3 : vector<8x8x128xf32> to vector<64x128xf32>
    %c0_3 = arith.constant 0 : index
    %c0_4 = arith.constant 0 : index
    %5 = vector.load %arg3[%c0_3, %c0_4] : memref<128x512xf32, #tpu.memory_space<vmem>>, vector<128x512xf32>
    %cst = arith.constant dense<0.000000e+00> : vector<64x512xf32>
    %6 = tpu.matmul %4, %5, %cst {dimension_numbers = #tpu.dot_dimension_numbers<[1], [0], [0], [1], [0, 0, 1, 1], [], []>} : vector<64x128xf32>, vector<128x512xf32>, vector<64x512xf32> -> vector<64x512xf32>
    %c0_5 = arith.constant 0 : index
    %c0_6 = arith.constant 0 : index
    %7 = vector.load %arg5[%c0_5, %c0_6] : memref<1x512xf32, #tpu.memory_space<vmem>>, vector<1x512xf32>
    %8 = vector.broadcast %7 : vector<1x512xf32> to vector<64x512xf32>
    %9 = arith.addf %6, %8 : vector<64x512xf32>
    %c0_7 = arith.constant 0 : index
    %c0_8 = arith.constant 0 : index
    %10 = vector.load %arg7[%c0_7, %c0_8] : memref<64x512xf32, #tpu.memory_space<vmem>>, vector<64x512xf32>
    tpu.vector_store %arg7[%c0_7, %c0_8], %9 {strides = array<i32>} : memref<64x512xf32, #tpu.memory_space<vmem>>, vector<64x512xf32>,
    %c0_9 = arith.constant 0 : index
    %c0_10 = arith.constant 0 : index
    %11 = vector.load %arg8[%c0_9, %c0_10] : memref<8x128xf32, #tpu.memory_space<vmem>>, vector<8x128xf32>
    %c0_11 = arith.constant 0 : index
    %c0_12 = arith.constant 0 : index
    %12 = vector.load %arg9[%c0_11, %c0_12] : memref<8x128xf32, #tpu.memory_space<vmem>>, vector<8x128xf32>
    %c0_13 = arith.constant 0 : index
    %c0_14 = arith.constant 0 : index
    %13 = vector.load %arg7[%c0_13, %c0_14] : memref<64x512xf32, #tpu.memory_space<vmem>>, vector<8x512xf32>
    %c0_15 = arith.constant 0 : index
    %c0_16 = arith.constant 0 : index
    %14 = vector.load %arg4[%c0_15, %c0_16] : memref<128x512xf32, #tpu.memory_space<vmem>>, vector<128x512xf32>
    %cst_17 = arith.constant dense<0.000000e+00> : vector<8x512xf32>
    %15 = tpu.matmul %11, %14, %cst_17 {dimension_numbers = #tpu.dot_dimension_numbers<[1], [0], [0], [1], [0, 0, 1, 1], [], []>} : vector<8x128xf32>, vector<128x512xf32>, vector<8x512xf32> -> vector<8x512xf32>
    %16 = arith.addf %13, %15 : vector<8x512xf32>
    %17 = vector.extract_strided_slice %16 {offsets = [0, 0], sizes = [8, 128], strides = [1, 1]} : vector<8x512xf32> to vector<8x128xf32>
    %18 = arith.negf %17 : vector<8x128xf32>
    %19 = math.exp %18 : vector<8x128xf32>
    %cst_18 = arith.constant 1.000000e+00 : f32
    %20 = vector.broadcast %cst_18 : f32 to vector<8x128xf32>
    %21 = arith.addf %20, %19 : vector<8x128xf32>
    %22 = arith.divf %20, %21 : vector<8x128xf32>
    %23 = vector.extract_strided_slice %16 {offsets = [0, 128], sizes = [8, 128], strides = [1, 1]} : vector<8x512xf32> to vector<8x128xf32>
    %24 = arith.negf %23 : vector<8x128xf32>
    %25 = math.exp %24 : vector<8x128xf32>
    %cst_19 = arith.constant 1.000000e+00 : f32
    %26 = vector.broadcast %cst_19 : f32 to vector<8x128xf32>
    %27 = arith.addf %26, %25 : vector<8x128xf32>
    %28 = arith.divf %26, %27 : vector<8x128xf32>
    %29 = vector.extract_strided_slice %16 {offsets = [0, 256], sizes = [8, 128], strides = [1, 1]} : vector<8x512xf32> to vector<8x128xf32>
    %30 = math.tanh %29 : vector<8x128xf32>
    %31 = vector.extract_strided_slice %16 {offsets = [0, 384], sizes = [8, 128], strides = [1, 1]} : vector<8x512xf32> to vector<8x128xf32>
    %32 = arith.negf %31 : vector<8x128xf32>
    %33 = math.exp %32 : vector<8x128xf32>
    %cst_20 = arith.constant 1.000000e+00 : f32
    %34 = vector.broadcast %cst_20 : f32 to vector<8x128xf32>
    %35 = arith.addf %34, %33 : vector<8x128xf32>
    %36 = arith.divf %34, %35 : vector<8x128xf32>
    %37 = arith.mulf %28, %12 : vector<8x128xf32>
    %38 = arith.mulf %22, %30 : vector<8x128xf32>
    %39 = arith.addf %37, %38 : vector<8x128xf32>
    %40 = math.tanh %39 : vector<8x128xf32>
    %41 = arith.mulf %36, %40 : vector<8x128xf32>
    %c0_21 = arith.constant 0 : index
    %c0_22 = arith.constant 0 : index
    %42 = vector.load %arg6[%c0_21, %c0_22] : memref<8x1024xf32, #tpu.memory_space<vmem>>, vector<8x128xf32>
    tpu.vector_store %arg6[%c0_21, %c0_22], %41 {strides = array<i32>} : memref<8x1024xf32, #tpu.memory_space<vmem>>, vector<8x128xf32>,
    %c8 = arith.constant 8 : index
    %c0_23 = arith.constant 0 : index
    %43 = vector.load %arg7[%c8, %c0_23] : memref<64x512xf32, #tpu.memory_space<vmem>>, vector<8x512xf32>
    %c0_24 = arith.constant 0 : index
    %c0_25 = arith.constant 0 : index
    %44 = vector.load %arg4[%c0_24, %c0_25] : memref<128x512xf32, #tpu.memory_space<vmem>>, vector<128x512xf32>
    %cst_26 = arith.constant dense<0.000000e+00> : vector<8x512xf32>
    %45 = tpu.matmul %41, %44, %cst_26 {dimension_numbers = #tpu.dot_dimension_numbers<[1], [0], [0], [1], [0, 0, 1, 1], [], []>} : vector<8x128xf32>, vector<128x512xf32>, vector<8x512xf32> -> vector<8x512xf32>
    %46 = arith.addf %43, %45 : vector<8x512xf32>
    %47 = vector.extract_strided_slice %46 {offsets = [0, 0], sizes = [8, 128], strides = [1, 1]} : vector<8x512xf32> to vector<8x128xf32>
    %48 = arith.negf %47 : vector<8x128xf32>
    %49 = math.exp %48 : vector<8x128xf32>
    %cst_27 = arith.constant 1.000000e+00 : f32
    %50 = vector.broadcast %cst_27 : f32 to vector<8x128xf32>
    %51 = arith.addf %50, %49 : vector<8x128xf32>
    %52 = arith.divf %50, %51 : vector<8x128xf32>
    %53 = vector.extract_strided_slice %46 {offsets = [0, 128], sizes = [8, 128], strides = [1, 1]} : vector<8x512xf32> to vector<8x128xf32>
    %54 = arith.negf %53 : vector<8x128xf32>
    %55 = math.exp %54 : vector<8x128xf32>
    %cst_28 = arith.constant 1.000000e+00 : f32
    %56 = vector.broadcast %cst_28 : f32 to vector<8x128xf32>
    %57 = arith.addf %56, %55 : vector<8x128xf32>
    %58 = arith.divf %56, %57 : vector<8x128xf32>
    %59 = vector.extract_strided_slice %46 {offsets = [0, 256], sizes = [8, 128], strides = [1, 1]} : vector<8x512xf32> to vector<8x128xf32>
    %60 = math.tanh %59 : vector<8x128xf32>
    %61 = vector.extract_strided_slice %46 {offsets = [0, 384], sizes = [8, 128], strides = [1, 1]} : vector<8x512xf32> to vector<8x128xf32>
    %62 = arith.negf %61 : vector<8x128xf32>
    %63 = math.exp %62 : vector<8x128xf32>
    %cst_29 = arith.constant 1.000000e+00 : f32
    %64 = vector.broadcast %cst_29 : f32 to vector<8x128xf32>
    %65 = arith.addf %64, %63 : vector<8x128xf32>
    %66 = arith.divf %64, %65 : vector<8x128xf32>
    %67 = arith.mulf %58, %39 : vector<8x128xf32>
    %68 = arith.mulf %52, %60 : vector<8x128xf32>
    %69 = arith.addf %67, %68 : vector<8x128xf32>
    %70 = math.tanh %69 : vector<8x128xf32>
    %71 = arith.mulf %66, %70 : vector<8x128xf32>
    %c0_30 = arith.constant 0 : index
    %c128 = arith.constant 128 : index
    %72 = vector.load %arg6[%c0_30, %c128] : memref<8x1024xf32, #tpu.memory_space<vmem>>, vector<8x128xf32>
    tpu.vector_store %arg6[%c0_30, %c128], %71 {strides = array<i32>} : memref<8x1024xf32, #tpu.memory_space<vmem>>, vector<8x128xf32>,
    %c16 = arith.constant 16 : index
    %c0_31 = arith.constant 0 : index
    %73 = vector.load %arg7[%c16, %c0_31] : memref<64x512xf32, #tpu.memory_space<vmem>>, vector<8x512xf32>
    %c0_32 = arith.constant 0 : index
    %c0_33 = arith.constant 0 : index
    %74 = vector.load %arg4[%c0_32, %c0_33] : memref<128x512xf32, #tpu.memory_space<vmem>>, vector<128x512xf32>
    %cst_34 = arith.constant dense<0.000000e+00> : vector<8x512xf32>
    %75 = tpu.matmul %71, %74, %cst_34 {dimension_numbers = #tpu.dot_dimension_numbers<[1], [0], [0], [1], [0, 0, 1, 1], [], []>} : vector<8x128xf32>, vector<128x512xf32>, vector<8x512xf32> -> vector<8x512xf32>
    %76 = arith.addf %73, %75 : vector<8x512xf32>
    %77 = vector.extract_strided_slice %76 {offsets = [0, 0], sizes = [8, 128], strides = [1, 1]} : vector<8x512xf32> to vector<8x128xf32>
    %78 = arith.negf %77 : vector<8x128xf32>
    %79 = math.exp %78 : vector<8x128xf32>
    %cst_35 = arith.constant 1.000000e+00 : f32
    %80 = vector.broadcast %cst_35 : f32 to vector<8x128xf32>
    %81 = arith.addf %80, %79 : vector<8x128xf32>
    %82 = arith.divf %80, %81 : vector<8x128xf32>
    %83 = vector.extract_strided_slice %76 {offsets = [0, 128], sizes = [8, 128], strides = [1, 1]} : vector<8x512xf32> to vector<8x128xf32>
    %84 = arith.negf %83 : vector<8x128xf32>
    %85 = math.exp %84 : vector<8x128xf32>
    %cst_36 = arith.constant 1.000000e+00 : f32
    %86 = vector.broadcast %cst_36 : f32 to vector<8x128xf32>
    %87 = arith.addf %86, %85 : vector<8x128xf32>
    %88 = arith.divf %86, %87 : vector<8x128xf32>
    %89 = vector.extract_strided_slice %76 {offsets = [0, 256], sizes = [8, 128], strides = [1, 1]} : vector<8x512xf32> to vector<8x128xf32>
    %90 = math.tanh %89 : vector<8x128xf32>
    %91 = vector.extract_strided_slice %76 {offsets = [0, 384], sizes = [8, 128], strides = [1, 1]} : vector<8x512xf32> to vector<8x128xf32>
    %92 = arith.negf %91 : vector<8x128xf32>
    %93 = math.exp %92 : vector<8x128xf32>
    %cst_37 = arith.constant 1.000000e+00 : f32
    %94 = vector.broadcast %cst_37 : f32 to vector<8x128xf32>
    %95 = arith.addf %94, %93 : vector<8x128xf32>
    %96 = arith.divf %94, %95 : vector<8x128xf32>
    %97 = arith.mulf %88, %69 : vector<8x128xf32>
    %98 = arith.mulf %82, %90 : vector<8x128xf32>
    %99 = arith.addf %97, %98 : vector<8x128xf32>
    %100 = math.tanh %99 : vector<8x128xf32>
    %101 = arith.mulf %96, %100 : vector<8x128xf32>
    %c0_38 = arith.constant 0 : index
    %c256 = arith.constant 256 : index
    %102 = vector.load %arg6[%c0_38, %c256] : memref<8x1024xf32, #tpu.memory_space<vmem>>, vector<8x128xf32>
    tpu.vector_store %arg6[%c0_38, %c256], %101 {strides = array<i32>} : memref<8x1024xf32, #tpu.memory_space<vmem>>, vector<8x128xf32>,
    %c24 = arith.constant 24 : index
    %c0_39 = arith.constant 0 : index
    %103 = vector.load %arg7[%c24, %c0_39] : memref<64x512xf32, #tpu.memory_space<vmem>>, vector<8x512xf32>
    %c0_40 = arith.constant 0 : index
    %c0_41 = arith.constant 0 : index
    %104 = vector.load %arg4[%c0_40, %c0_41] : memref<128x512xf32, #tpu.memory_space<vmem>>, vector<128x512xf32>
    %cst_42 = arith.constant dense<0.000000e+00> : vector<8x512xf32>
    %105 = tpu.matmul %101, %104, %cst_42 {dimension_numbers = #tpu.dot_dimension_numbers<[1], [0], [0], [1], [0, 0, 1, 1], [], []>} : vector<8x128xf32>, vector<128x512xf32>, vector<8x512xf32> -> vector<8x512xf32>
    %106 = arith.addf %103, %105 : vector<8x512xf32>
    %107 = vector.extract_strided_slice %106 {offsets = [0, 0], sizes = [8, 128], strides = [1, 1]} : vector<8x512xf32> to vector<8x128xf32>
    %108 = arith.negf %107 : vector<8x128xf32>
    %109 = math.exp %108 : vector<8x128xf32>
    %cst_43 = arith.constant 1.000000e+00 : f32
    %110 = vector.broadcast %cst_43 : f32 to vector<8x128xf32>
    %111 = arith.addf %110, %109 : vector<8x128xf32>
    %112 = arith.divf %110, %111 : vector<8x128xf32>
    %113 = vector.extract_strided_slice %106 {offsets = [0, 128], sizes = [8, 128], strides = [1, 1]} : vector<8x512xf32> to vector<8x128xf32>
    %114 = arith.negf %113 : vector<8x128xf32>
    %115 = math.exp %114 : vector<8x128xf32>
    %cst_44 = arith.constant 1.000000e+00 : f32
    %116 = vector.broadcast %cst_44 : f32 to vector<8x128xf32>
    %117 = arith.addf %116, %115 : vector<8x128xf32>
    %118 = arith.divf %116, %117 : vector<8x128xf32>
    %119 = vector.extract_strided_slice %106 {offsets = [0, 256], sizes = [8, 128], strides = [1, 1]} : vector<8x512xf32> to vector<8x128xf32>
    %120 = math.tanh %119 : vector<8x128xf32>
    %121 = vector.extract_strided_slice %106 {offsets = [0, 384], sizes = [8, 128], strides = [1, 1]} : vector<8x512xf32> to vector<8x128xf32>
    %122 = arith.negf %121 : vector<8x128xf32>
    %123 = math.exp %122 : vector<8x128xf32>
    %cst_45 = arith.constant 1.000000e+00 : f32
    %124 = vector.broadcast %cst_45 : f32 to vector<8x128xf32>
    %125 = arith.addf %124, %123 : vector<8x128xf32>
    %126 = arith.divf %124, %125 : vector<8x128xf32>
    %127 = arith.mulf %118, %99 : vector<8x128xf32>
    %128 = arith.mulf %112, %120 : vector<8x128xf32>
    %129 = arith.addf %127, %128 : vector<8x128xf32>
    %130 = math.tanh %129 : vector<8x128xf32>
    %131 = arith.mulf %126, %130 : vector<8x128xf32>
    %c0_46 = arith.constant 0 : index
    %c384 = arith.constant 384 : index
    %132 = vector.load %arg6[%c0_46, %c384] : memref<8x1024xf32, #tpu.memory_space<vmem>>, vector<8x128xf32>
    tpu.vector_store %arg6[%c0_46, %c384], %131 {strides = array<i32>} : memref<8x1024xf32, #tpu.memory_space<vmem>>, vector<8x128xf32>,
    %c32 = arith.constant 32 : index
    %c0_47 = arith.constant 0 : index
    %133 = vector.load %arg7[%c32, %c0_47] : memref<64x512xf32, #tpu.memory_space<vmem>>, vector<8x512xf32>
    %c0_48 = arith.constant 0 : index
    %c0_49 = arith.constant 0 : index
    %134 = vector.load %arg4[%c0_48, %c0_49] : memref<128x512xf32, #tpu.memory_space<vmem>>, vector<128x512xf32>
    %cst_50 = arith.constant dense<0.000000e+00> : vector<8x512xf32>
    %135 = tpu.matmul %131, %134, %cst_50 {dimension_numbers = #tpu.dot_dimension_numbers<[1], [0], [0], [1], [0, 0, 1, 1], [], []>} : vector<8x128xf32>, vector<128x512xf32>, vector<8x512xf32> -> vector<8x512xf32>
    %136 = arith.addf %133, %135 : vector<8x512xf32>
    %137 = vector.extract_strided_slice %136 {offsets = [0, 0], sizes = [8, 128], strides = [1, 1]} : vector<8x512xf32> to vector<8x128xf32>
    %138 = arith.negf %137 : vector<8x128xf32>
    %139 = math.exp %138 : vector<8x128xf32>
    %cst_51 = arith.constant 1.000000e+00 : f32
    %140 = vector.broadcast %cst_51 : f32 to vector<8x128xf32>
    %141 = arith.addf %140, %139 : vector<8x128xf32>
    %142 = arith.divf %140, %141 : vector<8x128xf32>
    %143 = vector.extract_strided_slice %136 {offsets = [0, 128], sizes = [8, 128], strides = [1, 1]} : vector<8x512xf32> to vector<8x128xf32>
    %144 = arith.negf %143 : vector<8x128xf32>
    %145 = math.exp %144 : vector<8x128xf32>
    %cst_52 = arith.constant 1.000000e+00 : f32
    %146 = vector.broadcast %cst_52 : f32 to vector<8x128xf32>
    %147 = arith.addf %146, %145 : vector<8x128xf32>
    %148 = arith.divf %146, %147 : vector<8x128xf32>
    %149 = vector.extract_strided_slice %136 {offsets = [0, 256], sizes = [8, 128], strides = [1, 1]} : vector<8x512xf32> to vector<8x128xf32>
    %150 = math.tanh %149 : vector<8x128xf32>
    %151 = vector.extract_strided_slice %136 {offsets = [0, 384], sizes = [8, 128], strides = [1, 1]} : vector<8x512xf32> to vector<8x128xf32>
    %152 = arith.negf %151 : vector<8x128xf32>
    %153 = math.exp %152 : vector<8x128xf32>
    %cst_53 = arith.constant 1.000000e+00 : f32
    %154 = vector.broadcast %cst_53 : f32 to vector<8x128xf32>
    %155 = arith.addf %154, %153 : vector<8x128xf32>
    %156 = arith.divf %154, %155 : vector<8x128xf32>
    %157 = arith.mulf %148, %129 : vector<8x128xf32>
    %158 = arith.mulf %142, %150 : vector<8x128xf32>
    %159 = arith.addf %157, %158 : vector<8x128xf32>
    %160 = math.tanh %159 : vector<8x128xf32>
    %161 = arith.mulf %156, %160 : vector<8x128xf32>
    %c0_54 = arith.constant 0 : index
    %c512 = arith.constant 512 : index
    %162 = vector.load %arg6[%c0_54, %c512] : memref<8x1024xf32, #tpu.memory_space<vmem>>, vector<8x128xf32>
    tpu.vector_store %arg6[%c0_54, %c512], %161 {strides = array<i32>} : memref<8x1024xf32, #tpu.memory_space<vmem>>, vector<8x128xf32>,
    %c40 = arith.constant 40 : index
    %c0_55 = arith.constant 0 : index
    %163 = vector.load %arg7[%c40, %c0_55] : memref<64x512xf32, #tpu.memory_space<vmem>>, vector<8x512xf32>
    %c0_56 = arith.constant 0 : index
    %c0_57 = arith.constant 0 : index
    %164 = vector.load %arg4[%c0_56, %c0_57] : memref<128x512xf32, #tpu.memory_space<vmem>>, vector<128x512xf32>
    %cst_58 = arith.constant dense<0.000000e+00> : vector<8x512xf32>
    %165 = tpu.matmul %161, %164, %cst_58 {dimension_numbers = #tpu.dot_dimension_numbers<[1], [0], [0], [1], [0, 0, 1, 1], [], []>} : vector<8x128xf32>, vector<128x512xf32>, vector<8x512xf32> -> vector<8x512xf32>
    %166 = arith.addf %163, %165 : vector<8x512xf32>
    %167 = vector.extract_strided_slice %166 {offsets = [0, 0], sizes = [8, 128], strides = [1, 1]} : vector<8x512xf32> to vector<8x128xf32>
    %168 = arith.negf %167 : vector<8x128xf32>
    %169 = math.exp %168 : vector<8x128xf32>
    %cst_59 = arith.constant 1.000000e+00 : f32
    %170 = vector.broadcast %cst_59 : f32 to vector<8x128xf32>
    %171 = arith.addf %170, %169 : vector<8x128xf32>
    %172 = arith.divf %170, %171 : vector<8x128xf32>
    %173 = vector.extract_strided_slice %166 {offsets = [0, 128], sizes = [8, 128], strides = [1, 1]} : vector<8x512xf32> to vector<8x128xf32>
    %174 = arith.negf %173 : vector<8x128xf32>
    %175 = math.exp %174 : vector<8x128xf32>
    %cst_60 = arith.constant 1.000000e+00 : f32
    %176 = vector.broadcast %cst_60 : f32 to vector<8x128xf32>
    %177 = arith.addf %176, %175 : vector<8x128xf32>
    %178 = arith.divf %176, %177 : vector<8x128xf32>
    %179 = vector.extract_strided_slice %166 {offsets = [0, 256], sizes = [8, 128], strides = [1, 1]} : vector<8x512xf32> to vector<8x128xf32>
    %180 = math.tanh %179 : vector<8x128xf32>
    %181 = vector.extract_strided_slice %166 {offsets = [0, 384], sizes = [8, 128], strides = [1, 1]} : vector<8x512xf32> to vector<8x128xf32>
    %182 = arith.negf %181 : vector<8x128xf32>
    %183 = math.exp %182 : vector<8x128xf32>
    %cst_61 = arith.constant 1.000000e+00 : f32
    %184 = vector.broadcast %cst_61 : f32 to vector<8x128xf32>
    %185 = arith.addf %184, %183 : vector<8x128xf32>
    %186 = arith.divf %184, %185 : vector<8x128xf32>
    %187 = arith.mulf %178, %159 : vector<8x128xf32>
    %188 = arith.mulf %172, %180 : vector<8x128xf32>
    %189 = arith.addf %187, %188 : vector<8x128xf32>
    %190 = math.tanh %189 : vector<8x128xf32>
    %191 = arith.mulf %186, %190 : vector<8x128xf32>
    %c0_62 = arith.constant 0 : index
    %c640 = arith.constant 640 : index
    %192 = vector.load %arg6[%c0_62, %c640] : memref<8x1024xf32, #tpu.memory_space<vmem>>, vector<8x128xf32>
    tpu.vector_store %arg6[%c0_62, %c640], %191 {strides = array<i32>} : memref<8x1024xf32, #tpu.memory_space<vmem>>, vector<8x128xf32>,
    %c48 = arith.constant 48 : index
    %c0_63 = arith.constant 0 : index
    %193 = vector.load %arg7[%c48, %c0_63] : memref<64x512xf32, #tpu.memory_space<vmem>>, vector<8x512xf32>
    %c0_64 = arith.constant 0 : index
    %c0_65 = arith.constant 0 : index
    %194 = vector.load %arg4[%c0_64, %c0_65] : memref<128x512xf32, #tpu.memory_space<vmem>>, vector<128x512xf32>
    %cst_66 = arith.constant dense<0.000000e+00> : vector<8x512xf32>
    %195 = tpu.matmul %191, %194, %cst_66 {dimension_numbers = #tpu.dot_dimension_numbers<[1], [0], [0], [1], [0, 0, 1, 1], [], []>} : vector<8x128xf32>, vector<128x512xf32>, vector<8x512xf32> -> vector<8x512xf32>
    %196 = arith.addf %193, %195 : vector<8x512xf32>
    %197 = vector.extract_strided_slice %196 {offsets = [0, 0], sizes = [8, 128], strides = [1, 1]} : vector<8x512xf32> to vector<8x128xf32>
    %198 = arith.negf %197 : vector<8x128xf32>
    %199 = math.exp %198 : vector<8x128xf32>
    %cst_67 = arith.constant 1.000000e+00 : f32
    %200 = vector.broadcast %cst_67 : f32 to vector<8x128xf32>
    %201 = arith.addf %200, %199 : vector<8x128xf32>
    %202 = arith.divf %200, %201 : vector<8x128xf32>
    %203 = vector.extract_strided_slice %196 {offsets = [0, 128], sizes = [8, 128], strides = [1, 1]} : vector<8x512xf32> to vector<8x128xf32>
    %204 = arith.negf %203 : vector<8x128xf32>
    %205 = math.exp %204 : vector<8x128xf32>
    %cst_68 = arith.constant 1.000000e+00 : f32
    %206 = vector.broadcast %cst_68 : f32 to vector<8x128xf32>
    %207 = arith.addf %206, %205 : vector<8x128xf32>
    %208 = arith.divf %206, %207 : vector<8x128xf32>
    %209 = vector.extract_strided_slice %196 {offsets = [0, 256], sizes = [8, 128], strides = [1, 1]} : vector<8x512xf32> to vector<8x128xf32>
    %210 = math.tanh %209 : vector<8x128xf32>
    %211 = vector.extract_strided_slice %196 {offsets = [0, 384], sizes = [8, 128], strides = [1, 1]} : vector<8x512xf32> to vector<8x128xf32>
    %212 = arith.negf %211 : vector<8x128xf32>
    %213 = math.exp %212 : vector<8x128xf32>
    %cst_69 = arith.constant 1.000000e+00 : f32
    %214 = vector.broadcast %cst_69 : f32 to vector<8x128xf32>
    %215 = arith.addf %214, %213 : vector<8x128xf32>
    %216 = arith.divf %214, %215 : vector<8x128xf32>
    %217 = arith.mulf %208, %189 : vector<8x128xf32>
    %218 = arith.mulf %202, %210 : vector<8x128xf32>
    %219 = arith.addf %217, %218 : vector<8x128xf32>
    %220 = math.tanh %219 : vector<8x128xf32>
    %221 = arith.mulf %216, %220 : vector<8x128xf32>
    %c0_70 = arith.constant 0 : index
    %c768 = arith.constant 768 : index
    %222 = vector.load %arg6[%c0_70, %c768] : memref<8x1024xf32, #tpu.memory_space<vmem>>, vector<8x128xf32>
    tpu.vector_store %arg6[%c0_70, %c768], %221 {strides = array<i32>} : memref<8x1024xf32, #tpu.memory_space<vmem>>, vector<8x128xf32>,
    %c56 = arith.constant 56 : index
    %c0_71 = arith.constant 0 : index
    %223 = vector.load %arg7[%c56, %c0_71] : memref<64x512xf32, #tpu.memory_space<vmem>>, vector<8x512xf32>
    %c0_72 = arith.constant 0 : index
    %c0_73 = arith.constant 0 : index
    %224 = vector.load %arg4[%c0_72, %c0_73] : memref<128x512xf32, #tpu.memory_space<vmem>>, vector<128x512xf32>
    %cst_74 = arith.constant dense<0.000000e+00> : vector<8x512xf32>
    %225 = tpu.matmul %221, %224, %cst_74 {dimension_numbers = #tpu.dot_dimension_numbers<[1], [0], [0], [1], [0, 0, 1, 1], [], []>} : vector<8x128xf32>, vector<128x512xf32>, vector<8x512xf32> -> vector<8x512xf32>
    %226 = arith.addf %223, %225 : vector<8x512xf32>
    %227 = vector.extract_strided_slice %226 {offsets = [0, 0], sizes = [8, 128], strides = [1, 1]} : vector<8x512xf32> to vector<8x128xf32>
    %228 = arith.negf %227 : vector<8x128xf32>
    %229 = math.exp %228 : vector<8x128xf32>
    %cst_75 = arith.constant 1.000000e+00 : f32
    %230 = vector.broadcast %cst_75 : f32 to vector<8x128xf32>
    %231 = arith.addf %230, %229 : vector<8x128xf32>
    %232 = arith.divf %230, %231 : vector<8x128xf32>
    %233 = vector.extract_strided_slice %226 {offsets = [0, 128], sizes = [8, 128], strides = [1, 1]} : vector<8x512xf32> to vector<8x128xf32>
    %234 = arith.negf %233 : vector<8x128xf32>
    %235 = math.exp %234 : vector<8x128xf32>
    %cst_76 = arith.constant 1.000000e+00 : f32
    %236 = vector.broadcast %cst_76 : f32 to vector<8x128xf32>
    %237 = arith.addf %236, %235 : vector<8x128xf32>
    %238 = arith.divf %236, %237 : vector<8x128xf32>
    %239 = vector.extract_strided_slice %226 {offsets = [0, 256], sizes = [8, 128], strides = [1, 1]} : vector<8x512xf32> to vector<8x128xf32>
    %240 = math.tanh %239 : vector<8x128xf32>
    %241 = vector.extract_strided_slice %226 {offsets = [0, 384], sizes = [8, 128], strides = [1, 1]} : vector<8x512xf32> to vector<8x128xf32>
    %242 = arith.negf %241 : vector<8x128xf32>
    %243 = math.exp %242 : vector<8x128xf32>
    %cst_77 = arith.constant 1.000000e+00 : f32
    %244 = vector.broadcast %cst_77 : f32 to vector<8x128xf32>
    %245 = arith.addf %244, %243 : vector<8x128xf32>
    %246 = arith.divf %244, %245 : vector<8x128xf32>
    %247 = arith.mulf %238, %219 : vector<8x128xf32>
    %248 = arith.mulf %232, %240 : vector<8x128xf32>
    %249 = arith.addf %247, %248 : vector<8x128xf32>
    %250 = math.tanh %249 : vector<8x128xf32>
    %251 = arith.mulf %246, %250 : vector<8x128xf32>
    %c0_78 = arith.constant 0 : index
    %c896 = arith.constant 896 : index
    %252 = vector.load %arg6[%c0_78, %c896] : memref<8x1024xf32, #tpu.memory_space<vmem>>, vector<8x128xf32>
    tpu.vector_store %arg6[%c0_78, %c896], %251 {strides = array<i32>} : memref<8x1024xf32, #tpu.memory_space<vmem>>, vector<8x128xf32>,
    %c0_79 = arith.constant 0 : index
    %c0_80 = arith.constant 0 : index
    %253 = vector.load %arg8[%c0_79, %c0_80] : memref<8x128xf32, #tpu.memory_space<vmem>>, vector<8x128xf32>
    tpu.vector_store %arg8[%c0_79, %c0_80], %251 {strides = array<i32>} : memref<8x128xf32, #tpu.memory_space<vmem>>, vector<8x128xf32>,
    %c0_81 = arith.constant 0 : index
    %c0_82 = arith.constant 0 : index
    %254 = vector.load %arg9[%c0_81, %c0_82] : memref<8x128xf32, #tpu.memory_space<vmem>>, vector<8x128xf32>
    tpu.vector_store %arg9[%c0_81, %c0_82], %249 {strides = array<i32>} : memref<8x128xf32, #tpu.memory_space<vmem>>, vector<8x128xf32>,
    return
  }
  func.func @transform_0(%arg0: i32, %arg1: i32) -> (i32, i32, i32) {
    %c0_i32 = arith.constant 0 : i32
    %c0_i32_0 = arith.constant 0 : i32
    return %arg1, %arg0, %c0_i32 : i32, i32, i32
  }
  func.func @transform_1(%arg0: i32, %arg1: i32) -> (i32, i32) {
    %c0_i32 = arith.constant 0 : i32
    %c0_i32_0 = arith.constant 0 : i32
    %c0_i32_1 = arith.constant 0 : i32
    return %c0_i32, %c0_i32_0 : i32, i32
  }
  func.func @transform_2(%arg0: i32, %arg1: i32) -> (i32, i32) {
    %c0_i32 = arith.constant 0 : i32
    %c0_i32_0 = arith.constant 0 : i32
    %c0_i32_1 = arith.constant 0 : i32
    return %c0_i32, %c0_i32_0 : i32, i32
  }
  func.func @transform_3(%arg0: i32, %arg1: i32) -> (i32, i32) {
    %c0_i32 = arith.constant 0 : i32
    %c0_i32_0 = arith.constant 0 : i32
    %c0_i32_1 = arith.constant 0 : i32
    return %c0_i32, %c0_i32_0 : i32, i32
  }
  func.func @transform_4(%arg0: i32, %arg1: i32) -> (i32, i32) {
    %c0_i32 = arith.constant 0 : i32
    return %arg0, %arg1 : i32, i32
  }
}

</mosaic_0001>

<bundles_post_ra>
// kernel: better_lstm_forward.2
= control target key start
LH: loop header
LB: loop body
LE: loop exit
PB: predicated region body
PF: predicated region fallthrough
CT: control target
= control target key end

     0   :  { %9 = vsyncpa [#allocation6], 0  ;;  %s2912_s15 = smov 0   ;;  %s2914_s16 = smov 0   ;;  %s3892_s0 = inlined_call_operand.vmem [shape: f32[16,8,4], index: 0, kind: input, shape index: {}]   ;;  %s3893_s1 = inlined_call_operand.vmem [shape: f32[4,512], index: 1, kind: input, shape index: {}]   ;;  %s3894_s2 = inlined_call_operand.hbm [shape: f32[128,512], index: 2, kind: input, shape index: {}]   ;;  %s3895_s3 = inlined_call_operand.vmem [shape: f32[1,512], index: 3, kind: input, shape index: {}]   ;;  %s3896_s4 = inlined_call_operand.vmem [shape: f32[16,8,128], index: 4, kind: output, shape index: {}]  }
   0x1   :  { %s2916_s17 = smov 0  }
   0x2 LB: > { %s2594_s18 = sadd.s32 4294967295, %s2880_s17   ;;  %s24_s19 = sadd.s32 1, %s2876_s16  ;;  %s2880_s17 = sphi %s2916_s17, %s15_s17   ;;  %s2876_s16 = sphi %s2914_s16, %s4143_s16   ;;  %s2872_s15 = sphi %s2912_s15, %s4142_s15  }
   0x3   : > { %p25_p0 = scmp.ge.s32.totalorder %s24_s19, 2  ;;  %p2596_p1 = scmp.ge.s32.totalorder %s2880_s17, 1 }
   0x4   : > { %p151_p2 = scmp.lt.s32.totalorder %s2880_s17, 3  ;;  %p2937_p4 = scmp.eq.s32.totalorder %s2594_s18, 0 }
   0x5   : > { %s4145_s19 = smov (%p25_p0, %s24_s19), 0  ;;  %s2882_s22 = smov [#allocation5]  }
   0x6   : > { %p2933_p3 = pnand %p2596_p1, %p151_p2  ;;  %s166_s23 = sshll.u32 %s2882_s22, 4  ;;  %s167_s23 = int_to_ptr.vmem [resolvable:$true] %s166_s23 }
   0x7   : > { %s2839_s24 = scalar_lea.vmem %s167_s23, 8192  ;;  %p2847_p11 = scmp.lt.s32.totalorder %s167_s23, %s167_s23 }
   0x8   : > { %p2663_p5 = pneg %p2933_p3  ;;  %p2840_p8 = scmp.ne.s32.totalorder %s167_s23, %s2839_s24 }
   0x9   : > { %p2848_p12 = scmp.lt.s32.totalorder %s2839_s24, %s2839_s24 }
   0xa   : > { %p2664_p6 = pnand %p2937_p4, %p2663_p5 }
   0xb   : > { %p2849_p13 = por %p2848_p12, %p2847_p11 }
   0xc   : > { %p2830_p7 = pneg %p2664_p6 }
   0xe   : > { %p2842_p9 = pnand %p2840_p8, %p2830_p7 }
  0x10   : > { %p2843_p10 = pneg %p2842_p9 }
  0x12   : > { %p2850_p0 = pnand %p2849_p13, %p2843_p10 }
  0x14   : > { %2853 = shalt.err (!%p2850_p0)
}
  0x15   : > { %s2883_s25 = smov 512   ;;  %s2884_s26 = smov 32  }
  0x16   : > { %2666 = dma.hbm_to_vmem [thread:$0]  (!%p2664_p6), %s3894_s2, 8192, %s167_s23, [#allocation6], %s2883_s25, %s2883_s25, %s2884_s26  }
  0x17   : > { %197 = sbr.rel (%p2933_p3) target bundleno = 2084 (0x824), region = 36 }
  0x1c   : > { %2867 = dma.done.wait (%p2937_p4), [#allocation6], 8192  }
  0x1d   : > { %2869 = vsyncadd (%p2937_p4), [#allocation6], 4294959104  ;;  %s2601_s29 = sshll.u32 %s2872_s15, 3  ;;  %p2605_p2 = scmp.ne.s32.totalorder %s2872_s15, 0 }
  0x1e   : > { %p230_p1 = scmp.lt.s32.totalorder %s2601_s29, 15 }
  0x1f   : > { %250 = sbr.rel (%p2605_p2) target bundleno = 38 (0x26), region = 44 }
  0x20   : > { %s4147_s29 = smov (!%p230_p1, %s2601_s29), 15 }
  0x21   : > { %s2602_s30 = sshll.u32 %s4147_s29, 3 }
  0x22   : > { %s2958_s7 = scalar_lea.vmem %s3892_s0, %s2602_s30  ;;  %s2963_s10 = scalar_lea.vmem %s3896_s4, %s2602_s30 }
  0x24   : > { %v2885_v0 = vmov 0.0  }
  0x25   : > { %251 = vst [vmem:[#allocation3] sm:$0xff] %v2885_v0  ;;  %252 = vst [vmem:[#allocation4] sm:$0xff] %v2885_v0 }
  0x26 PF: > { %v261_v1 = vld [vmem:[%s3893_s1] sm:$0xff]  ;;  %vm314_vm0 = vcmask 1043456   ;;  %v262_v2 = vld [vmem:[%s3893_s1 + $0x8] sm:$0xff]  ;;  %v3897_v5 = vmov 0.0   ;;  %vm289_vm1 = vcmask 31744   ;;  %v2975_v7 = vld [vmem:[#allocation5 + $0x1e8] sm:$0xff] }
  0x27   : > { %v287_v3 = vcombine.high %v261_v1, %v261_v1  ;;  %v288_v4 = vcombine.high %v262_v2, %v262_v2  ;;  %387 = vmatprep.mubr.f32.mxu0 %v3897_v5  ;;  %500 = vmatprep.mubr.f32.mxu1 %v3897_v5  ;;  %v253_v6 = vld [vmem:[%s2958_s7] sm:$0xff]  ;;  %v2977_v8 = vld [vmem:[#allocation5 + $0x1f8] sm:$0xff]  ;;  %v2979_v9 = vld [vmem:[#allocation5 + $0x1e0] sm:$0xff] }
  0x28   : > { %v2981_v10 = vld [vmem:[#allocation5 + $0x1f0] sm:$0xff]  ;;  %v2985_v11 = vld [vmem:[#allocation5 + $0x1c8] sm:$0xff]  ;;  %v2987_v12 = vld [vmem:[#allocation5 + $0x1d8] sm:$0xff] }
  0x29   : > { %2606 = vmatprep.subr.msk.mxu0 %vm314_vm0, %v287_v3  ;;  %2616 = vmatprep.subr.msk.mxu1 %vm314_vm0, %v288_v4  ;;  %v2993_v13 = vld [vmem:[#allocation5 + $0x1c0] sm:$0xff]  ;;  %v2995_v14 = vld [vmem:[#allocation5 + $0x1d0] sm:$0xff]  ;;  %v254_v15 = vld [vmem:[%s2958_s7 + $0x8] sm:$0xff] }
  0x2a   : > { %2607 = vmatpush1.msk.msra.mxu0 %vm314_vm0, %v261_v1  ;;  %2617 = vmatpush1.msk.msra.mxu1 %vm314_vm0, %v262_v2  ;;  %v3002_v16 = vld [vmem:[#allocation5 + $0x1a8] sm:$0xff]  ;;  %v3004_v17 = vld [vmem:[#allocation5 + $0x1b8] sm:$0xff]  ;;  %v3008_v18 = vld [vmem:[#allocation5 + $0x1a0] sm:$0xff] }
  0x2b   : > { %2608 = vmatmul.mubr.msk.f32.vlgmr.msra.gmra.mxu0 %vm289_vm1, %v253_v6  ;;  %2618 = vmatmul.mubr.msk.f32.vlgmr.msra.gmra.mxu1 %vm289_vm1, %v253_v6  ;;  %v3010_v19 = vld [vmem:[#allocation5 + $0x1b0] sm:$0xff]  ;;  %v3014_v20 = vld [vmem:[#allocation5 + $0x188] sm:$0xff]  ;;  %v3016_v21 = vld [vmem:[#allocation5 + $0x198] sm:$0xff] }
  0x2c   : > { %651 = vmatprep.subr.mxu0 %v2975_v7  ;;  %722 = vmatprep.subr.mxu1 %v2977_v8  ;;  %v3022_v22 = vld [vmem:[#allocation5 + $0x180] sm:$0xff]  ;;  %v3024_v23 = vld [vmem:[#allocation5 + $0x190] sm:$0xff]  ;;  %v3031_v25 = vld [vmem:[#allocation5 + $0x168] sm:$0xff] }
  0x2d   : > { %652 = vmatpush1.msra.mxu0 %v2979_v9  ;;  %723 = vmatpush1.msra.mxu1 %v2981_v10  ;;  %v255_v24 = vld [vmem:[%s2958_s7 + $0x10] sm:$0xff]  ;;  %v3033_v26 = vld [vmem:[#allocation5 + $0x178] sm:$0xff]  ;;  %v3039_v28 = vld [vmem:[#allocation5 + $0x170] sm:$0xff] }
  0x2e   : > { %653 = vmatprep.subr.mxu0 %v2985_v11  ;;  %724 = vmatprep.subr.mxu1 %v2987_v12  ;;  %v3037_v27 = vld [vmem:[#allocation5 + $0x160] sm:$0xff]  ;;  %v3043_v29 = vld [vmem:[#allocation5 + $0x148] sm:$0xff]  ;;  %v3045_v30 = vld [vmem:[#allocation5 + $0x158] sm:$0xff] }
  0x2f   : > { %393 = vmatprep.mubr.f32.mxu0 %v3897_v5  ;;  %506 = vmatprep.mubr.f32.mxu1 %v3897_v5  ;;  %v3051_v31 = vld [vmem:[#allocation5 + $0x140] sm:$0xff]  ;;  %v3053_v32 = vld [vmem:[#allocation5 + $0x150] sm:$0xff]  ;;  %v256_v33 = vld [vmem:[%s2958_s7 + $0x18] sm:$0xff] }
  0x30   : > { %654 = vmatpush1.msra.mxu0 %v2993_v13  ;;  %725 = vmatpush1.msra.mxu1 %v2995_v14  ;;  %v3060_v34 = vld [vmem:[#allocation5 + $0x128] sm:$0xff]  ;;  %v3062_v35 = vld [vmem:[#allocation5 + $0x138] sm:$0xff]  ;;  %v3066_v36 = vld [vmem:[#allocation5 + $0x120] sm:$0xff] }
  0x31   : > { %2609 = vmatmul.mubr.msk.f32.gmra.mxu0 %vm289_vm1, %v254_v15  ;;  %2619 = vmatmul.mubr.msk.f32.gmra.mxu1 %vm289_vm1, %v254_v15  ;;  %v3068_v37 = vld [vmem:[#allocation5 + $0x130] sm:$0xff]  ;;  %v3072_v38 = vld [vmem:[#allocation5 + $0x108] sm:$0xff]  ;;  %v3074_v39 = vld [vmem:[#allocation5 + $0x118] sm:$0xff] }
  0x32   : > { %655 = vmatprep.subr.mxu0 %v3002_v16  ;;  %726 = vmatprep.subr.mxu1 %v3004_v17  ;;  %v3080_v40 = vld [vmem:[#allocation5 + $0x100] sm:$0xff]  ;;  %v3082_v41 = vld [vmem:[#allocation5 + $0x110] sm:$0xff]  ;;  %v3089_v43 = vld [vmem:[#allocation5 + $0xe8] sm:$0xff] }
  0x33   : > { %656 = vmatpush1.msra.mxu0 %v3008_v18  ;;  %727 = vmatpush1.msra.mxu1 %v3010_v19  ;;  %v257_v42 = vld [vmem:[%s2958_s7 + $0x20] sm:$0xff]  ;;  %v3091_v44 = vld [vmem:[#allocation5 + $0xf8] sm:$0xff]  ;;  %v3095_v45 = vld [vmem:[#allocation5 + $0xe0] sm:$0xff] }
  0x34   : > { %657 = vmatprep.subr.mxu0 %v3014_v20  ;;  %728 = vmatprep.subr.mxu1 %v3016_v21  ;;  %v3097_v46 = vld [vmem:[#allocation5 + $0xf0] sm:$0xff]  ;;  %v3101_v47 = vld [vmem:[#allocation5 + $0xc8] sm:$0xff]  ;;  %v3103_v48 = vld [vmem:[#allocation5 + $0xd8] sm:$0xff] }
  0x35   : > { %399 = vmatprep.mubr.f32.mxu0 %v3897_v5  ;;  %512 = vmatprep.mubr.f32.mxu1 %v3897_v5  ;;  %v3109_v49 = vld [vmem:[#allocation5 + $0xc0] sm:$0xff]  ;;  %v3111_v50 = vld [vmem:[#allocation5 + $0xd0] sm:$0xff]  ;;  %v258_v51 = vld [vmem:[%s2958_s7 + $0x28] sm:$0xff] }
  0x36   : > { %658 = vmatpush1.msra.mxu0 %v3022_v22  ;;  %729 = vmatpush1.msra.mxu1 %v3024_v23  ;;  %v3118_v52 = vld [vmem:[#allocation5 + $0xa8] sm:$0xff]  ;;  %v3120_v53 = vld [vmem:[#allocation5 + $0xb8] sm:$0xff]  ;;  %v3124_v54 = vld [vmem:[#allocation5 + $0xa0] sm:$0xff] }
  0x37   : > { %2610 = vmatmul.mubr.msk.f32.gmra.mxu0 %vm289_vm1, %v255_v24  ;;  %2620 = vmatmul.mubr.msk.f32.gmra.mxu1 %vm289_vm1, %v255_v24  ;;  %v3126_v55 = vld [vmem:[#allocation5 + $0xb0] sm:$0xff]  ;;  %v3130_v56 = vld [vmem:[#allocation5 + $0x88] sm:$0xff]  ;;  %v3132_v57 = vld [vmem:[#allocation5 + $0x98] sm:$0xff] }
  0x38   : > { %659 = vmatprep.subr.mxu0 %v3031_v25  ;;  %730 = vmatprep.subr.mxu1 %v3033_v26  ;;  %3965 = vst [vmem:[#allocation8_spill] sm:$0xff] %v3130_v56  ;;  %3966 = vst [vmem:[#allocation9_spill] sm:$0xff] %v3132_v57  ;;  %v3138_v58 = vld [vmem:[#allocation5 + $0x80] sm:$0xff]  ;;  %v3140_v59 = vld [vmem:[#allocation5 + $0x90] sm:$0xff] }
  0x39   : > { %660 = vmatpush1.msra.mxu0 %v3037_v27  ;;  %731 = vmatpush1.msra.mxu1 %v3039_v28  ;;  %3967 = vst [vmem:[#allocation10_spill] sm:$0xff] %v3138_v58  ;;  %3968 = vst [vmem:[#allocation11_spill] sm:$0xff] %v3140_v59  ;;  %v259_v60 = vld [vmem:[%s2958_s7 + $0x30] sm:$0xff]  ;;  %v3147_v61 = vld [vmem:[#allocation5 + $0x68] sm:$0xff] }
  0x3a   : > { %661 = vmatprep.subr.mxu0 %v3043_v29  ;;  %732 = vmatprep.subr.mxu1 %v3045_v30  ;;  %3969 = vst [vmem:[#allocation12_spill] sm:$0xff] %v3147_v61  ;;  %v3149_v62 = vld [vmem:[#allocation5 + $0x78] sm:$0xff]  ;;  %v3153_v63 = vld [vmem:[#allocation5 + $0x60] sm:$0xff]  ;;  %v3155_v0 = vld [vmem:[#allocation5 + $0x70] sm:$0xff] }
  0x3b   : > { %405 = vmatprep.mubr.f32.mxu0 %v3897_v5  ;;  %518 = vmatprep.mubr.f32.mxu1 %v3897_v5  ;;  %3970 = vst [vmem:[#allocation13_spill] sm:$0xff] %v3149_v62  ;;  %3971 = vst [vmem:[#allocation14_spill] sm:$0xff] %v3153_v63  ;;  %v3159_v1 = vld [vmem:[#allocation5 + $0x48] sm:$0xff]  ;;  %v3161_v2 = vld [vmem:[#allocation5 + $0x58] sm:$0xff] }
  0x3c   : > { %662 = vmatpush1.msra.mxu0 %v3051_v31  ;;  %733 = vmatpush1.msra.mxu1 %v3053_v32  ;;  %3972 = vst [vmem:[#allocation15_spill] sm:$0xff] %v3155_v0  ;;  %3973 = vst [vmem:[#allocation16_spill] sm:$0xff] %v3159_v1  ;;  %v3167_v3 = vld [vmem:[#allocation5 + $0x40] sm:$0xff]  ;;  %v3169_v4 = vld [vmem:[#allocation5 + $0x50] sm:$0xff] }
  0x3d   : > { %2611 = vmatmul.mubr.msk.f32.gmra.mxu0 %vm289_vm1, %v256_v33  ;;  %2621 = vmatmul.mubr.msk.f32.gmra.mxu1 %vm289_vm1, %v256_v33  ;;  %3974 = vst [vmem:[#allocation17_spill] sm:$0xff] %v3161_v2  ;;  %3975 = vst [vmem:[#allocation18_spill] sm:$0xff] %v3167_v3  ;;  %v260_v6 = vld [vmem:[%s2958_s7 + $0x38] sm:$0xff]  ;;  %v3178_v24 = vld [vmem:[#allocation5 + $0x38] sm:$0xff] }
  0x3e   : > { %663 = vmatprep.subr.mxu0 %v3060_v34  ;;  %734 = vmatprep.subr.mxu1 %v3062_v35  ;;  %3976 = vst [vmem:[#allocation19_spill] sm:$0xff] %v3169_v4  ;;  %v3176_v15 = vld [vmem:[#allocation5 + $0x28] sm:$0xff]  ;;  %3978 = vst [vmem:[#allocation21_spill] sm:$0xff] %v3178_v24  ;;  %v3182_v33 = vld [vmem:[#allocation5 + $0x20] sm:$0xff] }
  0x3f   : > { %664 = vmatpush1.msra.mxu0 %v3066_v36  ;;  %735 = vmatpush1.msra.mxu1 %v3068_v37  ;;  %3977 = vst [vmem:[#allocation20_spill] sm:$0xff] %v3176_v15  ;;  %3979 = vst [vmem:[#allocation22_spill] sm:$0xff] %v3182_v33 }
  0x40   : > { %665 = vmatprep.subr.mxu0 %v3072_v38  ;;  %736 = vmatprep.subr.mxu1 %v3074_v39 }
  0x41   : > { %411 = vmatprep.mubr.f32.mxu0 %v3897_v5  ;;  %524 = vmatprep.mubr.f32.mxu1 %v3897_v5 }
  0x42   : > { %666 = vmatpush1.msra.mxu0 %v3080_v40  ;;  %737 = vmatpush1.msra.mxu1 %v3082_v41 }
  0x43   : > { %2612 = vmatmul.mubr.msk.f32.gmra.mxu0 %vm289_vm1, %v257_v42  ;;  %2622 = vmatmul.mubr.msk.f32.gmra.mxu1 %vm289_vm1, %v257_v42  ;;  %v3184_v42 = vld [vmem:[#allocation5 + $0x30] sm:$0xff] }
  0x44   : > { %667 = vmatprep.subr.mxu0 %v3089_v43  ;;  %738 = vmatprep.subr.mxu1 %v3091_v44  ;;  %3980 = vst [vmem:[#allocation23_spill] sm:$0xff] %v3184_v42 }
  0x45   : > { %668 = vmatpush1.msra.mxu0 %v3095_v45  ;;  %739 = vmatpush1.msra.mxu1 %v3097_v46 }
  0x46   : > { %669 = vmatprep.subr.mxu0 %v3101_v47  ;;  %740 = vmatprep.subr.mxu1 %v3103_v48 }
  0x47   : > { %417 = vmatprep.mubr.f32.mxu0 %v3897_v5  ;;  %530 = vmatprep.mubr.f32.mxu1 %v3897_v5 }
  0x48   : > { %670 = vmatpush1.msra.mxu0 %v3109_v49  ;;  %741 = vmatpush1.msra.mxu1 %v3111_v50 }
  0x49   : > { %2613 = vmatmul.mubr.msk.f32.gmra.mxu0 %vm289_vm1, %v258_v51  ;;  %2623 = vmatmul.mubr.msk.f32.gmra.mxu1 %vm289_vm1, %v258_v51  ;;  %v3188_v51 = vld [vmem:[#allocation5 + $0x8] sm:$0xff] }
  0x4a   : > { %671 = vmatprep.subr.mxu0 %v3118_v52  ;;  %742 = vmatprep.subr.mxu1 %v3120_v53  ;;  %3981 = vst [vmem:[#allocation24_spill] sm:$0xff] %v3188_v51 }
  0x4b   : > { %672 = vmatpush1.msra.mxu0 %v3124_v54  ;;  %743 = vmatpush1.msra.mxu1 %v3126_v55 }
  0x4c   : > { %673 = vmatprep.subr.mxu0 %v3130_v56  ;;  %744 = vmatprep.subr.mxu1 %v3132_v57 }
  0x4d   : > { %423 = vmatprep.mubr.f32.mxu0 %v3897_v5  ;;  %536 = vmatprep.mubr.f32.mxu1 %v3897_v5 }
  0x4e   : > { %674 = vmatpush1.msra.mxu0 %v3138_v58  ;;  %745 = vmatpush1.msra.mxu1 %v3140_v59 }
  0x4f   : > { %2614 = vmatmul.mubr.msk.f32.gmra.mxu0 %vm289_vm1, %v259_v60  ;;  %2624 = vmatmul.mubr.msk.f32.gmra.mxu1 %vm289_vm1, %v259_v60  ;;  %v3190_v60 = vld [vmem:[#allocation5 + $0x18] sm:$0xff] }
  0x50   : > { %675 = vmatprep.subr.mxu0 %v3147_v61  ;;  %746 = vmatprep.subr.mxu1 %v3149_v62  ;;  %3982 = vst [vmem:[#allocation25_spill] sm:$0xff] %v3190_v60 }
  0x51   : > { %676 = vmatpush1.msra.mxu0 %v3153_v63  ;;  %747 = vmatpush1.msra.mxu1 %v3155_v0 }
  0x52   : > { %677 = vmatprep.subr.mxu0 %v3159_v1  ;;  %748 = vmatprep.subr.mxu1 %v3161_v2 }
  0x53   : > { %429 = vmatprep.mubr.f32.mxu0 %v3897_v5  ;;  %542 = vmatprep.mubr.f32.mxu1 %v3897_v5  ;;  %v3194_v5 = vld [vmem:[#allocation5] sm:$0xff] }
  0x54   : > { %678 = vmatpush1.msra.mxu0 %v3167_v3  ;;  %749 = vmatpush1.msra.mxu1 %v3169_v4  ;;  %3983 = vst [vmem:[#allocation26_spill] sm:$0xff] %v3194_v5  ;;  %v3198_v4 = vld [vmem:[#allocation5 + $0x10] sm:$0xff]  ;;  %v3985_v3 = vmov 0.0  }
  0x55   : > { %2615 = vmatmul.mubr.msk.f32.gmra.mxu0 %vm289_vm1, %v260_v6  ;;  %2625 = vmatmul.mubr.msk.f32.gmra.mxu1 %vm289_vm1, %v260_v6  ;;  %3984 = vst [vmem:[#allocation27_spill] sm:$0xff] %v3198_v4  ;;  %v581_v6 = vld [vmem:[#allocation3] sm:$0xff] }
  0x56   : > { %679 = vmatprep.subr.mxu0 %v3176_v15  ;;  %750 = vmatprep.subr.mxu1 %v3178_v24 }
  0x57   : > { %680 = vmatpush1.msra.mxu0 %v3182_v33  ;;  %751 = vmatpush1.msra.mxu1 %v3184_v42 }
  0x58   : > { %681 = vmatprep.subr.mxu0 %v3188_v51  ;;  %752 = vmatprep.subr.mxu1 %v3190_v60 }
  0x59   : > { %682 = vmatpush1.msra.mxu0 %v3194_v5  ;;  %715 = vmatprep.mubr.f32.mxu0 %v3985_v3 }
  0x5a   : > { %753 = vmatpush1.msra.mxu1 %v3198_v4  ;;  %786 = vmatprep.mubr.f32.mxu1 %v3985_v3 }
  0x5b   : > { %716 = vmatmul.mubr.f32.vlgmr.msra.gmra.mxu0 %v581_v6  ;;  %787 = vmatmul.mubr.f32.vlgmr.msra.gmra.mxu1 %v581_v6  ;;  %v3986_v6 = vld [vmem:[#allocation18_spill] sm:$0xff] }
  0x5c   : > { %890 = vmatprep.subr.mxu0 %v2975_v7  ;;  %961 = vmatprep.subr.mxu1 %v2977_v8 }
  0x5d   : > { %891 = vmatpush1.msra.mxu0 %v2979_v9  ;;  %962 = vmatpush1.msra.mxu1 %v2981_v10 }
  0x5e   : > { %892 = vmatprep.subr.mxu0 %v2985_v11  ;;  %963 = vmatprep.subr.mxu1 %v2987_v12 }
  0x5f   : > { %893 = vmatpush1.msra.mxu0 %v2993_v13  ;;  %964 = vmatpush1.msra.mxu1 %v2995_v14 }
  0x60   : > { %894 = vmatprep.subr.mxu0 %v3002_v16  ;;  %965 = vmatprep.subr.mxu1 %v3004_v17 }
  0x61   : > { %895 = vmatpush1.msra.mxu0 %v3008_v18  ;;  %966 = vmatpush1.msra.mxu1 %v3010_v19 }
  0x62   : > { %896 = vmatprep.subr.mxu0 %v3014_v20  ;;  %967 = vmatprep.subr.mxu1 %v3016_v21 }
  0x63   : > { %897 = vmatpush1.msra.mxu0 %v3022_v22  ;;  %968 = vmatpush1.msra.mxu1 %v3024_v23 }
  0x64   : > { %898 = vmatprep.subr.mxu0 %v3031_v25  ;;  %969 = vmatprep.subr.mxu1 %v3033_v26 }
  0x65   : > { %899 = vmatpush1.msra.mxu0 %v3037_v27  ;;  %970 = vmatpush1.msra.mxu1 %v3039_v28 }
  0x66   : > { %900 = vmatprep.subr.mxu0 %v3043_v29  ;;  %971 = vmatprep.subr.mxu1 %v3045_v30 }
  0x67   : > { %901 = vmatpush1.msra.mxu0 %v3051_v31  ;;  %972 = vmatpush1.msra.mxu1 %v3053_v32 }
  0x68   : > { %902 = vmatprep.subr.mxu0 %v3060_v34  ;;  %973 = vmatprep.subr.mxu1 %v3062_v35 }
  0x69   : > { %903 = vmatpush1.msra.mxu0 %v3066_v36  ;;  %974 = vmatpush1.msra.mxu1 %v3068_v37 }
  0x6a   : > { %904 = vmatprep.subr.mxu0 %v3072_v38  ;;  %975 = vmatprep.subr.mxu1 %v3074_v39 }
  0x6b   : > { %905 = vmatpush1.msra.mxu0 %v3080_v40  ;;  %976 = vmatpush1.msra.mxu1 %v3082_v41 }
  0x6c   : > { %906 = vmatprep.subr.mxu0 %v3089_v43  ;;  %977 = vmatprep.subr.mxu1 %v3091_v44 }
  0x6d   : > { %907 = vmatpush1.msra.mxu0 %v3095_v45  ;;  %978 = vmatpush1.msra.mxu1 %v3097_v46 }
  0x6e   : > { %908 = vmatprep.subr.mxu0 %v3101_v47  ;;  %979 = vmatprep.subr.mxu1 %v3103_v48 }
  0x6f   : > { %909 = vmatpush1.msra.mxu0 %v3109_v49  ;;  %980 = vmatpush1.msra.mxu1 %v3111_v50 }
  0x70   : > { %910 = vmatprep.subr.mxu0 %v3118_v52  ;;  %981 = vmatprep.subr.mxu1 %v3120_v53 }
  0x71   : > { %911 = vmatpush1.msra.mxu0 %v3124_v54  ;;  %982 = vmatpush1.msra.mxu1 %v3126_v55 }
  0x72   : > { %912 = vmatprep.subr.mxu0 %v3130_v56  ;;  %983 = vmatprep.subr.mxu1 %v3132_v57  ;;  %v3987_v56 = vld [vmem:[#allocation19_spill] sm:$0xff] }
  0x73   : > { %913 = vmatpush1.msra.mxu0 %v3138_v58  ;;  %984 = vmatpush1.msra.mxu1 %v3140_v59 }
  0x74   : > { %914 = vmatprep.subr.mxu0 %v3147_v61  ;;  %985 = vmatprep.subr.mxu1 %v3149_v62 }
  0x75   : > { %915 = vmatpush1.msra.mxu0 %v3153_v63  ;;  %986 = vmatpush1.msra.mxu1 %v3155_v0 }
  0x76   : > { %916 = vmatprep.subr.mxu0 %v3159_v1  ;;  %987 = vmatprep.subr.mxu1 %v3161_v2 }
  0x77   : > { %917 = vmatpush1.msra.mxu0 %v3986_v6  ;;  %988 = vmatpush1.msra.mxu1 %v3987_v56 }
  0x78   : > { %918 = vmatprep.subr.mxu0 %v3176_v15  ;;  %989 = vmatprep.subr.mxu1 %v3178_v24  ;;  %v265_v24 = vlaneseq }
  0x79   : > { %919 = vmatpush1.msra.mxu0 %v3182_v33  ;;  %990 = vmatpush1.msra.mxu1 %v3184_v42 }
  0x7a   : > { %920 = vmatprep.subr.mxu0 %v3188_v51  ;;  %991 = vmatprep.subr.mxu1 %v3190_v60  ;;  %v266_v33 = vshrl.u32 %v265_v24, 7 }
  0x7b   : > { %921 = vmatpush1.msra.mxu0 %v3194_v5  ;;  %954 = vmatprep.mubr.f32.mxu0 %v3985_v3  ;;  %v263_v5 = vld [vmem:[%s3895_s3] sm:$0xf] }
  0x7c   : > { %992 = vmatpush1.msra.mxu1 %v3198_v4  ;;  %1025 = vmatprep.mubr.f32.mxu1 %v3985_v3  ;;  %v267_v51 = vsub.s32 0, %v266_v33  ;;  %v275_v60 = vsub.s32 2, %v266_v33  ;;  %v271_v3 = vsub.s32 1, %v266_v33 }
  0x7d   : > { %1130 = vmatprep.subr.mxu0 %v2975_v7  ;;  %1201 = vmatprep.subr.mxu1 %v2977_v8  ;;  %v279_v7 = vsub.s32 3, %v266_v33 }
  0x7e   : > { %v268_v6 = vrot.slane %v263_v5, %v267_v51  ;;  %v3285_v8 = vrot.slane %v263_v5, %v275_v60  ;;  %v272_v1 = vrot.slane %v263_v5, %v271_v3 }
  0x7f   : > { %v3287_v0 = vrot.slane %v263_v5, %v279_v7 }
  0xeb   : > { %v3274_v15 = vpop.f32.mrf.mxu0  ;;  %v3276_v42 = vpop.f32.mrf.mxu1 }
  0xed   : > { %v3281_v56 = vpop.f32.mrf.mxu0  ;;  %v3283_v4 = vpop.f32.mrf.mxu1 }
  0xf1   : > { %v395_v24 = vpop.f32.mrf.mxu0  ;;  %v508_v2 = vpop.f32.mrf.mxu1 }
  0xf2   : > { %v3289_v63 = vadd.f32 %v395_v24, %v268_v6  ;;  %v3292_v62 = vadd.f32 %v508_v2, %v3285_v8 }
  0xf3   : > { %v397_v61 = vpop.f32.mrf.mxu0  ;;  %v510_v59 = vpop.f32.mrf.mxu1 }
  0xf4   : > { %3988 = vst [vmem:[#allocation28_spill] sm:$0xff] %v3289_v63  ;;  %3989 = vst [vmem:[#allocation29_spill] sm:$0xff] %v3292_v62  ;;  %v3294_v58 = vadd.f32 %v397_v61, %v272_v1  ;;  %v3297_v57 = vadd.f32 %v510_v59, %v3287_v0 }
  0xf6   : > { %3990 = vst [vmem:[#allocation30_spill] sm:$0xff] %v3294_v58  ;;  %3991 = vst [vmem:[#allocation31_spill] sm:$0xff] %v3297_v57 }
  0xf7   : > { %v401_v33 = vpop.f32.mrf.mxu0  ;;  %v514_v51 = vpop.f32.mrf.mxu1 }
  0xf8   : > { %v3299_v60 = vadd.f32 %v401_v33, %v268_v6  ;;  %v3302_v3 = vadd.f32 %v514_v51, %v3285_v8 }
  0xf9   : > { %v403_v5 = vpop.f32.mrf.mxu0  ;;  %v516_v7 = vpop.f32.mrf.mxu1 }
  0xfa   : > { %3992 = vst [vmem:[#allocation32_spill] sm:$0xff] %v3299_v60  ;;  %3993 = vst [vmem:[#allocation33_spill] sm:$0xff] %v3302_v3  ;;  %v3304_v24 = vadd.f32 %v403_v5, %v272_v1  ;;  %v3307_v2 = vadd.f32 %v516_v7, %v3287_v0 }
  0xfc   : > { %3994 = vst [vmem:[#allocation34_spill] sm:$0xff] %v3304_v24  ;;  %3995 = vst [vmem:[#allocation35_spill] sm:$0xff] %v3307_v2 }
  0xfd   : > { %v407_v62 = vpop.f32.mrf.mxu0  ;;  %v520_v61 = vpop.f32.mrf.mxu1 }
  0xfe   : > { %v3309_v58 = vadd.f32 %v407_v62, %v268_v6  ;;  %v3312_v59 = vadd.f32 %v520_v61, %v3285_v8 }
  0xff   : > { %v409_v57 = vpop.f32.mrf.mxu0  ;;  %v522_v33 = vpop.f32.mrf.mxu1 }
 0x100   : > { %3996 = vst [vmem:[#allocation36_spill] sm:$0xff] %v3309_v58  ;;  %3997 = vst [vmem:[#allocation37_spill] sm:$0xff] %v3312_v59  ;;  %v3314_v60 = vadd.f32 %v409_v57, %v272_v1  ;;  %v3317_v51 = vadd.f32 %v522_v33, %v3287_v0 }
 0x102   : > { %3998 = vst [vmem:[#allocation38_spill] sm:$0xff] %v3314_v60  ;;  %3999 = vst [vmem:[#allocation39_spill] sm:$0xff] %v3317_v51 }
 0x103   : > { %v413_v3 = vpop.f32.mrf.mxu0  ;;  %v526_v5 = vpop.f32.mrf.mxu1 }
 0x104   : > { %v3319_v24 = vadd.f32 %v413_v3, %v268_v6  ;;  %v3322_v7 = vadd.f32 %v526_v5, %v3285_v8 }
 0x105   : > { %v415_v2 = vpop.f32.mrf.mxu0  ;;  %v528_v62 = vpop.f32.mrf.mxu1 }
 0x106   : > { %4000 = vst [vmem:[#allocation40_spill] sm:$0xff] %v3319_v24  ;;  %4001 = vst [vmem:[#allocation41_spill] sm:$0xff] %v3322_v7  ;;  %v3324_v58 = vadd.f32 %v415_v2, %v272_v1  ;;  %v3327_v61 = vadd.f32 %v528_v62, %v3287_v0 }
 0x108   : > { %4002 = vst [vmem:[#allocation42_spill] sm:$0xff] %v3324_v58  ;;  %4003 = vst [vmem:[#allocation43_spill] sm:$0xff] %v3327_v61 }
 0x109   : > { %v419_v59 = vpop.f32.mrf.mxu0  ;;  %v532_v57 = vpop.f32.mrf.mxu1 }
 0x10a   : > { %v3329_v60 = vadd.f32 %v419_v59, %v268_v6  ;;  %v3332_v33 = vadd.f32 %v532_v57, %v3285_v8 }
 0x10b   : > { %v421_v51 = vpop.f32.mrf.mxu0  ;;  %v534_v3 = vpop.f32.mrf.mxu1 }
 0x10c   : > { %4004 = vst [vmem:[#allocation44_spill] sm:$0xff] %v3329_v60  ;;  %4005 = vst [vmem:[#allocation45_spill] sm:$0xff] %v3332_v33  ;;  %v3334_v24 = vadd.f32 %v421_v51, %v272_v1  ;;  %v3337_v5 = vadd.f32 %v534_v3, %v3287_v0 }
 0x10e   : > { %4006 = vst [vmem:[#allocation46_spill] sm:$0xff] %v3334_v24  ;;  %4007 = vst [vmem:[#allocation47_spill] sm:$0xff] %v3337_v5 }
 0x10f   : > { %v425_v7 = vpop.f32.mrf.mxu0  ;;  %v538_v2 = vpop.f32.mrf.mxu1 }
 0x110   : > { %v3339_v58 = vadd.f32 %v425_v7, %v268_v6  ;;  %v3342_v62 = vadd.f32 %v538_v2, %v3285_v8 }
 0x111   : > { %v427_v61 = vpop.f32.mrf.mxu0  ;;  %v540_v59 = vpop.f32.mrf.mxu1 }
 0x112   : > { %4008 = vst [vmem:[#allocation48_spill] sm:$0xff] %v3339_v58  ;;  %4009 = vst [vmem:[#allocation49_spill] sm:$0xff] %v3342_v62  ;;  %v3344_v60 = vadd.f32 %v427_v61, %v272_v1  ;;  %v3347_v57 = vadd.f32 %v540_v59, %v3287_v0  ;;  %v390_v61 = vadd.f32 %v3274_v15, %v268_v6 }
 0x113   : > { %v392_v59 = vadd.f32 %v3281_v56, %v272_v1 }
 0x114   : > { %4010 = vst [vmem:[#allocation50_spill] sm:$0xff] %v3344_v60  ;;  %4011 = vst [vmem:[#allocation51_spill] sm:$0xff] %v3347_v57 }
 0x115   : > { %v431_v33 = vpop.f32.mrf.mxu0  ;;  %v544_v51 = vpop.f32.mrf.mxu1 }
 0x116   : > { %v3349_v24 = vadd.f32 %v431_v33, %v268_v6  ;;  %v3352_v3 = vadd.f32 %v544_v51, %v3285_v8 }
 0x117   : > { %v433_v5 = vpop.f32.mrf.mxu0  ;;  %v546_v7 = vpop.f32.mrf.mxu1 }
 0x118   : > { %4012 = vst [vmem:[#allocation52_spill] sm:$0xff] %v3349_v24  ;;  %4013 = vst [vmem:[#allocation53_spill] sm:$0xff] %v3352_v3  ;;  %v3354_v58 = vadd.f32 %v433_v5, %v272_v1  ;;  %v3357_v2 = vadd.f32 %v546_v7, %v3287_v0  ;;  %v505_v5 = vadd.f32 %v3283_v4, %v3287_v0 }
 0x119   : > { %v503_v7 = vadd.f32 %v3276_v42, %v3285_v8 }
 0x11a   : > { %4014 = vst [vmem:[#allocation54_spill] sm:$0xff] %v3354_v58  ;;  %4015 = vst [vmem:[#allocation55_spill] sm:$0xff] %v3357_v2 }
 0x11b   : > { %v717_v62 = vpop.f32.mrf.mxu0  ;;  %v788_v24 = vpop.f32.mrf.mxu1 }
 0x11c   : > { %v793_v57 = vadd.f32 %v717_v62, %v390_v61  ;;  %v795_v2 = vadd.f32 %v788_v24, %v503_v7 }
 0x11d   : > { %v719_v60 = vpop.f32.mrf.mxu0  ;;  %v790_v3 = vpop.f32.mrf.mxu1 }
 0x11e   : > { %v2626_v63 = vmul.f32 -1.442695, %v793_v57  ;;  %v794_v33 = vadd.f32 %v719_v60, %v392_v59  ;;  %v796_v58 = vadd.f32 %v790_v3, %v505_v5  ;;  %v582_v57 = vld [vmem:[#allocation4] sm:$0xff] }
 0x120   : > { %2700 = vpow2.f32 %v2626_v63  ;;  %v2627_v51 = vmul.f32 -1.442695, %v794_v33  ;;  %v2628_v15 = vmul.f32 -1.442695, %v796_v58 }
 0x122   : > { %2702 = vpow2.f32 %v2627_v51 }
 0x123   : > { %2704 = vpow2.f32 %v2628_v15 }
 0x12d   : > { %v2701_v6 = vpop.eup %2700 }
 0x12e   : > { %v800_v56 = vadd.f32 1.0, %v2701_v6 }
 0x12f   : > { %v2703_v1 = vpop.eup %2702 }
 0x130   : > { %2706 = vrcp.f32 %v800_v56  ;;  %v806_v60 = vadd.f32 1.0, %v2703_v1  ;;  %v2705_v63 = vpop.eup %2704 }
 0x131   : > { %2708 = vtanh.f32 %v795_v2  ;;  %v813_v4 = vadd.f32 1.0, %v2705_v63  ;;  %v3446_v63 = vld [vmem:[#allocation5 + $0x1f8] sm:$0xff] }
 0x132   : > { %2710 = vrcp.f32 %v806_v60  ;;  %v3444_v60 = vld [vmem:[#allocation5 + $0x1e8] sm:$0xff] }
 0x133   : > { %2712 = vrcp.f32 %v813_v4  ;;  %v3462_v4 = vld [vmem:[#allocation5 + $0x1c0] sm:$0xff] }
 0x13d   : > { %v2707_v62 = vpop.eup %2706 }
 0x13e   : > { %v2709_v61 = vpop.eup %2708 }
 0x13f   : > { %v2711_v0 = vpop.eup %2710  ;;  %v817_v3 = vmul.f32 %v2709_v61, %v2707_v62  ;;  %v3450_v62 = vld [vmem:[#allocation5 + $0x1e0] sm:$0xff]  ;;  %v3456_v61 = vld [vmem:[#allocation5 + $0x1c8] sm:$0xff] }
 0x140   : > { %v816_v59 = vmul.f32 %v2711_v0, %v582_v57  ;;  %v2713_v58 = vpop.eup %2712  ;;  %v3452_v57 = vld [vmem:[#allocation5 + $0x1f0] sm:$0xff]  ;;  %v3458_v0 = vld [vmem:[#allocation5 + $0x1d8] sm:$0xff] }
 0x142   : > { %v3365_v42 = vadd.f32 %v817_v3, %v816_v59  ;;  %v3464_v3 = vld [vmem:[#allocation5 + $0x1d0] sm:$0xff]  ;;  %v3468_v59 = vld [vmem:[#allocation5 + $0x1a8] sm:$0xff] }
 0x144   : > { %2714 = vtanh.f32 %v3365_v42 }
 0x151   : > { %v2715_v8 = vpop.eup %2714 }
 0x152   : > { %v820_v24 = vmul.f32 %v2715_v8, %v2713_v58  ;;  %v3474_v58 = vld [vmem:[#allocation5 + $0x1a0] sm:$0xff]  ;;  %v3476_v8 = vld [vmem:[#allocation5 + $0x1b0] sm:$0xff] }
 0x154   : > { %821 = vst [vmem:[%s2963_s10] sm:$0xff] %v820_v24  ;;  %955 = vmatmul.mubr.f32.vlgmr.msra.gmra.mxu0 %v820_v24  ;;  %1026 = vmatmul.mubr.f32.vlgmr.msra.gmra.mxu1 %v820_v24  ;;  %v3480_v24 = vld [vmem:[#allocation5 + $0x188] sm:$0xff] }
 0x155   : > { %1131 = vmatpush1.msra.mxu0 %v2979_v9  ;;  %1202 = vmatpush1.msra.mxu1 %v2981_v10  ;;  %v4016_v9 = vld [vmem:[#allocation8_spill] sm:$0xff]  ;;  %v4017_v10 = vld [vmem:[#allocation9_spill] sm:$0xff] }
 0x156   : > { %1132 = vmatprep.subr.mxu0 %v2985_v11  ;;  %1203 = vmatprep.subr.mxu1 %v2987_v12  ;;  %v4018_v11 = vld [vmem:[#allocation10_spill] sm:$0xff]  ;;  %v4019_v12 = vld [vmem:[#allocation11_spill] sm:$0xff]  ;;  %4041 = vst [vmem:[#allocation8_spill] sm:$0xff] %v3444_v60  ;;  %4042 = vst [vmem:[#allocation9_spill] sm:$0xff] %v3446_v63 }
 0x157   : > { %1133 = vmatpush1.msra.mxu0 %v2993_v13  ;;  %1204 = vmatpush1.msra.mxu1 %v2995_v14  ;;  %v4020_v13 = vld [vmem:[#allocation12_spill] sm:$0xff]  ;;  %v4021_v14 = vld [vmem:[#allocation13_spill] sm:$0xff] }
 0x158   : > { %1134 = vmatprep.subr.mxu0 %v3002_v16  ;;  %1205 = vmatprep.subr.mxu1 %v3004_v17  ;;  %v4022_v16 = vld [vmem:[#allocation14_spill] sm:$0xff]  ;;  %v4023_v17 = vld [vmem:[#allocation15_spill] sm:$0xff] }
 0x159   : > { %1135 = vmatpush1.msra.mxu0 %v3008_v18  ;;  %1206 = vmatpush1.msra.mxu1 %v3010_v19  ;;  %v4024_v18 = vld [vmem:[#allocation16_spill] sm:$0xff]  ;;  %v4025_v19 = vld [vmem:[#allocation17_spill] sm:$0xff] }
 0x15a   : > { %1136 = vmatprep.subr.mxu0 %v3014_v20  ;;  %1207 = vmatprep.subr.mxu1 %v3016_v21  ;;  %v4026_v20 = vld [vmem:[#allocation18_spill] sm:$0xff]  ;;  %v4027_v21 = vld [vmem:[#allocation19_spill] sm:$0xff] }
 0x15b   : > { %1137 = vmatpush1.msra.mxu0 %v3022_v22  ;;  %1208 = vmatpush1.msra.mxu1 %v3024_v23  ;;  %v4028_v22 = vld [vmem:[#allocation20_spill] sm:$0xff]  ;;  %v4029_v23 = vld [vmem:[#allocation21_spill] sm:$0xff] }
 0x15c   : > { %1138 = vmatprep.subr.mxu0 %v3031_v25  ;;  %1209 = vmatprep.subr.mxu1 %v3033_v26  ;;  %v4030_v25 = vld [vmem:[#allocation22_spill] sm:$0xff]  ;;  %v4031_v26 = vld [vmem:[#allocation23_spill] sm:$0xff] }
 0x15d   : > { %1139 = vmatpush1.msra.mxu0 %v3037_v27  ;;  %1210 = vmatpush1.msra.mxu1 %v3039_v28  ;;  %v4032_v27 = vld [vmem:[#allocation24_spill] sm:$0xff]  ;;  %v4033_v28 = vld [vmem:[#allocation25_spill] sm:$0xff] }
 0x15e   : > { %1140 = vmatprep.subr.mxu0 %v3043_v29  ;;  %1211 = vmatprep.subr.mxu1 %v3045_v30  ;;  %v4034_v29 = vld [vmem:[#allocation26_spill] sm:$0xff]  ;;  %v4035_v30 = vmov 0.0  }
 0x15f   : > { %1141 = vmatpush1.msra.mxu0 %v3051_v31  ;;  %1212 = vmatpush1.msra.mxu1 %v3053_v32  ;;  %v4036_v31 = vld [vmem:[#allocation27_spill] sm:$0xff] }
 0x160   : > { %1142 = vmatprep.subr.mxu0 %v3060_v34  ;;  %1213 = vmatprep.subr.mxu1 %v3062_v35  ;;  %v4037_v34 = vld [vmem:[#allocation28_spill] sm:$0xff] }
 0x161   : > { %1143 = vmatpush1.msra.mxu0 %v3066_v36  ;;  %1214 = vmatpush1.msra.mxu1 %v3068_v37 }
 0x162   : > { %1144 = vmatprep.subr.mxu0 %v3072_v38  ;;  %1215 = vmatprep.subr.mxu1 %v3074_v39  ;;  %v4038_v38 = vld [vmem:[#allocation30_spill] sm:$0xff] }
 0x163   : > { %1145 = vmatpush1.msra.mxu0 %v3080_v40  ;;  %1216 = vmatpush1.msra.mxu1 %v3082_v41 }
 0x164   : > { %1146 = vmatprep.subr.mxu0 %v3089_v43  ;;  %1217 = vmatprep.subr.mxu1 %v3091_v44  ;;  %v4039_v44 = vld [vmem:[#allocation31_spill] sm:$0xff] }
 0x165   : > { %1147 = vmatpush1.msra.mxu0 %v3095_v45  ;;  %1218 = vmatpush1.msra.mxu1 %v3097_v46  ;;  %v4040_v46 = vld [vmem:[#allocation29_spill] sm:$0xff] }
 0x166   : > { %1148 = vmatprep.subr.mxu0 %v3101_v47  ;;  %1219 = vmatprep.subr.mxu1 %v3103_v48 }
 0x167   : > { %1149 = vmatpush1.msra.mxu0 %v3109_v49  ;;  %1220 = vmatpush1.msra.mxu1 %v3111_v50 }
 0x168   : > { %1150 = vmatprep.subr.mxu0 %v3118_v52  ;;  %1221 = vmatprep.subr.mxu1 %v3120_v53 }
 0x169   : > { %1151 = vmatpush1.msra.mxu0 %v3124_v54  ;;  %1222 = vmatpush1.msra.mxu1 %v3126_v55 }
 0x16a   : > { %1152 = vmatprep.subr.mxu0 %v4016_v9  ;;  %1223 = vmatprep.subr.mxu1 %v4017_v10  ;;  %v3482_v9 = vld [vmem:[#allocation5 + $0x198] sm:$0xff]  ;;  %v3486_v10 = vld [vmem:[#allocation5 + $0x180] sm:$0xff] }
 0x16b   : > { %1153 = vmatpush1.msra.mxu0 %v4018_v11  ;;  %1224 = vmatpush1.msra.mxu1 %v4019_v12  ;;  %v3488_v11 = vld [vmem:[#allocation5 + $0x190] sm:$0xff]  ;;  %v3492_v12 = vld [vmem:[#allocation5 + $0x168] sm:$0xff] }
 0x16c   : > { %1154 = vmatprep.subr.mxu0 %v4020_v13  ;;  %1225 = vmatprep.subr.mxu1 %v4021_v14  ;;  %v3494_v13 = vld [vmem:[#allocation5 + $0x178] sm:$0xff]  ;;  %v3498_v14 = vld [vmem:[#allocation5 + $0x160] sm:$0xff] }
 0x16d   : > { %1155 = vmatpush1.msra.mxu0 %v4022_v16  ;;  %1226 = vmatpush1.msra.mxu1 %v4023_v17  ;;  %v3500_v16 = vld [vmem:[#allocation5 + $0x170] sm:$0xff]  ;;  %v3504_v17 = vld [vmem:[#allocation5 + $0x148] sm:$0xff] }
 0x16e   : > { %1156 = vmatprep.subr.mxu0 %v4024_v18  ;;  %1227 = vmatprep.subr.mxu1 %v4025_v19  ;;  %v3506_v18 = vld [vmem:[#allocation5 + $0x158] sm:$0xff]  ;;  %v3510_v19 = vld [vmem:[#allocation5 + $0x140] sm:$0xff] }
 0x16f   : > { %1157 = vmatpush1.msra.mxu0 %v4026_v20  ;;  %1228 = vmatpush1.msra.mxu1 %v4027_v21  ;;  %v3512_v20 = vld [vmem:[#allocation5 + $0x150] sm:$0xff]  ;;  %v3516_v21 = vld [vmem:[#allocation5 + $0x128] sm:$0xff] }
 0x170   : > { %1158 = vmatprep.subr.mxu0 %v4028_v22  ;;  %1229 = vmatprep.subr.mxu1 %v4029_v23  ;;  %v3518_v22 = vld [vmem:[#allocation5 + $0x138] sm:$0xff]  ;;  %v3522_v23 = vld [vmem:[#allocation5 + $0x120] sm:$0xff] }
 0x171   : > { %1159 = vmatpush1.msra.mxu0 %v4030_v25  ;;  %1230 = vmatpush1.msra.mxu1 %v4031_v26  ;;  %v3524_v25 = vld [vmem:[#allocation5 + $0x130] sm:$0xff]  ;;  %v3528_v26 = vld [vmem:[#allocation5 + $0x108] sm:$0xff] }
 0x172   : > { %1160 = vmatprep.subr.mxu0 %v4032_v27  ;;  %1231 = vmatprep.subr.mxu1 %v4033_v28  ;;  %v3530_v27 = vld [vmem:[#allocation5 + $0x118] sm:$0xff]  ;;  %v3532_v28 = vld [vmem:[#allocation5 + $0x100] sm:$0xff] }
 0x173   : > { %1161 = vmatpush1.msra.mxu0 %v4034_v29  ;;  %1194 = vmatprep.mubr.f32.mxu0 %v4035_v30  ;;  %v3536_v29 = vld [vmem:[#allocation5 + $0x110] sm:$0xff] }
 0x174   : > { %1232 = vmatpush1.msra.mxu1 %v4036_v31  ;;  %1265 = vmatprep.mubr.f32.mxu1 %v4035_v30  ;;  %v3538_v31 = vld [vmem:[#allocation5 + $0xe8] sm:$0xff] }
 0x175   : > { %1370 = vmatprep.subr.mxu0 %v3444_v60  ;;  %1441 = vmatprep.subr.mxu1 %v3446_v63 }
 0x214   : > { %v956_v32 = vpop.f32.mrf.mxu0  ;;  %v1027_v40 = vpop.f32.mrf.mxu1 }
 0x215   : > { %v1032_v35 = vadd.f32 %v956_v32, %v4037_v34  ;;  %v1034_v47 = vadd.f32 %v1027_v40, %v4040_v46  ;;  %v3540_v32 = vld [vmem:[#allocation5 + $0xf8] sm:$0xff]  ;;  %v3544_v34 = vld [vmem:[#allocation5 + $0xe0] sm:$0xff]  ;;  %v3560_v40 = vld [vmem:[#allocation5 + $0xa8] sm:$0xff] }
 0x216   : > { %v958_v36 = vpop.f32.mrf.mxu0  ;;  %v1029_v43 = vpop.f32.mrf.mxu1  ;;  %v3574_v46 = vld [vmem:[#allocation5 + $0x98] sm:$0xff] }
 0x217   : > { %v2629_v37 = vmul.f32 -1.442695, %v1032_v35  ;;  %v1033_v39 = vadd.f32 %v958_v36, %v4038_v38  ;;  %v1035_v45 = vadd.f32 %v1029_v43, %v4039_v44  ;;  %v3546_v35 = vld [vmem:[#allocation5 + $0xf0] sm:$0xff]  ;;  %v3548_v36 = vld [vmem:[#allocation5 + $0xc8] sm:$0xff]  ;;  %v3554_v38 = vld [vmem:[#allocation5 + $0xc0] sm:$0xff] }
 0x218   : > { %v3566_v43 = vld [vmem:[#allocation5 + $0xa0] sm:$0xff]  ;;  %v3568_v44 = vld [vmem:[#allocation5 + $0xb0] sm:$0xff] }
 0x219   : > { %2716 = vpow2.f32 %v2629_v37  ;;  %v2630_v41 = vmul.f32 -1.442695, %v1033_v39  ;;  %v2631_v48 = vmul.f32 -1.442695, %v1035_v45  ;;  %v3552_v37 = vld [vmem:[#allocation5 + $0xd8] sm:$0xff]  ;;  %v3556_v39 = vld [vmem:[#allocation5 + $0xd0] sm:$0xff] }
 0x21a   : > { %v3572_v45 = vld [vmem:[#allocation5 + $0x88] sm:$0xff] }
 0x21b   : > { %2718 = vpow2.f32 %v2630_v41  ;;  %v3562_v41 = vld [vmem:[#allocation5 + $0xb8] sm:$0xff] }
 0x21c   : > { %2720 = vtanh.f32 %v1034_v47  ;;  %v3578_v47 = vld [vmem:[#allocation5 + $0x80] sm:$0xff] }
 0x21d   : > { %2722 = vpow2.f32 %v2631_v48  ;;  %v3580_v48 = vld [vmem:[#allocation5 + $0x90] sm:$0xff] }
 0x21e   : > { %4043 = vst [vmem:[#allocation10_spill] sm:$0xff] %v3580_v48 }
 0x226   : > { %v2717_v49 = vpop.eup %2716 }
 0x227   : > { %v1039_v50 = vadd.f32 1.0, %v2717_v49  ;;  %v3584_v49 = vld [vmem:[#allocation5 + $0x68] sm:$0xff] }
 0x228   : > { %v2719_v52 = vpop.eup %2718  ;;  %4044 = vst [vmem:[#allocation11_spill] sm:$0xff] %v3584_v49 }
 0x229   : > { %2724 = vrcp.f32 %v1039_v50  ;;  %v1045_v53 = vadd.f32 1.0, %v2719_v52  ;;  %v2721_v54 = vpop.eup %2720  ;;  %v3586_v50 = vld [vmem:[#allocation5 + $0x78] sm:$0xff]  ;;  %v3590_v52 = vld [vmem:[#allocation5 + $0x60] sm:$0xff] }
 0x22a   : > { %v2723_v55 = vpop.eup %2722  ;;  %4045 = vst [vmem:[#allocation12_spill] sm:$0xff] %v3586_v50  ;;  %4046 = vst [vmem:[#allocation13_spill] sm:$0xff] %v3590_v52 }
 0x22b   : > { %2726 = vrcp.f32 %v1045_v53  ;;  %v1052_v5 = vadd.f32 1.0, %v2723_v55  ;;  %v3592_v53 = vld [vmem:[#allocation5 + $0x70] sm:$0xff]  ;;  %v3598_v55 = vld [vmem:[#allocation5 + $0x58] sm:$0xff] }
 0x22c   : > { %4047 = vst [vmem:[#allocation14_spill] sm:$0xff] %v3592_v53  ;;  %4049 = vst [vmem:[#allocation16_spill] sm:$0xff] %v3598_v55 }
 0x22d   : > { %2728 = vrcp.f32 %v1052_v5  ;;  %v3610_v5 = vld [vmem:[#allocation5 + $0x38] sm:$0xff] }
 0x22e   : > { %4053 = vst [vmem:[#allocation20_spill] sm:$0xff] %v3610_v5 }
 0x236   : > { %v2725_v2 = vpop.eup %2724 }
 0x237   : > { %v1056_v33 = vmul.f32 %v2725_v2, %v2721_v54  ;;  %v3596_v54 = vld [vmem:[#allocation5 + $0x48] sm:$0xff]  ;;  %v3602_v2 = vld [vmem:[#allocation5 + $0x40] sm:$0xff] }
 0x238   : > { %v2727_v51 = vpop.eup %2726  ;;  %4048 = vst [vmem:[#allocation15_spill] sm:$0xff] %v3596_v54  ;;  %4050 = vst [vmem:[#allocation17_spill] sm:$0xff] %v3602_v2 }
 0x239   : > { %v1055_v7 = vmul.f32 %v2727_v51, %v3365_v42  ;;  %v3470_v42 = vld [vmem:[#allocation5 + $0x1b8] sm:$0xff]  ;;  %v3608_v51 = vld [vmem:[#allocation5 + $0x28] sm:$0xff] }
 0x23a   : > { %v2729_v6 = vpop.eup %2728  ;;  %4052 = vst [vmem:[#allocation19_spill] sm:$0xff] %v3608_v51 }
 0x23b   : > { %v3438_v15 = vadd.f32 %v1056_v33, %v1055_v7  ;;  %v3604_v33 = vld [vmem:[#allocation5 + $0x50] sm:$0xff]  ;;  %v3614_v7 = vld [vmem:[#allocation5 + $0x20] sm:$0xff] }
 0x23c   : > { %4051 = vst [vmem:[#allocation18_spill] sm:$0xff] %v3604_v33  ;;  %4054 = vst [vmem:[#allocation21_spill] sm:$0xff] %v3614_v7 }
 0x23d   : > { %2730 = vtanh.f32 %v3438_v15 }
 0x24a   : > { %v2731_v56 = vpop.eup %2730 }
 0x24b   : > { %v1059_v1 = vmul.f32 %v2731_v56, %v2729_v6  ;;  %v3616_v6 = vld [vmem:[#allocation5 + $0x30] sm:$0xff]  ;;  %v3620_v56 = vld [vmem:[#allocation5 + $0x8] sm:$0xff] }
 0x24c   : > { %4055 = vst [vmem:[#allocation22_spill] sm:$0xff] %v3616_v6  ;;  %4056 = vst [vmem:[#allocation23_spill] sm:$0xff] %v3620_v56 }
 0x24d   : > { %2632 = vst [vmem:[%s2963_s10 + $0x8] sm:$0xff] %v1059_v1  ;;  %1195 = vmatmul.mubr.f32.vlgmr.msra.gmra.mxu0 %v1059_v1  ;;  %1266 = vmatmul.mubr.f32.vlgmr.msra.gmra.mxu1 %v1059_v1  ;;  %v3622_v1 = vld [vmem:[#allocation5 + $0x18] sm:$0xff] }
 0x24e   : > { %1434 = vmatprep.mubr.f32.mxu0 %v4035_v30  ;;  %1505 = vmatprep.mubr.f32.mxu1 %v4035_v30  ;;  %4057 = vst [vmem:[#allocation24_spill] sm:$0xff] %v3622_v1  ;;  %v3626_v30 = vld [vmem:[#allocation5] sm:$0xff] }
 0x24f   : > { %1371 = vmatpush1.msra.mxu0 %v3450_v62  ;;  %1442 = vmatpush1.msra.mxu1 %v3452_v57  ;;  %4058 = vst [vmem:[#allocation25_spill] sm:$0xff] %v3626_v30 }
 0x250   : > { %1372 = vmatprep.subr.mxu0 %v3456_v61  ;;  %1443 = vmatprep.subr.mxu1 %v3458_v0 }
 0x251   : > { %1373 = vmatpush1.msra.mxu0 %v3462_v4  ;;  %1444 = vmatpush1.msra.mxu1 %v3464_v3 }
 0x252   : > { %1374 = vmatprep.subr.mxu0 %v3468_v59  ;;  %1445 = vmatprep.subr.mxu1 %v3470_v42 }
 0x253   : > { %1375 = vmatpush1.msra.mxu0 %v3474_v58  ;;  %1446 = vmatpush1.msra.mxu1 %v3476_v8 }
 0x254   : > { %1376 = vmatprep.subr.mxu0 %v3480_v24  ;;  %1447 = vmatprep.subr.mxu1 %v3482_v9 }
 0x255   : > { %1377 = vmatpush1.msra.mxu0 %v3486_v10  ;;  %1448 = vmatpush1.msra.mxu1 %v3488_v11 }
 0x256   : > { %1378 = vmatprep.subr.mxu0 %v3492_v12  ;;  %1449 = vmatprep.subr.mxu1 %v3494_v13 }
 0x257   : > { %1379 = vmatpush1.msra.mxu0 %v3498_v14  ;;  %1450 = vmatpush1.msra.mxu1 %v3500_v16 }
 0x258   : > { %1380 = vmatprep.subr.mxu0 %v3504_v17  ;;  %1451 = vmatprep.subr.mxu1 %v3506_v18 }
 0x259   : > { %1381 = vmatpush1.msra.mxu0 %v3510_v19  ;;  %1452 = vmatpush1.msra.mxu1 %v3512_v20 }
 0x25a   : > { %1382 = vmatprep.subr.mxu0 %v3516_v21  ;;  %1453 = vmatprep.subr.mxu1 %v3518_v22 }
 0x25b   : > { %1383 = vmatpush1.msra.mxu0 %v3522_v23  ;;  %1454 = vmatpush1.msra.mxu1 %v3524_v25 }
 0x25c   : > { %1384 = vmatprep.subr.mxu0 %v3528_v26  ;;  %1455 = vmatprep.subr.mxu1 %v3530_v27 }
 0x25d   : > { %1385 = vmatpush1.msra.mxu0 %v3532_v28  ;;  %1456 = vmatpush1.msra.mxu1 %v3536_v29 }
 0x25e   : > { %1386 = vmatprep.subr.mxu0 %v3538_v31  ;;  %1457 = vmatprep.subr.mxu1 %v3540_v32 }
 0x25f   : > { %1387 = vmatpush1.msra.mxu0 %v3544_v34  ;;  %1458 = vmatpush1.msra.mxu1 %v3546_v35 }
 0x260   : > { %1388 = vmatprep.subr.mxu0 %v3548_v36  ;;  %1459 = vmatprep.subr.mxu1 %v3552_v37 }
 0x261   : > { %1389 = vmatpush1.msra.mxu0 %v3554_v38  ;;  %1460 = vmatpush1.msra.mxu1 %v3556_v39 }
 0x262   : > { %1390 = vmatprep.subr.mxu0 %v3560_v40  ;;  %1461 = vmatprep.subr.mxu1 %v3562_v41 }
 0x263   : > { %1391 = vmatpush1.msra.mxu0 %v3566_v43  ;;  %1462 = vmatpush1.msra.mxu1 %v3568_v44 }
 0x264   : > { %1392 = vmatprep.subr.mxu0 %v3572_v45  ;;  %1463 = vmatprep.subr.mxu1 %v3574_v46 }
 0x265   : > { %1393 = vmatpush1.msra.mxu0 %v3578_v47  ;;  %1464 = vmatpush1.msra.mxu1 %v3580_v48 }
 0x266   : > { %1394 = vmatprep.subr.mxu0 %v3584_v49  ;;  %1465 = vmatprep.subr.mxu1 %v3586_v50  ;;  %v4063_v50 = vld [vmem:[#allocation33_spill] sm:$0xff] }
 0x267   : > { %1395 = vmatpush1.msra.mxu0 %v3590_v52  ;;  %1466 = vmatpush1.msra.mxu1 %v3592_v53  ;;  %v4062_v52 = vld [vmem:[#allocation35_spill] sm:$0xff] }
 0x268   : > { %1396 = vmatprep.subr.mxu0 %v3596_v54  ;;  %1467 = vmatprep.subr.mxu1 %v3598_v55  ;;  %v3628_v54 = vld [vmem:[#allocation5 + $0x10] sm:$0xff] }
 0x269   : > { %1397 = vmatpush1.msra.mxu0 %v3602_v2  ;;  %1468 = vmatpush1.msra.mxu1 %v3604_v33  ;;  %4059 = vst [vmem:[#allocation26_spill] sm:$0xff] %v3628_v54 }
 0x26a   : > { %1398 = vmatprep.subr.mxu0 %v3608_v51  ;;  %1469 = vmatprep.subr.mxu1 %v3610_v5  ;;  %v4060_v51 = vld [vmem:[#allocation32_spill] sm:$0xff] }
 0x26b   : > { %1399 = vmatpush1.msra.mxu0 %v3614_v7  ;;  %1470 = vmatpush1.msra.mxu1 %v3616_v6  ;;  %v4061_v7 = vld [vmem:[#allocation34_spill] sm:$0xff] }
 0x26c   : > { %1400 = vmatprep.subr.mxu0 %v3620_v56  ;;  %1471 = vmatprep.subr.mxu1 %v3622_v1 }
 0x26d   : > { %1401 = vmatpush1.msra.mxu0 %v3626_v30  ;;  %1472 = vmatpush1.msra.mxu1 %v3628_v54 }
 0x26e   : > { %1610 = vmatprep.subr.mxu0 %v3444_v60  ;;  %1681 = vmatprep.subr.mxu1 %v3446_v63 }
 0x30d   : > { %v1196_v5 = vpop.f32.mrf.mxu0  ;;  %v1267_v6 = vpop.f32.mrf.mxu1 }
 0x30e   : > { %v1272_v33 = vadd.f32 %v1196_v5, %v4060_v51  ;;  %v1274_v54 = vadd.f32 %v1267_v6, %v4063_v50  ;;  %v4067_v50 = vld [vmem:[#allocation13_spill] sm:$0xff]  ;;  %v4069_v6 = vld [vmem:[#allocation15_spill] sm:$0xff] }
 0x30f   : > { %v1198_v2 = vpop.f32.mrf.mxu0  ;;  %v1269_v1 = vpop.f32.mrf.mxu1 }
 0x310   : > { %v2633_v55 = vmul.f32 -1.442695, %v1272_v33  ;;  %v1273_v53 = vadd.f32 %v1198_v2, %v4061_v7  ;;  %v1275_v30 = vadd.f32 %v1269_v1, %v4062_v52  ;;  %v4070_v1 = vld [vmem:[#allocation16_spill] sm:$0xff] }
 0x312   : > { %2732 = vpow2.f32 %v2633_v55  ;;  %v2634_v56 = vmul.f32 -1.442695, %v1273_v53  ;;  %v2635_v49 = vmul.f32 -1.442695, %v1275_v30 }
 0x314   : > { %2734 = vpow2.f32 %v2634_v56 }
 0x315   : > { %2736 = vtanh.f32 %v1274_v54  ;;  %v4068_v54 = vld [vmem:[#allocation14_spill] sm:$0xff] }
 0x316   : > { %2738 = vpow2.f32 %v2635_v49 }
 0x31f   : > { %v2733_v60 = vpop.eup %2732 }
 0x320   : > { %v1279_v48 = vadd.f32 1.0, %v2733_v60 }
 0x321   : > { %v2735_v63 = vpop.eup %2734 }
 0x322   : > { %2740 = vrcp.f32 %v1279_v48  ;;  %v1285_v33 = vadd.f32 1.0, %v2735_v63  ;;  %v2737_v2 = vpop.eup %2736  ;;  %v4065_v63 = vld [vmem:[#allocation11_spill] sm:$0xff]  ;;  %v4066_v48 = vld [vmem:[#allocation12_spill] sm:$0xff] }
 0x323   : > { %v2739_v55 = vpop.eup %2738 }
 0x324   : > { %2742 = vrcp.f32 %v1285_v33  ;;  %v1292_v7 = vadd.f32 1.0, %v2739_v55  ;;  %v4071_v33 = vld [vmem:[#allocation17_spill] sm:$0xff]  ;;  %v4073_v55 = vld [vmem:[#allocation19_spill] sm:$0xff] }
 0x326   : > { %2744 = vrcp.f32 %v1292_v7  ;;  %v4077_v7 = vld [vmem:[#allocation23_spill] sm:$0xff] }
 0x32f   : > { %v2741_v51 = vpop.eup %2740 }
 0x330   : > { %v1296_v53 = vmul.f32 %v2741_v51, %v2737_v2  ;;  %v4072_v2 = vld [vmem:[#allocation18_spill] sm:$0xff]  ;;  %v4074_v51 = vld [vmem:[#allocation20_spill] sm:$0xff] }
 0x331   : > { %v2743_v5 = vpop.eup %2742 }
 0x332   : > { %v1295_v52 = vmul.f32 %v2743_v5, %v3438_v15  ;;  %v4064_v15 = vld [vmem:[#allocation10_spill] sm:$0xff] }
 0x333   : > { %v2745_v30 = vpop.eup %2744  ;;  %v4076_v5 = vld [vmem:[#allocation22_spill] sm:$0xff] }
 0x334   : > { %v3643_v56 = vadd.f32 %v1296_v53, %v1295_v52  ;;  %v4075_v53 = vld [vmem:[#allocation21_spill] sm:$0xff]  ;;  %v4078_v52 = vld [vmem:[#allocation24_spill] sm:$0xff] }
 0x336   : > { %2746 = vtanh.f32 %v3643_v56 }
 0x343   : > { %v2747_v60 = vpop.eup %2746 }
 0x344   : > { %v1299_v49 = vmul.f32 %v2747_v60, %v2745_v30  ;;  %v4079_v30 = vld [vmem:[#allocation25_spill] sm:$0xff]  ;;  %v4080_v60 = vmov 0.0  }
 0x346   : > { %2636 = vst [vmem:[%s2963_s10 + $0x10] sm:$0xff] %v1299_v49  ;;  %1435 = vmatmul.mubr.f32.vlgmr.msra.gmra.mxu0 %v1299_v49  ;;  %1506 = vmatmul.mubr.f32.vlgmr.msra.gmra.mxu1 %v1299_v49  ;;  %v4081_v49 = vld [vmem:[#allocation26_spill] sm:$0xff] }
 0x347   : > { %1611 = vmatpush1.msra.mxu0 %v3450_v62  ;;  %1682 = vmatpush1.msra.mxu1 %v3452_v57 }
 0x348   : > { %1612 = vmatprep.subr.mxu0 %v3456_v61  ;;  %1683 = vmatprep.subr.mxu1 %v3458_v0 }
 0x349   : > { %1613 = vmatpush1.msra.mxu0 %v3462_v4  ;;  %1684 = vmatpush1.msra.mxu1 %v3464_v3 }
 0x34a   : > { %1614 = vmatprep.subr.mxu0 %v3468_v59  ;;  %1685 = vmatprep.subr.mxu1 %v3470_v42 }
 0x34b   : > { %1615 = vmatpush1.msra.mxu0 %v3474_v58  ;;  %1686 = vmatpush1.msra.mxu1 %v3476_v8 }
 0x34c   : > { %1616 = vmatprep.subr.mxu0 %v3480_v24  ;;  %1687 = vmatprep.subr.mxu1 %v3482_v9 }
 0x34d   : > { %1617 = vmatpush1.msra.mxu0 %v3486_v10  ;;  %1688 = vmatpush1.msra.mxu1 %v3488_v11 }
 0x34e   : > { %1618 = vmatprep.subr.mxu0 %v3492_v12  ;;  %1689 = vmatprep.subr.mxu1 %v3494_v13 }
 0x34f   : > { %1619 = vmatpush1.msra.mxu0 %v3498_v14  ;;  %1690 = vmatpush1.msra.mxu1 %v3500_v16 }
 0x350   : > { %1620 = vmatprep.subr.mxu0 %v3504_v17  ;;  %1691 = vmatprep.subr.mxu1 %v3506_v18 }
 0x351   : > { %1621 = vmatpush1.msra.mxu0 %v3510_v19  ;;  %1692 = vmatpush1.msra.mxu1 %v3512_v20 }
 0x352   : > { %1622 = vmatprep.subr.mxu0 %v3516_v21  ;;  %1693 = vmatprep.subr.mxu1 %v3518_v22 }
 0x353   : > { %1623 = vmatpush1.msra.mxu0 %v3522_v23  ;;  %1694 = vmatpush1.msra.mxu1 %v3524_v25 }
 0x354   : > { %1624 = vmatprep.subr.mxu0 %v3528_v26  ;;  %1695 = vmatprep.subr.mxu1 %v3530_v27 }
 0x355   : > { %1625 = vmatpush1.msra.mxu0 %v3532_v28  ;;  %1696 = vmatpush1.msra.mxu1 %v3536_v29 }
 0x356   : > { %1626 = vmatprep.subr.mxu0 %v3538_v31  ;;  %1697 = vmatprep.subr.mxu1 %v3540_v32 }
 0x357   : > { %1627 = vmatpush1.msra.mxu0 %v3544_v34  ;;  %1698 = vmatpush1.msra.mxu1 %v3546_v35 }
 0x358   : > { %1628 = vmatprep.subr.mxu0 %v3548_v36  ;;  %1699 = vmatprep.subr.mxu1 %v3552_v37 }
 0x359   : > { %1629 = vmatpush1.msra.mxu0 %v3554_v38  ;;  %1700 = vmatpush1.msra.mxu1 %v3556_v39 }
 0x35a   : > { %1630 = vmatprep.subr.mxu0 %v3560_v40  ;;  %1701 = vmatprep.subr.mxu1 %v3562_v41 }
 0x35b   : > { %1631 = vmatpush1.msra.mxu0 %v3566_v43  ;;  %1702 = vmatpush1.msra.mxu1 %v3568_v44 }
 0x35c   : > { %1632 = vmatprep.subr.mxu0 %v3572_v45  ;;  %1703 = vmatprep.subr.mxu1 %v3574_v46 }
 0x35d   : > { %1633 = vmatpush1.msra.mxu0 %v3578_v47  ;;  %1704 = vmatpush1.msra.mxu1 %v4064_v15 }
 0x35e   : > { %1634 = vmatprep.subr.mxu0 %v4065_v63  ;;  %1705 = vmatprep.subr.mxu1 %v4066_v48  ;;  %v4087_v48 = vld [vmem:[#allocation37_spill] sm:$0xff] }
 0x35f   : > { %1635 = vmatpush1.msra.mxu0 %v4067_v50  ;;  %1706 = vmatpush1.msra.mxu1 %v4068_v54  ;;  %v4086_v50 = vld [vmem:[#allocation39_spill] sm:$0xff] }
 0x360   : > { %1636 = vmatprep.subr.mxu0 %v4069_v6  ;;  %1707 = vmatprep.subr.mxu1 %v4070_v1 }
 0x361   : > { %1637 = vmatpush1.msra.mxu0 %v4071_v33  ;;  %1708 = vmatpush1.msra.mxu1 %v4072_v2  ;;  %v4082_v2 = vld [vmem:[#allocation8_spill] sm:$0xff] }
 0x362   : > { %1638 = vmatprep.subr.mxu0 %v4073_v55  ;;  %1709 = vmatprep.subr.mxu1 %v4074_v51  ;;  %v4083_v55 = vld [vmem:[#allocation9_spill] sm:$0xff] }
 0x363   : > { %1639 = vmatpush1.msra.mxu0 %v4075_v53  ;;  %1710 = vmatpush1.msra.mxu1 %v4076_v5  ;;  %v4084_v53 = vld [vmem:[#allocation36_spill] sm:$0xff] }
 0x364   : > { %1640 = vmatprep.subr.mxu0 %v4077_v7  ;;  %1711 = vmatprep.subr.mxu1 %v4078_v52  ;;  %v4085_v7 = vld [vmem:[#allocation38_spill] sm:$0xff] }
 0x365   : > { %1641 = vmatpush1.msra.mxu0 %v4079_v30  ;;  %1674 = vmatprep.mubr.f32.mxu0 %v4080_v60 }
 0x366   : > { %1712 = vmatpush1.msra.mxu1 %v4081_v49  ;;  %1745 = vmatprep.mubr.f32.mxu1 %v4080_v60 }
 0x367   : > { %1850 = vmatprep.subr.mxu0 %v4082_v2  ;;  %1921 = vmatprep.subr.mxu1 %v4083_v55 }
 0x406   : > { %v1436_v51 = vpop.f32.mrf.mxu0  ;;  %v1507_v52 = vpop.f32.mrf.mxu1 }
 0x407   : > { %v1512_v33 = vadd.f32 %v1436_v51, %v4084_v53  ;;  %v1514_v60 = vadd.f32 %v1507_v52, %v4087_v48  ;;  %v4091_v52 = vld [vmem:[#allocation13_spill] sm:$0xff] }
 0x408   : > { %v1438_v5 = vpop.f32.mrf.mxu0  ;;  %v1509_v54 = vpop.f32.mrf.mxu1 }
 0x409   : > { %v2637_v1 = vmul.f32 -1.442695, %v1512_v33  ;;  %v1513_v6 = vadd.f32 %v1438_v5, %v4085_v7  ;;  %v1515_v49 = vadd.f32 %v1509_v54, %v4086_v50 }
 0x40b   : > { %2748 = vpow2.f32 %v2637_v1  ;;  %v2638_v30 = vmul.f32 -1.442695, %v1513_v6  ;;  %v2639_v63 = vmul.f32 -1.442695, %v1515_v49  ;;  %v4094_v49 = vld [vmem:[#allocation16_spill] sm:$0xff] }
 0x40d   : > { %2750 = vpow2.f32 %v2638_v30  ;;  %v4092_v30 = vld [vmem:[#allocation14_spill] sm:$0xff] }
 0x40e   : > { %2752 = vtanh.f32 %v1514_v60  ;;  %v4093_v60 = vld [vmem:[#allocation15_spill] sm:$0xff] }
 0x40f   : > { %2754 = vpow2.f32 %v2639_v63 }
 0x418   : > { %v2749_v2 = vpop.eup %2748 }
 0x419   : > { %v1519_v15 = vadd.f32 1.0, %v2749_v2 }
 0x41a   : > { %v2751_v55 = vpop.eup %2750 }
 0x41b   : > { %2756 = vrcp.f32 %v1519_v15  ;;  %v1525_v33 = vadd.f32 1.0, %v2751_v55  ;;  %v2753_v51 = vpop.eup %2752  ;;  %v4089_v15 = vld [vmem:[#allocation11_spill] sm:$0xff]  ;;  %v4090_v55 = vld [vmem:[#allocation12_spill] sm:$0xff] }
 0x41c   : > { %v2755_v1 = vpop.eup %2754 }
 0x41d   : > { %2758 = vrcp.f32 %v1525_v33  ;;  %v1532_v7 = vadd.f32 1.0, %v2755_v1  ;;  %v4095_v33 = vld [vmem:[#allocation17_spill] sm:$0xff]  ;;  %v4097_v1 = vld [vmem:[#allocation19_spill] sm:$0xff] }
 0x41f   : > { %2760 = vrcp.f32 %v1532_v7  ;;  %v4101_v7 = vld [vmem:[#allocation23_spill] sm:$0xff] }
 0x428   : > { %v2757_v53 = vpop.eup %2756 }
 0x429   : > { %v1536_v6 = vmul.f32 %v2757_v53, %v2753_v51  ;;  %v4096_v51 = vld [vmem:[#allocation18_spill] sm:$0xff]  ;;  %v4098_v53 = vld [vmem:[#allocation20_spill] sm:$0xff] }
 0x42a   : > { %v2759_v5 = vpop.eup %2758 }
 0x42b   : > { %v1535_v50 = vmul.f32 %v2759_v5, %v3643_v56  ;;  %v4088_v56 = vld [vmem:[#allocation10_spill] sm:$0xff] }
 0x42c   : > { %v2761_v48 = vpop.eup %2760  ;;  %v4100_v5 = vld [vmem:[#allocation22_spill] sm:$0xff] }
 0x42d   : > { %v3718_v54 = vadd.f32 %v1536_v6, %v1535_v50  ;;  %v4099_v6 = vld [vmem:[#allocation21_spill] sm:$0xff]  ;;  %v4102_v50 = vld [vmem:[#allocation24_spill] sm:$0xff] }
 0x42f   : > { %2762 = vtanh.f32 %v3718_v54 }
 0x43c   : > { %v2763_v2 = vpop.eup %2762 }
 0x43d   : > { %v1539_v63 = vmul.f32 %v2763_v2, %v2761_v48  ;;  %v4103_v48 = vld [vmem:[#allocation25_spill] sm:$0xff]  ;;  %v4104_v2 = vmov 0.0  }
 0x43f   : > { %2640 = vst [vmem:[%s2963_s10 + $0x18] sm:$0xff] %v1539_v63  ;;  %1675 = vmatmul.mubr.f32.vlgmr.msra.gmra.mxu0 %v1539_v63  ;;  %1746 = vmatmul.mubr.f32.vlgmr.msra.gmra.mxu1 %v1539_v63  ;;  %v4105_v63 = vld [vmem:[#allocation26_spill] sm:$0xff] }
 0x440   : > { %1851 = vmatpush1.msra.mxu0 %v3450_v62  ;;  %1922 = vmatpush1.msra.mxu1 %v3452_v57 }
 0x441   : > { %1852 = vmatprep.subr.mxu0 %v3456_v61  ;;  %1923 = vmatprep.subr.mxu1 %v3458_v0 }
 0x442   : > { %1853 = vmatpush1.msra.mxu0 %v3462_v4  ;;  %1924 = vmatpush1.msra.mxu1 %v3464_v3 }
 0x443   : > { %1854 = vmatprep.subr.mxu0 %v3468_v59  ;;  %1925 = vmatprep.subr.mxu1 %v3470_v42 }
 0x444   : > { %1855 = vmatpush1.msra.mxu0 %v3474_v58  ;;  %1926 = vmatpush1.msra.mxu1 %v3476_v8 }
 0x445   : > { %1856 = vmatprep.subr.mxu0 %v3480_v24  ;;  %1927 = vmatprep.subr.mxu1 %v3482_v9 }
 0x446   : > { %1857 = vmatpush1.msra.mxu0 %v3486_v10  ;;  %1928 = vmatpush1.msra.mxu1 %v3488_v11 }
 0x447   : > { %1858 = vmatprep.subr.mxu0 %v3492_v12  ;;  %1929 = vmatprep.subr.mxu1 %v3494_v13 }
 0x448   : > { %1859 = vmatpush1.msra.mxu0 %v3498_v14  ;;  %1930 = vmatpush1.msra.mxu1 %v3500_v16 }
 0x449   : > { %1860 = vmatprep.subr.mxu0 %v3504_v17  ;;  %1931 = vmatprep.subr.mxu1 %v3506_v18 }
 0x44a   : > { %1861 = vmatpush1.msra.mxu0 %v3510_v19  ;;  %1932 = vmatpush1.msra.mxu1 %v3512_v20 }
 0x44b   : > { %1862 = vmatprep.subr.mxu0 %v3516_v21  ;;  %1933 = vmatprep.subr.mxu1 %v3518_v22 }
 0x44c   : > { %1863 = vmatpush1.msra.mxu0 %v3522_v23  ;;  %1934 = vmatpush1.msra.mxu1 %v3524_v25 }
 0x44d   : > { %1864 = vmatprep.subr.mxu0 %v3528_v26  ;;  %1935 = vmatprep.subr.mxu1 %v3530_v27 }
 0x44e   : > { %1865 = vmatpush1.msra.mxu0 %v3532_v28  ;;  %1936 = vmatpush1.msra.mxu1 %v3536_v29 }
 0x44f   : > { %1866 = vmatprep.subr.mxu0 %v3538_v31  ;;  %1937 = vmatprep.subr.mxu1 %v3540_v32 }
 0x450   : > { %1867 = vmatpush1.msra.mxu0 %v3544_v34  ;;  %1938 = vmatpush1.msra.mxu1 %v3546_v35 }
 0x451   : > { %1868 = vmatprep.subr.mxu0 %v3548_v36  ;;  %1939 = vmatprep.subr.mxu1 %v3552_v37 }
 0x452   : > { %1869 = vmatpush1.msra.mxu0 %v3554_v38  ;;  %1940 = vmatpush1.msra.mxu1 %v3556_v39 }
 0x453   : > { %1870 = vmatprep.subr.mxu0 %v3560_v40  ;;  %1941 = vmatprep.subr.mxu1 %v3562_v41 }
 0x454   : > { %1871 = vmatpush1.msra.mxu0 %v3566_v43  ;;  %1942 = vmatpush1.msra.mxu1 %v3568_v44 }
 0x455   : > { %1872 = vmatprep.subr.mxu0 %v3572_v45  ;;  %1943 = vmatprep.subr.mxu1 %v3574_v46 }
 0x456   : > { %1873 = vmatpush1.msra.mxu0 %v3578_v47  ;;  %1944 = vmatpush1.msra.mxu1 %v4088_v56 }
 0x457   : > { %1874 = vmatprep.subr.mxu0 %v4089_v15  ;;  %1945 = vmatprep.subr.mxu1 %v4090_v55  ;;  %v4111_v55 = vld [vmem:[#allocation41_spill] sm:$0xff] }
 0x458   : > { %1875 = vmatpush1.msra.mxu0 %v4091_v52  ;;  %1946 = vmatpush1.msra.mxu1 %v4092_v30  ;;  %v4110_v52 = vld [vmem:[#allocation43_spill] sm:$0xff] }
 0x459   : > { %1876 = vmatprep.subr.mxu0 %v4093_v60  ;;  %1947 = vmatprep.subr.mxu1 %v4094_v49 }
 0x45a   : > { %1877 = vmatpush1.msra.mxu0 %v4095_v33  ;;  %1948 = vmatpush1.msra.mxu1 %v4096_v51  ;;  %v4106_v51 = vld [vmem:[#allocation8_spill] sm:$0xff] }
 0x45b   : > { %1878 = vmatprep.subr.mxu0 %v4097_v1  ;;  %1949 = vmatprep.subr.mxu1 %v4098_v53  ;;  %v4107_v1 = vld [vmem:[#allocation9_spill] sm:$0xff] }
 0x45c   : > { %1879 = vmatpush1.msra.mxu0 %v4099_v6  ;;  %1950 = vmatpush1.msra.mxu1 %v4100_v5  ;;  %v4108_v6 = vld [vmem:[#allocation40_spill] sm:$0xff] }
 0x45d   : > { %1880 = vmatprep.subr.mxu0 %v4101_v7  ;;  %1951 = vmatprep.subr.mxu1 %v4102_v50  ;;  %v4109_v7 = vld [vmem:[#allocation42_spill] sm:$0xff] }
 0x45e   : > { %1881 = vmatpush1.msra.mxu0 %v4103_v48  ;;  %1914 = vmatprep.mubr.f32.mxu0 %v4104_v2 }
 0x45f   : > { %1952 = vmatpush1.msra.mxu1 %v4105_v63  ;;  %1985 = vmatprep.mubr.f32.mxu1 %v4104_v2 }
 0x460   : > { %2090 = vmatprep.subr.mxu0 %v4106_v51  ;;  %2161 = vmatprep.subr.mxu1 %v4107_v1 }
 0x4ff   : > { %v1676_v53 = vpop.f32.mrf.mxu0  ;;  %v1747_v50 = vpop.f32.mrf.mxu1 }
 0x500   : > { %v1752_v33 = vadd.f32 %v1676_v53, %v4108_v6  ;;  %v1754_v2 = vadd.f32 %v1747_v50, %v4111_v55 }
 0x501   : > { %v1678_v5 = vpop.f32.mrf.mxu0  ;;  %v1749_v30 = vpop.f32.mrf.mxu1 }
 0x502   : > { %v2641_v49 = vmul.f32 -1.442695, %v1752_v33  ;;  %v1753_v60 = vadd.f32 %v1678_v5, %v4109_v7  ;;  %v1755_v63 = vadd.f32 %v1749_v30, %v4110_v52 }
 0x504   : > { %2764 = vpow2.f32 %v2641_v49  ;;  %v2642_v48 = vmul.f32 -1.442695, %v1753_v60  ;;  %v2643_v15 = vmul.f32 -1.442695, %v1755_v63  ;;  %v2329_v63 = vld [vmem:[#allocation5 + $0x1f8] sm:$0xff] }
 0x506   : > { %2766 = vpow2.f32 %v2642_v48 }
 0x507   : > { %2768 = vtanh.f32 %v1754_v2  ;;  %v2327_v2 = vld [vmem:[#allocation5 + $0x1e8] sm:$0xff] }
 0x508   : > { %2770 = vpow2.f32 %v2643_v15 }
 0x511   : > { %v2765_v51 = vpop.eup %2764 }
 0x512   : > { %v1759_v56 = vadd.f32 1.0, %v2765_v51  ;;  %v2326_v51 = vld [vmem:[#allocation5 + $0x1e0] sm:$0xff] }
 0x513   : > { %v2767_v1 = vpop.eup %2766 }
 0x514   : > { %2772 = vrcp.f32 %v1759_v56  ;;  %v1765_v33 = vadd.f32 1.0, %v2767_v1  ;;  %v2769_v53 = vpop.eup %2768  ;;  %v2328_v1 = vld [vmem:[#allocation5 + $0x1f0] sm:$0xff] }
 0x515   : > { %v2771_v49 = vpop.eup %2770 }
 0x516   : > { %2774 = vrcp.f32 %v1765_v33  ;;  %v1772_v7 = vadd.f32 1.0, %v2771_v49  ;;  %v2323_v33 = vld [vmem:[#allocation5 + $0x1c8] sm:$0xff]  ;;  %v2322_v49 = vld [vmem:[#allocation5 + $0x1c0] sm:$0xff] }
 0x518   : > { %2776 = vrcp.f32 %v1772_v7  ;;  %v2318_v7 = vld [vmem:[#allocation5 + $0x1a0] sm:$0xff] }
 0x521   : > { %v2773_v6 = vpop.eup %2772 }
 0x522   : > { %v1776_v60 = vmul.f32 %v2773_v6, %v2769_v53  ;;  %v2325_v53 = vld [vmem:[#allocation5 + $0x1d8] sm:$0xff]  ;;  %v2324_v6 = vld [vmem:[#allocation5 + $0x1d0] sm:$0xff] }
 0x523   : > { %v2775_v5 = vpop.eup %2774 }
 0x524   : > { %v1775_v52 = vmul.f32 %v2775_v5, %v3718_v54  ;;  %v2321_v5 = vld [vmem:[#allocation5 + $0x1b8] sm:$0xff] }
 0x525   : > { %v2777_v55 = vpop.eup %2776 }
 0x526   : > { %v3793_v30 = vadd.f32 %v1776_v60, %v1775_v52  ;;  %v2319_v60 = vld [vmem:[#allocation5 + $0x1a8] sm:$0xff]  ;;  %v2320_v52 = vld [vmem:[#allocation5 + $0x1b0] sm:$0xff] }
 0x528   : > { %2778 = vtanh.f32 %v3793_v30 }
 0x535   : > { %v2779_v50 = vpop.eup %2778 }
 0x536   : > { %v1779_v15 = vmul.f32 %v2779_v50, %v2777_v55  ;;  %v2317_v55 = vld [vmem:[#allocation5 + $0x198] sm:$0xff]  ;;  %v2314_v50 = vld [vmem:[#allocation5 + $0x180] sm:$0xff] }
 0x538   : > { %2644 = vst [vmem:[%s2963_s10 + $0x20] sm:$0xff] %v1779_v15  ;;  %1915 = vmatmul.mubr.f32.vlgmr.msra.gmra.mxu0 %v1779_v15  ;;  %1986 = vmatmul.mubr.f32.vlgmr.msra.gmra.mxu1 %v1779_v15  ;;  %v2316_v15 = vld [vmem:[#allocation5 + $0x190] sm:$0xff] }
 0x539   : > { %2091 = vmatpush1.msra.mxu0 %v3450_v62  ;;  %2162 = vmatpush1.msra.mxu1 %v3452_v57  ;;  %v4112_v62 = vld [vmem:[#allocation10_spill] sm:$0xff]  ;;  %v4113_v57 = vld [vmem:[#allocation11_spill] sm:$0xff] }
 0x53a   : > { %2092 = vmatprep.subr.mxu0 %v3456_v61  ;;  %2163 = vmatprep.subr.mxu1 %v3458_v0  ;;  %v4114_v61 = vld [vmem:[#allocation12_spill] sm:$0xff]  ;;  %v4115_v0 = vld [vmem:[#allocation13_spill] sm:$0xff] }
 0x53b   : > { %2093 = vmatpush1.msra.mxu0 %v3462_v4  ;;  %2164 = vmatpush1.msra.mxu1 %v3464_v3  ;;  %v4116_v4 = vld [vmem:[#allocation14_spill] sm:$0xff]  ;;  %v4117_v3 = vld [vmem:[#allocation15_spill] sm:$0xff] }
 0x53c   : > { %2094 = vmatprep.subr.mxu0 %v3468_v59  ;;  %2165 = vmatprep.subr.mxu1 %v3470_v42  ;;  %v4118_v59 = vld [vmem:[#allocation16_spill] sm:$0xff]  ;;  %v4119_v42 = vld [vmem:[#allocation17_spill] sm:$0xff] }
 0x53d   : > { %2095 = vmatpush1.msra.mxu0 %v3474_v58  ;;  %2166 = vmatpush1.msra.mxu1 %v3476_v8  ;;  %v4120_v58 = vld [vmem:[#allocation18_spill] sm:$0xff]  ;;  %v4121_v8 = vld [vmem:[#allocation19_spill] sm:$0xff] }
 0x53e   : > { %2096 = vmatprep.subr.mxu0 %v3480_v24  ;;  %2167 = vmatprep.subr.mxu1 %v3482_v9  ;;  %v4122_v24 = vld [vmem:[#allocation20_spill] sm:$0xff]  ;;  %v4123_v9 = vld [vmem:[#allocation21_spill] sm:$0xff] }
 0x53f   : > { %2097 = vmatpush1.msra.mxu0 %v3486_v10  ;;  %2168 = vmatpush1.msra.mxu1 %v3488_v11  ;;  %v4124_v10 = vld [vmem:[#allocation22_spill] sm:$0xff]  ;;  %v4125_v11 = vld [vmem:[#allocation23_spill] sm:$0xff] }
 0x540   : > { %2098 = vmatprep.subr.mxu0 %v3492_v12  ;;  %2169 = vmatprep.subr.mxu1 %v3494_v13  ;;  %v4126_v12 = vld [vmem:[#allocation24_spill] sm:$0xff]  ;;  %v4127_v13 = vld [vmem:[#allocation25_spill] sm:$0xff] }
 0x541   : > { %2099 = vmatpush1.msra.mxu0 %v3498_v14  ;;  %2170 = vmatpush1.msra.mxu1 %v3500_v16  ;;  %v4128_v14 = vmov 0.0   ;;  %v4129_v16 = vld [vmem:[#allocation26_spill] sm:$0xff] }
 0x542   : > { %2100 = vmatprep.subr.mxu0 %v3504_v17  ;;  %2171 = vmatprep.subr.mxu1 %v3506_v18  ;;  %v4130_v18 = vld [vmem:[#allocation44_spill] sm:$0xff] }
 0x543   : > { %2101 = vmatpush1.msra.mxu0 %v3510_v19  ;;  %2172 = vmatpush1.msra.mxu1 %v3512_v20 }
 0x544   : > { %2102 = vmatprep.subr.mxu0 %v3516_v21  ;;  %2173 = vmatprep.subr.mxu1 %v3518_v22  ;;  %v4131_v22 = vld [vmem:[#allocation46_spill] sm:$0xff] }
 0x545   : > { %2103 = vmatpush1.msra.mxu0 %v3522_v23  ;;  %2174 = vmatpush1.msra.mxu1 %v3524_v25 }
 0x546   : > { %2104 = vmatprep.subr.mxu0 %v3528_v26  ;;  %2175 = vmatprep.subr.mxu1 %v3530_v27 }
 0x547   : > { %2105 = vmatpush1.msra.mxu0 %v3532_v28  ;;  %2176 = vmatpush1.msra.mxu1 %v3536_v29  ;;  %v4132_v28 = vld [vmem:[#allocation47_spill] sm:$0xff] }
 0x548   : > { %2106 = vmatprep.subr.mxu0 %v3538_v31  ;;  %2177 = vmatprep.subr.mxu1 %v3540_v32  ;;  %v4133_v31 = vld [vmem:[#allocation45_spill] sm:$0xff] }
 0x549   : > { %2107 = vmatpush1.msra.mxu0 %v3544_v34  ;;  %2178 = vmatpush1.msra.mxu1 %v3546_v35 }
 0x54a   : > { %2108 = vmatprep.subr.mxu0 %v3548_v36  ;;  %2179 = vmatprep.subr.mxu1 %v3552_v37 }
 0x54b   : > { %2109 = vmatpush1.msra.mxu0 %v3554_v38  ;;  %2180 = vmatpush1.msra.mxu1 %v3556_v39 }
 0x54c   : > { %2110 = vmatprep.subr.mxu0 %v3560_v40  ;;  %2181 = vmatprep.subr.mxu1 %v3562_v41 }
 0x54d   : > { %2111 = vmatpush1.msra.mxu0 %v3566_v43  ;;  %2182 = vmatpush1.msra.mxu1 %v3568_v44 }
 0x54e   : > { %2112 = vmatprep.subr.mxu0 %v3572_v45  ;;  %2183 = vmatprep.subr.mxu1 %v3574_v46 }
 0x54f   : > { %2113 = vmatpush1.msra.mxu0 %v3578_v47  ;;  %2184 = vmatpush1.msra.mxu1 %v4112_v62  ;;  %v2311_v62 = vld [vmem:[#allocation5 + $0x168] sm:$0xff] }
 0x550   : > { %2114 = vmatprep.subr.mxu0 %v4113_v57  ;;  %2185 = vmatprep.subr.mxu1 %v4114_v61  ;;  %v2313_v57 = vld [vmem:[#allocation5 + $0x178] sm:$0xff]  ;;  %v2310_v61 = vld [vmem:[#allocation5 + $0x160] sm:$0xff] }
 0x551   : > { %2115 = vmatpush1.msra.mxu0 %v4115_v0  ;;  %2186 = vmatpush1.msra.mxu1 %v4116_v4  ;;  %v2312_v0 = vld [vmem:[#allocation5 + $0x170] sm:$0xff]  ;;  %v2307_v4 = vld [vmem:[#allocation5 + $0x148] sm:$0xff] }
 0x552   : > { %2116 = vmatprep.subr.mxu0 %v4117_v3  ;;  %2187 = vmatprep.subr.mxu1 %v4118_v59  ;;  %v2309_v3 = vld [vmem:[#allocation5 + $0x158] sm:$0xff]  ;;  %v2306_v59 = vld [vmem:[#allocation5 + $0x140] sm:$0xff] }
 0x553   : > { %2117 = vmatpush1.msra.mxu0 %v4119_v42  ;;  %2188 = vmatpush1.msra.mxu1 %v4120_v58  ;;  %v2308_v42 = vld [vmem:[#allocation5 + $0x150] sm:$0xff]  ;;  %v2303_v58 = vld [vmem:[#allocation5 + $0x128] sm:$0xff] }
 0x554   : > { %2118 = vmatprep.subr.mxu0 %v4121_v8  ;;  %2189 = vmatprep.subr.mxu1 %v4122_v24  ;;  %v2305_v8 = vld [vmem:[#allocation5 + $0x138] sm:$0xff]  ;;  %v2302_v24 = vld [vmem:[#allocation5 + $0x120] sm:$0xff] }
 0x555   : > { %2119 = vmatpush1.msra.mxu0 %v4123_v9  ;;  %2190 = vmatpush1.msra.mxu1 %v4124_v10  ;;  %v2304_v9 = vld [vmem:[#allocation5 + $0x130] sm:$0xff]  ;;  %v2299_v10 = vld [vmem:[#allocation5 + $0x108] sm:$0xff] }
 0x556   : > { %2120 = vmatprep.subr.mxu0 %v4125_v11  ;;  %2191 = vmatprep.subr.mxu1 %v4126_v12  ;;  %v2301_v11 = vld [vmem:[#allocation5 + $0x118] sm:$0xff]  ;;  %v2298_v12 = vld [vmem:[#allocation5 + $0x100] sm:$0xff] }
 0x557   : > { %2121 = vmatpush1.msra.mxu0 %v4127_v13  ;;  %2154 = vmatprep.mubr.f32.mxu0 %v4128_v14  ;;  %v2300_v13 = vld [vmem:[#allocation5 + $0x110] sm:$0xff] }
 0x558   : > { %2192 = vmatpush1.msra.mxu1 %v4129_v16  ;;  %2225 = vmatprep.mubr.f32.mxu1 %v4128_v14  ;;  %v2297_v16 = vld [vmem:[#allocation5 + $0xf8] sm:$0xff] }
 0x559   : > { %2330 = vmatprep.subr.mxu0 %v2327_v2  ;;  %2401 = vmatprep.subr.mxu1 %v2329_v63  ;;  %v2268_v2 = vld [vmem:[#allocation5 + $0x10] sm:$0xff] }
 0x5f8   : > { %v1916_v17 = vpop.f32.mrf.mxu0  ;;  %v1987_v25 = vpop.f32.mrf.mxu1 }
 0x5f9   : > { %v1992_v19 = vadd.f32 %v1916_v17, %v4130_v18  ;;  %v1994_v32 = vadd.f32 %v1987_v25, %v4133_v31  ;;  %v2294_v17 = vld [vmem:[#allocation5 + $0xe0] sm:$0xff]  ;;  %v2296_v18 = vld [vmem:[#allocation5 + $0xf0] sm:$0xff]  ;;  %v2289_v25 = vld [vmem:[#allocation5 + $0xb8] sm:$0xff] }
 0x5fa   : > { %v1918_v20 = vpop.f32.mrf.mxu0  ;;  %v1989_v27 = vpop.f32.mrf.mxu1  ;;  %v2282_v31 = vld [vmem:[#allocation5 + $0x80] sm:$0xff] }
 0x5fb   : > { %v2645_v21 = vmul.f32 -1.442695, %v1992_v19  ;;  %v1993_v23 = vadd.f32 %v1918_v20, %v4131_v22  ;;  %v1995_v29 = vadd.f32 %v1989_v27, %v4132_v28  ;;  %v2291_v19 = vld [vmem:[#allocation5 + $0xc8] sm:$0xff]  ;;  %v2293_v20 = vld [vmem:[#allocation5 + $0xd8] sm:$0xff]  ;;  %v2292_v22 = vld [vmem:[#allocation5 + $0xd0] sm:$0xff] }
 0x5fc   : > { %v2288_v27 = vld [vmem:[#allocation5 + $0xb0] sm:$0xff]  ;;  %v2283_v28 = vld [vmem:[#allocation5 + $0x88] sm:$0xff] }
 0x5fd   : > { %2780 = vpow2.f32 %v2645_v21  ;;  %v2646_v26 = vmul.f32 -1.442695, %v1993_v23  ;;  %v2647_v34 = vmul.f32 -1.442695, %v1995_v29  ;;  %v2290_v21 = vld [vmem:[#allocation5 + $0xc0] sm:$0xff]  ;;  %v2287_v23 = vld [vmem:[#allocation5 + $0xa8] sm:$0xff] }
 0x5fe   : > { %v2285_v29 = vld [vmem:[#allocation5 + $0x98] sm:$0xff] }
 0x5ff   : > { %2782 = vpow2.f32 %v2646_v26  ;;  %v2286_v26 = vld [vmem:[#allocation5 + $0xa0] sm:$0xff] }
 0x600   : > { %2784 = vtanh.f32 %v1994_v32  ;;  %v2284_v32 = vld [vmem:[#allocation5 + $0x90] sm:$0xff] }
 0x601   : > { %2786 = vpow2.f32 %v2647_v34  ;;  %v2279_v34 = vld [vmem:[#allocation5 + $0x68] sm:$0xff] }
 0x60a   : > { %v2781_v35 = vpop.eup %2780 }
 0x60b   : > { %v1999_v36 = vadd.f32 1.0, %v2781_v35  ;;  %v2281_v35 = vld [vmem:[#allocation5 + $0x78] sm:$0xff] }
 0x60c   : > { %v2783_v37 = vpop.eup %2782 }
 0x60d   : > { %2788 = vrcp.f32 %v1999_v36  ;;  %v2005_v38 = vadd.f32 1.0, %v2783_v37  ;;  %v2785_v39 = vpop.eup %2784  ;;  %v2278_v36 = vld [vmem:[#allocation5 + $0x60] sm:$0xff]  ;;  %v2280_v37 = vld [vmem:[#allocation5 + $0x70] sm:$0xff] }
 0x60e   : > { %v2787_v40 = vpop.eup %2786 }
 0x60f   : > { %2790 = vrcp.f32 %v2005_v38  ;;  %v2012_v45 = vadd.f32 1.0, %v2787_v40  ;;  %v2275_v38 = vld [vmem:[#allocation5 + $0x48] sm:$0xff]  ;;  %v2274_v40 = vld [vmem:[#allocation5 + $0x40] sm:$0xff] }
 0x611   : > { %2792 = vrcp.f32 %v2012_v45  ;;  %v2270_v45 = vld [vmem:[#allocation5 + $0x20] sm:$0xff] }
 0x61a   : > { %v2789_v41 = vpop.eup %2788 }
 0x61b   : > { %v2016_v43 = vmul.f32 %v2789_v41, %v2785_v39  ;;  %v2277_v39 = vld [vmem:[#allocation5 + $0x58] sm:$0xff]  ;;  %v2276_v41 = vld [vmem:[#allocation5 + $0x50] sm:$0xff] }
 0x61c   : > { %v2791_v44 = vpop.eup %2790 }
 0x61d   : > { %v2015_v46 = vmul.f32 %v2791_v44, %v3793_v30  ;;  %v2315_v30 = vld [vmem:[#allocation5 + $0x188] sm:$0xff]  ;;  %v2273_v44 = vld [vmem:[#allocation5 + $0x38] sm:$0xff] }
 0x61e   : > { %v2793_v54 = vpop.eup %2792 }
 0x61f   : > { %v3866_v47 = vadd.f32 %v2016_v43, %v2015_v46  ;;  %v2271_v43 = vld [vmem:[#allocation5 + $0x28] sm:$0xff]  ;;  %v2272_v46 = vld [vmem:[#allocation5 + $0x30] sm:$0xff] }
 0x621   : > { %2794 = vtanh.f32 %v3866_v47 }
 0x62e   : > { %v2795_v56 = vpop.eup %2794 }
 0x62f   : > { %v2019_v48 = vmul.f32 %v2795_v56, %v2793_v54  ;;  %v2267_v54 = vld [vmem:[#allocation5 + $0x8] sm:$0xff]  ;;  %v2269_v56 = vld [vmem:[#allocation5 + $0x18] sm:$0xff] }
 0x631   : > { %2648 = vst [vmem:[%s2963_s10 + $0x28] sm:$0xff] %v2019_v48  ;;  %2155 = vmatmul.mubr.f32.vlgmr.msra.gmra.mxu0 %v2019_v48  ;;  %2226 = vmatmul.mubr.f32.vlgmr.msra.gmra.mxu1 %v2019_v48  ;;  %v2266_v48 = vld [vmem:[#allocation5] sm:$0xff] }
 0x632   : > { %2394 = vmatprep.mubr.f32.mxu0 %v4128_v14  ;;  %2465 = vmatprep.mubr.f32.mxu1 %v4128_v14  ;;  %v2295_v14 = vld [vmem:[#allocation5 + $0xe8] sm:$0xff] }
 0x633   : > { %2331 = vmatpush1.msra.mxu0 %v2326_v51  ;;  %2402 = vmatpush1.msra.mxu1 %v2328_v1  ;;  %v4134_v51 = vld [vmem:[#allocation48_spill] sm:$0xff] }
 0x634   : > { %2332 = vmatprep.subr.mxu0 %v2323_v33  ;;  %2403 = vmatprep.subr.mxu1 %v2325_v53 }
 0x635   : > { %2333 = vmatpush1.msra.mxu0 %v2322_v49  ;;  %2404 = vmatpush1.msra.mxu1 %v2324_v6  ;;  %v4135_v49 = vld [vmem:[#allocation50_spill] sm:$0xff] }
 0x636   : > { %2334 = vmatprep.subr.mxu0 %v2319_v60  ;;  %2405 = vmatprep.subr.mxu1 %v2321_v5 }
 0x637   : > { %2335 = vmatpush1.msra.mxu0 %v2318_v7  ;;  %2406 = vmatpush1.msra.mxu1 %v2320_v52  ;;  %v4136_v52 = vld [vmem:[#allocation51_spill] sm:$0xff] }
 0x638   : > { %2336 = vmatprep.subr.mxu0 %v2315_v30  ;;  %2407 = vmatprep.subr.mxu1 %v2317_v55  ;;  %v4137_v55 = vld [vmem:[#allocation49_spill] sm:$0xff] }
 0x639   : > { %2337 = vmatpush1.msra.mxu0 %v2314_v50  ;;  %2408 = vmatpush1.msra.mxu1 %v2316_v15 }
 0x63a   : > { %2338 = vmatprep.subr.mxu0 %v2311_v62  ;;  %2409 = vmatprep.subr.mxu1 %v2313_v57 }
 0x63b   : > { %2339 = vmatpush1.msra.mxu0 %v2310_v61  ;;  %2410 = vmatpush1.msra.mxu1 %v2312_v0 }
 0x63c   : > { %2340 = vmatprep.subr.mxu0 %v2307_v4  ;;  %2411 = vmatprep.subr.mxu1 %v2309_v3 }
 0x63d   : > { %2341 = vmatpush1.msra.mxu0 %v2306_v59  ;;  %2412 = vmatpush1.msra.mxu1 %v2308_v42 }
 0x63e   : > { %2342 = vmatprep.subr.mxu0 %v2303_v58  ;;  %2413 = vmatprep.subr.mxu1 %v2305_v8 }
 0x63f   : > { %2343 = vmatpush1.msra.mxu0 %v2302_v24  ;;  %2414 = vmatpush1.msra.mxu1 %v2304_v9 }
 0x640   : > { %2344 = vmatprep.subr.mxu0 %v2299_v10  ;;  %2415 = vmatprep.subr.mxu1 %v2301_v11 }
 0x641   : > { %2345 = vmatpush1.msra.mxu0 %v2298_v12  ;;  %2416 = vmatpush1.msra.mxu1 %v2300_v13 }
 0x642   : > { %2346 = vmatprep.subr.mxu0 %v2295_v14  ;;  %2417 = vmatprep.subr.mxu1 %v2297_v16  ;;  %v4138_v14 = vld [vmem:[#allocation52_spill] sm:$0xff] }
 0x643   : > { %2347 = vmatpush1.msra.mxu0 %v2294_v17  ;;  %2418 = vmatpush1.msra.mxu1 %v2296_v18 }
 0x644   : > { %2348 = vmatprep.subr.mxu0 %v2291_v19  ;;  %2419 = vmatprep.subr.mxu1 %v2293_v20  ;;  %v4139_v19 = vld [vmem:[#allocation54_spill] sm:$0xff] }
 0x645   : > { %2349 = vmatpush1.msra.mxu0 %v2290_v21  ;;  %2420 = vmatpush1.msra.mxu1 %v2292_v22 }
 0x646   : > { %2350 = vmatprep.subr.mxu0 %v2287_v23  ;;  %2421 = vmatprep.subr.mxu1 %v2289_v25  ;;  %v4140_v23 = vld [vmem:[#allocation55_spill] sm:$0xff] }
 0x647   : > { %2351 = vmatpush1.msra.mxu0 %v2286_v26  ;;  %2422 = vmatpush1.msra.mxu1 %v2288_v27  ;;  %v4141_v26 = vld [vmem:[#allocation53_spill] sm:$0xff] }
 0x648   : > { %2352 = vmatprep.subr.mxu0 %v2283_v28  ;;  %2423 = vmatprep.subr.mxu1 %v2285_v29 }
 0x649   : > { %2353 = vmatpush1.msra.mxu0 %v2282_v31  ;;  %2424 = vmatpush1.msra.mxu1 %v2284_v32 }
 0x64a   : > { %2354 = vmatprep.subr.mxu0 %v2279_v34  ;;  %2425 = vmatprep.subr.mxu1 %v2281_v35 }
 0x64b   : > { %2355 = vmatpush1.msra.mxu0 %v2278_v36  ;;  %2426 = vmatpush1.msra.mxu1 %v2280_v37 }
 0x64c   : > { %2356 = vmatprep.subr.mxu0 %v2275_v38  ;;  %2427 = vmatprep.subr.mxu1 %v2277_v39 }
 0x64d   : > { %2357 = vmatpush1.msra.mxu0 %v2274_v40  ;;  %2428 = vmatpush1.msra.mxu1 %v2276_v41 }
 0x64e   : > { %2358 = vmatprep.subr.mxu0 %v2271_v43  ;;  %2429 = vmatprep.subr.mxu1 %v2273_v44 }
 0x64f   : > { %2359 = vmatpush1.msra.mxu0 %v2270_v45  ;;  %2430 = vmatpush1.msra.mxu1 %v2272_v46 }
 0x650   : > { %2360 = vmatprep.subr.mxu0 %v2267_v54  ;;  %2431 = vmatprep.subr.mxu1 %v2269_v56 }
 0x651   : > { %2361 = vmatpush1.msra.mxu0 %v2266_v48  ;;  %2432 = vmatpush1.msra.mxu1 %v2268_v2 }
 0x6f1   : > { %v2156_v63 = vpop.f32.mrf.mxu0  ;;  %v2227_v60 = vpop.f32.mrf.mxu1 }
 0x6f2   : > { %v2232_v1 = vadd.f32 %v2156_v63, %v4134_v51  ;;  %v2234_v50 = vadd.f32 %v2227_v60, %v4137_v55 }
 0x6f3   : > { %v2158_v33 = vpop.f32.mrf.mxu0  ;;  %v2229_v7 = vpop.f32.mrf.mxu1 }
 0x6f4   : > { %v2649_v53 = vmul.f32 -1.442695, %v2232_v1  ;;  %v2233_v6 = vadd.f32 %v2158_v33, %v4135_v49  ;;  %v2235_v30 = vadd.f32 %v2229_v7, %v4136_v52 }
 0x6f6   : > { %2796 = vpow2.f32 %v2649_v53  ;;  %v2650_v5 = vmul.f32 -1.442695, %v2233_v6  ;;  %v2651_v15 = vmul.f32 -1.442695, %v2235_v30 }
 0x6f8   : > { %2798 = vpow2.f32 %v2650_v5 }
 0x6f9   : > { %2800 = vtanh.f32 %v2234_v50 }
 0x6fa   : > { %2802 = vpow2.f32 %v2651_v15 }
 0x703   : > { %v2797_v62 = vpop.eup %2796 }
 0x704   : > { %v2239_v57 = vadd.f32 1.0, %v2797_v62 }
 0x705   : > { %v2799_v61 = vpop.eup %2798 }
 0x706   : > { %2804 = vrcp.f32 %v2239_v57  ;;  %v2245_v0 = vadd.f32 1.0, %v2799_v61  ;;  %v2801_v4 = vpop.eup %2800 }
 0x707   : > { %v2803_v3 = vpop.eup %2802 }
 0x708   : > { %2806 = vrcp.f32 %v2245_v0  ;;  %v2252_v8 = vadd.f32 1.0, %v2803_v3 }
 0x70a   : > { %2808 = vrcp.f32 %v2252_v8 }
 0x713   : > { %v2805_v59 = vpop.eup %2804 }
 0x714   : > { %v2256_v42 = vmul.f32 %v2805_v59, %v2801_v4 }
 0x715   : > { %v2807_v58 = vpop.eup %2806 }
 0x716   : > { %v2255_v24 = vmul.f32 %v2807_v58, %v3866_v47 }
 0x717   : > { %v2809_v10 = vpop.eup %2808 }
 0x718   : > { %v2257_v9 = vadd.f32 %v2256_v42, %v2255_v24 }
 0x71a   : > { %2810 = vtanh.f32 %v2257_v9 }
 0x727   : > { %v2811_v11 = vpop.eup %2810 }
 0x728   : > { %v2259_v12 = vmul.f32 %v2811_v11, %v2809_v10 }
 0x72a   : > { %2652 = vst [vmem:[%s2963_s10 + $0x30] sm:$0xff] %v2259_v12  ;;  %2395 = vmatmul.mubr.f32.vlgmr.msra.gmra.mxu0 %v2259_v12  ;;  %2466 = vmatmul.mubr.f32.vlgmr.msra.gmra.mxu1 %v2259_v12 }
 0x7ea   : > { %v2396_v13 = vpop.f32.mrf.mxu0  ;;  %v2467_v21 = vpop.f32.mrf.mxu1 }
 0x7eb   : > { %v2472_v16 = vadd.f32 %v2396_v13, %v4138_v14  ;;  %v2474_v27 = vadd.f32 %v2467_v21, %v4141_v26 }
 0x7ec   : > { %v2398_v17 = vpop.f32.mrf.mxu0  ;;  %v2469_v47 = vpop.f32.mrf.mxu1 }
 0x7ed   : > { %v2653_v18 = vmul.f32 -1.442695, %v2472_v16  ;;  %v2473_v20 = vadd.f32 %v2398_v17, %v4139_v19  ;;  %v2475_v25 = vadd.f32 %v2469_v47, %v4140_v23 }
 0x7ef   : > { %2812 = vpow2.f32 %v2653_v18  ;;  %v2654_v22 = vmul.f32 -1.442695, %v2473_v20  ;;  %v2655_v28 = vmul.f32 -1.442695, %v2475_v25 }
 0x7f1   : > { %2814 = vpow2.f32 %v2654_v22 }
 0x7f2   : > { %2816 = vtanh.f32 %v2474_v27 }
 0x7f3   : > { %2818 = vpow2.f32 %v2655_v28 }
 0x7fc   : > { %v2813_v29 = vpop.eup %2812 }
 0x7fd   : > { %v2479_v31 = vadd.f32 1.0, %v2813_v29 }
 0x7fe   : > { %v2815_v32 = vpop.eup %2814 }
 0x7ff   : > { %2820 = vrcp.f32 %v2479_v31  ;;  %v2485_v34 = vadd.f32 1.0, %v2815_v32  ;;  %v2817_v35 = vpop.eup %2816 }
 0x800   : > { %v2819_v36 = vpop.eup %2818 }
 0x801   : > { %2822 = vrcp.f32 %v2485_v34  ;;  %v2492_v40 = vadd.f32 1.0, %v2819_v36 }
 0x803   : > { %2824 = vrcp.f32 %v2492_v40 }
 0x80c   : > { %v2821_v37 = vpop.eup %2820 }
 0x80d   : > { %v2496_v38 = vmul.f32 %v2821_v37, %v2817_v35 }
 0x80e   : > { %v2823_v39 = vpop.eup %2822 }
 0x80f   : > { %v2495_v41 = vmul.f32 %v2823_v39, %v2257_v9 }
 0x810   : > { %v2825_v44 = vpop.eup %2824 }
 0x811   : > { %v2497_v43 = vadd.f32 %v2496_v38, %v2495_v41 }
 0x813   : > { %2826 = vtanh.f32 %v2497_v43  ;;  %2503 = vst [vmem:[#allocation4] sm:$0xff] %v2497_v43 }
 0x820   : > { %v2827_v45 = vpop.eup %2826 }
 0x821   : > { %v2499_v46 = vmul.f32 %v2827_v45, %v2825_v44 }
 0x823   : > { %2656 = vst [vmem:[%s2963_s10 + $0x38] sm:$0xff] %v2499_v46  ;;  %2502 = vst [vmem:[#allocation3] sm:$0xff] %v2499_v46 }
 0x824 PF: > { %s15_s17 = sadd.s32 1, %s2880_s17   ;;  %s4142_s15 = smov %s2876_s16 }
 0x825   : > { %p12_p3 = scmp.ge.s32.totalorder %s15_s17, 4   ;;  %s4143_s16 = smov %s4145_s19 }
 0x827   :  { %14 = sbr.rel (!%p12_p3) target bundleno = 2 (0x2), region = 82 }
 0x82c   :  { %2532 = vsyncpa [#allocation6], 1 }
 0x82d   :  { %2534 = vsyncpa [#allocation6 + $0x1], 1 }

// kernel: better_lstm_forward.3
= control target key start
LH: loop header
LB: loop body
LE: loop exit
PB: predicated region body
PF: predicated region fallthrough
CT: control target
= control target key end

     0   :  { %s2833_s15 = smov 0   ;;  %s2835_s16 = smov 0   ;;  %s4533_s0 = inlined_call_operand.vmem [shape: f32[16,8,128], index: 0, kind: input, shape index: {}]   ;;  %s4534_s1 = inlined_call_operand.vmem [shape: f32[128,512], index: 1, kind: input, shape index: {}]   ;;  %s4535_s2 = inlined_call_operand.vmem [shape: f32[128,512], index: 2, kind: input, shape index: {}]   ;;  %s4536_s3 = inlined_call_operand.vmem [shape: f32[1,512], index: 3, kind: input, shape index: {}]   ;;  %s4537_s4 = inlined_call_operand.vmem [shape: f32[8,2048], index: 4, kind: output, shape index: {}]  }
   0x1   :  { %s2837_s17 = smov 0  }
   0x2 LB: > { %s23_s18 = sadd.s32 1, %s2800_s16  ;;  %p2596_p0 = scmp.ge.s32.totalorder %s2804_s17, 1  ;;  %s2804_s17 = sphi %s2837_s17, %s14_s17   ;;  %s2800_s16 = sphi %s2835_s16, %s4782_s16   ;;  %s2796_s15 = sphi %s2833_s15, %s4781_s15  }
   0x3   : > { %p24_p1 = scmp.ge.s32.totalorder %s23_s18, 2  ;;  %p182_p2 = scmp.lt.s32.totalorder %s2804_s17, 3 }
   0x5   : > { %s4784_s18 = smov (%p24_p1, %s23_s18), 0  ;;  %p183_p3 = pnand %p2596_p0, %p182_p2 }
   0x7   : > { %186 = sbr.rel (%p183_p3) target bundleno = 2096 (0x830), region = 36 }
   0xc   : > { %s2597_s19 = sshll.u32 %s2796_s15, 3  ;;  %p2601_p5 = scmp.ne.s32.totalorder %s2796_s15, 0 }
   0xd   : > { %p216_p4 = scmp.lt.s32.totalorder %s2597_s19, 15 }
   0xe   : > { %237 = sbr.rel (%p2601_p5) target bundleno = 21 (0x15), region = 40 }
   0xf   : > { %s4786_s19 = smov (!%p216_p4, %s2597_s19), 15 }
  0x10   : > { %s2598_s20 = sshll.u32 %s4786_s19, 3 }
  0x11   : > { %s2854_s23 = scalar_lea.vmem %s4533_s0, %s2598_s20  ;;  %s2859_s26 = scalar_lea.vmem %s4537_s4, %s2598_s20 }
  0x13   : > { %v2806_v0 = vmov 0.0  }
  0x14   : > { %238 = vst [vmem:[#allocation3] sm:$0xff] %v2806_v0  ;;  %239 = vst [vmem:[#allocation4] sm:$0xff] %v2806_v0 }
  0x15 PF: > { %v309_v1 = vld [vmem:[%s4534_s1 + $0x1e8] sm:$0xff]  ;;  %v311_v2 = vld [vmem:[%s4534_s1 + $0x1f8] sm:$0xff]  ;;  %v308_v3 = vld [vmem:[%s4534_s1 + $0x1e0] sm:$0xff] }
  0x16   : > { %334 = vmatprep.subr.mxu0 %v309_v1  ;;  %447 = vmatprep.subr.mxu1 %v311_v2  ;;  %v310_v4 = vld [vmem:[%s4534_s1 + $0x1f0] sm:$0xff]  ;;  %v305_v5 = vld [vmem:[%s4534_s1 + $0x1c8] sm:$0xff]  ;;  %v307_v6 = vld [vmem:[%s4534_s1 + $0x1d8] sm:$0xff]  ;;  %v4538_v2 = vmov 0.0  }
  0x17   : > { %335 = vmatpush1.msra.mxu0 %v308_v3  ;;  %448 = vmatpush1.msra.mxu1 %v310_v4  ;;  %v304_v7 = vld [vmem:[%s4534_s1 + $0x1c0] sm:$0xff]  ;;  %v306_v8 = vld [vmem:[%s4534_s1 + $0x1d0] sm:$0xff]  ;;  %v301_v9 = vld [vmem:[%s4534_s1 + $0x1a8] sm:$0xff] }
  0x18   : > { %336 = vmatprep.subr.mxu0 %v305_v5  ;;  %449 = vmatprep.subr.mxu1 %v307_v6  ;;  %v303_v10 = vld [vmem:[%s4534_s1 + $0x1b8] sm:$0xff]  ;;  %v300_v11 = vld [vmem:[%s4534_s1 + $0x1a0] sm:$0xff]  ;;  %v302_v12 = vld [vmem:[%s4534_s1 + $0x1b0] sm:$0xff] }
  0x19   : > { %337 = vmatpush1.msra.mxu0 %v304_v7  ;;  %450 = vmatpush1.msra.mxu1 %v306_v8  ;;  %v297_v13 = vld [vmem:[%s4534_s1 + $0x188] sm:$0xff]  ;;  %v299_v14 = vld [vmem:[%s4534_s1 + $0x198] sm:$0xff]  ;;  %v296_v15 = vld [vmem:[%s4534_s1 + $0x180] sm:$0xff] }
  0x1a   : > { %338 = vmatprep.subr.mxu0 %v301_v9  ;;  %451 = vmatprep.subr.mxu1 %v303_v10  ;;  %v298_v16 = vld [vmem:[%s4534_s1 + $0x190] sm:$0xff]  ;;  %v293_v17 = vld [vmem:[%s4534_s1 + $0x168] sm:$0xff]  ;;  %v295_v18 = vld [vmem:[%s4534_s1 + $0x178] sm:$0xff] }
  0x1b   : > { %339 = vmatpush1.msra.mxu0 %v300_v11  ;;  %452 = vmatpush1.msra.mxu1 %v302_v12  ;;  %v292_v19 = vld [vmem:[%s4534_s1 + $0x160] sm:$0xff]  ;;  %v294_v20 = vld [vmem:[%s4534_s1 + $0x170] sm:$0xff]  ;;  %v289_v21 = vld [vmem:[%s4534_s1 + $0x148] sm:$0xff] }
  0x1c   : > { %340 = vmatprep.subr.mxu0 %v297_v13  ;;  %453 = vmatprep.subr.mxu1 %v299_v14  ;;  %v291_v22 = vld [vmem:[%s4534_s1 + $0x158] sm:$0xff]  ;;  %v288_v23 = vld [vmem:[%s4534_s1 + $0x140] sm:$0xff]  ;;  %v290_v24 = vld [vmem:[%s4534_s1 + $0x150] sm:$0xff] }
  0x1d   : > { %341 = vmatpush1.msra.mxu0 %v296_v15  ;;  %454 = vmatpush1.msra.mxu1 %v298_v16  ;;  %v285_v25 = vld [vmem:[%s4534_s1 + $0x128] sm:$0xff]  ;;  %v287_v26 = vld [vmem:[%s4534_s1 + $0x138] sm:$0xff]  ;;  %v284_v27 = vld [vmem:[%s4534_s1 + $0x120] sm:$0xff] }
  0x1e   : > { %342 = vmatprep.subr.mxu0 %v293_v17  ;;  %455 = vmatprep.subr.mxu1 %v295_v18  ;;  %v286_v28 = vld [vmem:[%s4534_s1 + $0x130] sm:$0xff]  ;;  %v281_v29 = vld [vmem:[%s4534_s1 + $0x108] sm:$0xff]  ;;  %v283_v30 = vld [vmem:[%s4534_s1 + $0x118] sm:$0xff] }
  0x1f   : > { %343 = vmatpush1.msra.mxu0 %v292_v19  ;;  %456 = vmatpush1.msra.mxu1 %v294_v20  ;;  %v280_v31 = vld [vmem:[%s4534_s1 + $0x100] sm:$0xff]  ;;  %v282_v32 = vld [vmem:[%s4534_s1 + $0x110] sm:$0xff]  ;;  %v277_v33 = vld [vmem:[%s4534_s1 + $0xe8] sm:$0xff] }
  0x20   : > { %344 = vmatprep.subr.mxu0 %v289_v21  ;;  %457 = vmatprep.subr.mxu1 %v291_v22  ;;  %v279_v34 = vld [vmem:[%s4534_s1 + $0xf8] sm:$0xff]  ;;  %v276_v35 = vld [vmem:[%s4534_s1 + $0xe0] sm:$0xff]  ;;  %v278_v36 = vld [vmem:[%s4534_s1 + $0xf0] sm:$0xff] }
  0x21   : > { %345 = vmatpush1.msra.mxu0 %v288_v23  ;;  %458 = vmatpush1.msra.mxu1 %v290_v24  ;;  %v273_v37 = vld [vmem:[%s4534_s1 + $0xc8] sm:$0xff]  ;;  %v275_v38 = vld [vmem:[%s4534_s1 + $0xd8] sm:$0xff]  ;;  %v272_v39 = vld [vmem:[%s4534_s1 + $0xc0] sm:$0xff] }
  0x22   : > { %346 = vmatprep.subr.mxu0 %v285_v25  ;;  %459 = vmatprep.subr.mxu1 %v287_v26  ;;  %v274_v40 = vld [vmem:[%s4534_s1 + $0xd0] sm:$0xff]  ;;  %v269_v41 = vld [vmem:[%s4534_s1 + $0xa8] sm:$0xff]  ;;  %v271_v42 = vld [vmem:[%s4534_s1 + $0xb8] sm:$0xff] }
  0x23   : > { %347 = vmatpush1.msra.mxu0 %v284_v27  ;;  %460 = vmatpush1.msra.mxu1 %v286_v28  ;;  %v268_v43 = vld [vmem:[%s4534_s1 + $0xa0] sm:$0xff]  ;;  %v270_v44 = vld [vmem:[%s4534_s1 + $0xb0] sm:$0xff]  ;;  %v265_v45 = vld [vmem:[%s4534_s1 + $0x88] sm:$0xff] }
  0x24   : > { %348 = vmatprep.subr.mxu0 %v281_v29  ;;  %461 = vmatprep.subr.mxu1 %v283_v30  ;;  %v267_v46 = vld [vmem:[%s4534_s1 + $0x98] sm:$0xff]  ;;  %v264_v47 = vld [vmem:[%s4534_s1 + $0x80] sm:$0xff]  ;;  %v266_v48 = vld [vmem:[%s4534_s1 + $0x90] sm:$0xff] }
  0x25   : > { %349 = vmatpush1.msra.mxu0 %v280_v31  ;;  %462 = vmatpush1.msra.mxu1 %v282_v32  ;;  %v261_v49 = vld [vmem:[%s4534_s1 + $0x68] sm:$0xff]  ;;  %v263_v50 = vld [vmem:[%s4534_s1 + $0x78] sm:$0xff]  ;;  %v260_v51 = vld [vmem:[%s4534_s1 + $0x60] sm:$0xff] }
  0x26   : > { %350 = vmatprep.subr.mxu0 %v277_v33  ;;  %463 = vmatprep.subr.mxu1 %v279_v34  ;;  %v262_v52 = vld [vmem:[%s4534_s1 + $0x70] sm:$0xff]  ;;  %v257_v53 = vld [vmem:[%s4534_s1 + $0x48] sm:$0xff]  ;;  %v259_v54 = vld [vmem:[%s4534_s1 + $0x58] sm:$0xff] }
  0x27   : > { %351 = vmatpush1.msra.mxu0 %v276_v35  ;;  %464 = vmatpush1.msra.mxu1 %v278_v36  ;;  %v256_v55 = vld [vmem:[%s4534_s1 + $0x40] sm:$0xff]  ;;  %v258_v56 = vld [vmem:[%s4534_s1 + $0x50] sm:$0xff]  ;;  %v253_v57 = vld [vmem:[%s4534_s1 + $0x28] sm:$0xff] }
  0x28   : > { %352 = vmatprep.subr.mxu0 %v273_v37  ;;  %465 = vmatprep.subr.mxu1 %v275_v38  ;;  %v255_v58 = vld [vmem:[%s4534_s1 + $0x38] sm:$0xff]  ;;  %v252_v59 = vld [vmem:[%s4534_s1 + $0x20] sm:$0xff]  ;;  %v254_v60 = vld [vmem:[%s4534_s1 + $0x30] sm:$0xff] }
  0x29   : > { %353 = vmatpush1.msra.mxu0 %v272_v39  ;;  %466 = vmatpush1.msra.mxu1 %v274_v40  ;;  %v249_v61 = vld [vmem:[%s4534_s1 + $0x8] sm:$0xff]  ;;  %v251_v62 = vld [vmem:[%s4534_s1 + $0x18] sm:$0xff]  ;;  %v248_v63 = vld [vmem:[%s4534_s1] sm:$0xff] }
  0x2a   : > { %354 = vmatprep.subr.mxu0 %v269_v41  ;;  %467 = vmatprep.subr.mxu1 %v271_v42  ;;  %v250_v0 = vld [vmem:[%s4534_s1 + $0x10] sm:$0xff]  ;;  %v240_v1 = vld [vmem:[%s2854_s23] sm:$0xff]  ;;  %v3058_v3 = vld [vmem:[%s4535_s2 + $0x1e8] sm:$0xff] }
  0x2b   : > { %355 = vmatpush1.msra.mxu0 %v268_v43  ;;  %468 = vmatpush1.msra.mxu1 %v270_v44  ;;  %v3063_v4 = vld [vmem:[%s4535_s2 + $0x1f8] sm:$0xff]  ;;  %v3069_v5 = vld [vmem:[%s4535_s2 + $0x1e0] sm:$0xff]  ;;  %v3074_v6 = vld [vmem:[%s4535_s2 + $0x1f0] sm:$0xff] }
  0x2c   : > { %356 = vmatprep.subr.mxu0 %v265_v45  ;;  %469 = vmatprep.subr.mxu1 %v267_v46  ;;  %v3079_v7 = vld [vmem:[%s4535_s2 + $0x1c8] sm:$0xff]  ;;  %v3084_v8 = vld [vmem:[%s4535_s2 + $0x1d8] sm:$0xff]  ;;  %v3093_v9 = vld [vmem:[%s4535_s2 + $0x1c0] sm:$0xff] }
  0x2d   : > { %357 = vmatpush1.msra.mxu0 %v264_v47  ;;  %470 = vmatpush1.msra.mxu1 %v266_v48  ;;  %v3098_v10 = vld [vmem:[%s4535_s2 + $0x1d0] sm:$0xff]  ;;  %v241_v11 = vld [vmem:[%s2854_s23 + $0x8] sm:$0xff]  ;;  %v3113_v13 = vld [vmem:[%s4535_s2 + $0x1b8] sm:$0xff] }
  0x2e   : > { %358 = vmatprep.subr.mxu0 %v261_v49  ;;  %471 = vmatprep.subr.mxu1 %v263_v50  ;;  %v3108_v12 = vld [vmem:[%s4535_s2 + $0x1a8] sm:$0xff]  ;;  %v3120_v14 = vld [vmem:[%s4535_s2 + $0x1a0] sm:$0xff]  ;;  %v3125_v15 = vld [vmem:[%s4535_s2 + $0x1b0] sm:$0xff] }
  0x2f   : > { %359 = vmatpush1.msra.mxu0 %v260_v51  ;;  %472 = vmatpush1.msra.mxu1 %v262_v52  ;;  %v3130_v16 = vld [vmem:[%s4535_s2 + $0x188] sm:$0xff]  ;;  %v3135_v17 = vld [vmem:[%s4535_s2 + $0x198] sm:$0xff]  ;;  %v3144_v18 = vld [vmem:[%s4535_s2 + $0x180] sm:$0xff] }
  0x30   : > { %360 = vmatprep.subr.mxu0 %v257_v53  ;;  %473 = vmatprep.subr.mxu1 %v259_v54  ;;  %v3149_v19 = vld [vmem:[%s4535_s2 + $0x190] sm:$0xff]  ;;  %v3159_v21 = vld [vmem:[%s4535_s2 + $0x168] sm:$0xff]  ;;  %v3164_v22 = vld [vmem:[%s4535_s2 + $0x178] sm:$0xff] }
  0x31   : > { %361 = vmatpush1.msra.mxu0 %v256_v55  ;;  %474 = vmatpush1.msra.mxu1 %v258_v56  ;;  %v242_v20 = vld [vmem:[%s2854_s23 + $0x10] sm:$0xff]  ;;  %v3171_v23 = vld [vmem:[%s4535_s2 + $0x160] sm:$0xff]  ;;  %v3181_v25 = vld [vmem:[%s4535_s2 + $0x148] sm:$0xff] }
  0x32   : > { %362 = vmatprep.subr.mxu0 %v253_v57  ;;  %475 = vmatprep.subr.mxu1 %v255_v58  ;;  %v3176_v24 = vld [vmem:[%s4535_s2 + $0x170] sm:$0xff]  ;;  %v3186_v26 = vld [vmem:[%s4535_s2 + $0x158] sm:$0xff]  ;;  %v3195_v27 = vld [vmem:[%s4535_s2 + $0x140] sm:$0xff] }
  0x33   : > { %363 = vmatpush1.msra.mxu0 %v252_v59  ;;  %476 = vmatpush1.msra.mxu1 %v254_v60  ;;  %v3200_v28 = vld [vmem:[%s4535_s2 + $0x150] sm:$0xff]  ;;  %v243_v29 = vld [vmem:[%s2854_s23 + $0x18] sm:$0xff]  ;;  %v3210_v30 = vld [vmem:[%s4535_s2 + $0x128] sm:$0xff] }
  0x34   : > { %364 = vmatprep.subr.mxu0 %v249_v61  ;;  %477 = vmatprep.subr.mxu1 %v251_v62  ;;  %v3215_v31 = vld [vmem:[%s4535_s2 + $0x138] sm:$0xff]  ;;  %v3222_v32 = vld [vmem:[%s4535_s2 + $0x120] sm:$0xff]  ;;  %v3227_v33 = vld [vmem:[%s4535_s2 + $0x130] sm:$0xff] }
  0x35   : > { %365 = vmatpush1.msra.mxu0 %v248_v63  ;;  %398 = vmatprep.mubr.f32.mxu0 %v4538_v2  ;;  %v3232_v34 = vld [vmem:[%s4535_s2 + $0x108] sm:$0xff]  ;;  %v3237_v35 = vld [vmem:[%s4535_s2 + $0x118] sm:$0xff]  ;;  %v3246_v36 = vld [vmem:[%s4535_s2 + $0x100] sm:$0xff] }
  0x36   : > { %478 = vmatpush1.msra.mxu1 %v250_v0  ;;  %511 = vmatprep.mubr.f32.mxu1 %v4538_v2  ;;  %v3251_v37 = vld [vmem:[%s4535_s2 + $0x110] sm:$0xff]  ;;  %v244_v38 = vld [vmem:[%s2854_s23 + $0x20] sm:$0xff]  ;;  %v3261_v39 = vld [vmem:[%s4535_s2 + $0xe8] sm:$0xff] }
  0x37   : > { %399 = vmatmul.mubr.f32.vlgmr.msra.gmra.mxu0 %v240_v1  ;;  %512 = vmatmul.mubr.f32.vlgmr.msra.gmra.mxu1 %v240_v1  ;;  %v3266_v40 = vld [vmem:[%s4535_s2 + $0xf8] sm:$0xff]  ;;  %v3273_v41 = vld [vmem:[%s4535_s2 + $0xe0] sm:$0xff]  ;;  %v3278_v42 = vld [vmem:[%s4535_s2 + $0xf0] sm:$0xff] }
  0x38   : > { %662 = vmatprep.subr.mxu0 %v3058_v3  ;;  %733 = vmatprep.subr.mxu1 %v3063_v4  ;;  %v3283_v43 = vld [vmem:[%s4535_s2 + $0xc8] sm:$0xff]  ;;  %v3288_v44 = vld [vmem:[%s4535_s2 + $0xd8] sm:$0xff]  ;;  %v3297_v45 = vld [vmem:[%s4535_s2 + $0xc0] sm:$0xff] }
  0x39   : > { %663 = vmatpush1.msra.mxu0 %v3069_v5  ;;  %734 = vmatpush1.msra.mxu1 %v3074_v6  ;;  %v3302_v46 = vld [vmem:[%s4535_s2 + $0xd0] sm:$0xff]  ;;  %v245_v47 = vld [vmem:[%s2854_s23 + $0x28] sm:$0xff]  ;;  %v3317_v49 = vld [vmem:[%s4535_s2 + $0xb8] sm:$0xff] }
  0x3a   : > { %664 = vmatprep.subr.mxu0 %v3079_v7  ;;  %735 = vmatprep.subr.mxu1 %v3084_v8  ;;  %v3312_v48 = vld [vmem:[%s4535_s2 + $0xa8] sm:$0xff]  ;;  %v3324_v50 = vld [vmem:[%s4535_s2 + $0xa0] sm:$0xff]  ;;  %v3329_v51 = vld [vmem:[%s4535_s2 + $0xb0] sm:$0xff] }
  0x3b   : > { %404 = vmatprep.mubr.f32.mxu0 %v4538_v2  ;;  %517 = vmatprep.mubr.f32.mxu1 %v4538_v2  ;;  %v3334_v52 = vld [vmem:[%s4535_s2 + $0x88] sm:$0xff]  ;;  %v3339_v53 = vld [vmem:[%s4535_s2 + $0x98] sm:$0xff]  ;;  %v3348_v54 = vld [vmem:[%s4535_s2 + $0x80] sm:$0xff] }
  0x3c   : > { %665 = vmatpush1.msra.mxu0 %v3093_v9  ;;  %736 = vmatpush1.msra.mxu1 %v3098_v10  ;;  %4604 = vst [vmem:[#allocation5_spill] sm:$0xff] %v3334_v52  ;;  %4605 = vst [vmem:[#allocation6_spill] sm:$0xff] %v3339_v53  ;;  %v3353_v55 = vld [vmem:[%s4535_s2 + $0x90] sm:$0xff]  ;;  %v3363_v57 = vld [vmem:[%s4535_s2 + $0x68] sm:$0xff] }
  0x3d   : > { %405 = vmatmul.mubr.f32.gmra.mxu0 %v241_v11  ;;  %518 = vmatmul.mubr.f32.gmra.mxu1 %v241_v11  ;;  %4606 = vst [vmem:[#allocation7_spill] sm:$0xff] %v3348_v54  ;;  %4607 = vst [vmem:[#allocation8_spill] sm:$0xff] %v3353_v55  ;;  %v246_v56 = vld [vmem:[%s2854_s23 + $0x30] sm:$0xff]  ;;  %v3368_v58 = vld [vmem:[%s4535_s2 + $0x78] sm:$0xff] }
  0x3e   : > { %666 = vmatprep.subr.mxu0 %v3108_v12  ;;  %737 = vmatprep.subr.mxu1 %v3113_v13  ;;  %4608 = vst [vmem:[#allocation9_spill] sm:$0xff] %v3363_v57  ;;  %4609 = vst [vmem:[#allocation10_spill] sm:$0xff] %v3368_v58  ;;  %v3375_v59 = vld [vmem:[%s4535_s2 + $0x60] sm:$0xff]  ;;  %v3380_v60 = vld [vmem:[%s4535_s2 + $0x70] sm:$0xff] }
  0x3f   : > { %667 = vmatpush1.msra.mxu0 %v3120_v14  ;;  %738 = vmatpush1.msra.mxu1 %v3125_v15  ;;  %4610 = vst [vmem:[#allocation11_spill] sm:$0xff] %v3375_v59  ;;  %4611 = vst [vmem:[#allocation12_spill] sm:$0xff] %v3380_v60  ;;  %v3385_v61 = vld [vmem:[%s4535_s2 + $0x48] sm:$0xff]  ;;  %v3390_v62 = vld [vmem:[%s4535_s2 + $0x58] sm:$0xff] }
  0x40   : > { %668 = vmatprep.subr.mxu0 %v3130_v16  ;;  %739 = vmatprep.subr.mxu1 %v3135_v17  ;;  %4612 = vst [vmem:[#allocation13_spill] sm:$0xff] %v3385_v61  ;;  %4613 = vst [vmem:[#allocation14_spill] sm:$0xff] %v3390_v62  ;;  %v3399_v63 = vld [vmem:[%s4535_s2 + $0x40] sm:$0xff]  ;;  %v3404_v0 = vld [vmem:[%s4535_s2 + $0x50] sm:$0xff] }
  0x41   : > { %410 = vmatprep.mubr.f32.mxu0 %v4538_v2  ;;  %523 = vmatprep.mubr.f32.mxu1 %v4538_v2  ;;  %4614 = vst [vmem:[#allocation15_spill] sm:$0xff] %v3399_v63  ;;  %4615 = vst [vmem:[#allocation16_spill] sm:$0xff] %v3404_v0  ;;  %v247_v1 = vld [vmem:[%s2854_s23 + $0x38] sm:$0xff]  ;;  %v3414_v11 = vld [vmem:[%s4535_s2 + $0x28] sm:$0xff] }
  0x42   : > { %669 = vmatpush1.msra.mxu0 %v3144_v18  ;;  %740 = vmatpush1.msra.mxu1 %v3149_v19  ;;  %4616 = vst [vmem:[#allocation17_spill] sm:$0xff] %v3414_v11 }
  0x43   : > { %411 = vmatmul.mubr.f32.gmra.mxu0 %v242_v20  ;;  %524 = vmatmul.mubr.f32.gmra.mxu1 %v242_v20  ;;  %v3419_v20 = vld [vmem:[%s4535_s2 + $0x38] sm:$0xff] }
  0x44   : > { %670 = vmatprep.subr.mxu0 %v3159_v21  ;;  %741 = vmatprep.subr.mxu1 %v3164_v22  ;;  %4617 = vst [vmem:[#allocation18_spill] sm:$0xff] %v3419_v20 }
  0x45   : > { %671 = vmatpush1.msra.mxu0 %v3171_v23  ;;  %742 = vmatpush1.msra.mxu1 %v3176_v24 }
  0x46   : > { %672 = vmatprep.subr.mxu0 %v3181_v25  ;;  %743 = vmatprep.subr.mxu1 %v3186_v26 }
  0x47   : > { %416 = vmatprep.mubr.f32.mxu0 %v4538_v2  ;;  %529 = vmatprep.mubr.f32.mxu1 %v4538_v2 }
  0x48   : > { %673 = vmatpush1.msra.mxu0 %v3195_v27  ;;  %744 = vmatpush1.msra.mxu1 %v3200_v28 }
  0x49   : > { %417 = vmatmul.mubr.f32.gmra.mxu0 %v243_v29  ;;  %530 = vmatmul.mubr.f32.gmra.mxu1 %v243_v29  ;;  %v3426_v29 = vld [vmem:[%s4535_s2 + $0x20] sm:$0xff] }
  0x4a   : > { %674 = vmatprep.subr.mxu0 %v3210_v30  ;;  %745 = vmatprep.subr.mxu1 %v3215_v31  ;;  %4618 = vst [vmem:[#allocation19_spill] sm:$0xff] %v3426_v29 }
  0x4b   : > { %675 = vmatpush1.msra.mxu0 %v3222_v32  ;;  %746 = vmatpush1.msra.mxu1 %v3227_v33 }
  0x4c   : > { %676 = vmatprep.subr.mxu0 %v3232_v34  ;;  %747 = vmatprep.subr.mxu1 %v3237_v35 }
  0x4d   : > { %422 = vmatprep.mubr.f32.mxu0 %v4538_v2  ;;  %535 = vmatprep.mubr.f32.mxu1 %v4538_v2 }
  0x4e   : > { %677 = vmatpush1.msra.mxu0 %v3246_v36  ;;  %748 = vmatpush1.msra.mxu1 %v3251_v37 }
  0x4f   : > { %423 = vmatmul.mubr.f32.gmra.mxu0 %v244_v38  ;;  %536 = vmatmul.mubr.f32.gmra.mxu1 %v244_v38  ;;  %v3431_v38 = vld [vmem:[%s4535_s2 + $0x30] sm:$0xff] }
  0x50   : > { %678 = vmatprep.subr.mxu0 %v3261_v39  ;;  %749 = vmatprep.subr.mxu1 %v3266_v40  ;;  %4619 = vst [vmem:[#allocation20_spill] sm:$0xff] %v3431_v38 }
  0x51   : > { %679 = vmatpush1.msra.mxu0 %v3273_v41  ;;  %750 = vmatpush1.msra.mxu1 %v3278_v42 }
  0x52   : > { %680 = vmatprep.subr.mxu0 %v3283_v43  ;;  %751 = vmatprep.subr.mxu1 %v3288_v44 }
  0x53   : > { %428 = vmatprep.mubr.f32.mxu0 %v4538_v2  ;;  %541 = vmatprep.mubr.f32.mxu1 %v4538_v2 }
  0x54   : > { %681 = vmatpush1.msra.mxu0 %v3297_v45  ;;  %752 = vmatpush1.msra.mxu1 %v3302_v46 }
  0x55   : > { %429 = vmatmul.mubr.f32.gmra.mxu0 %v245_v47  ;;  %542 = vmatmul.mubr.f32.gmra.mxu1 %v245_v47  ;;  %v3436_v47 = vld [vmem:[%s4535_s2 + $0x8] sm:$0xff] }
  0x56   : > { %682 = vmatprep.subr.mxu0 %v3312_v48  ;;  %753 = vmatprep.subr.mxu1 %v3317_v49  ;;  %4620 = vst [vmem:[#allocation21_spill] sm:$0xff] %v3436_v47 }
  0x57   : > { %683 = vmatpush1.msra.mxu0 %v3324_v50  ;;  %754 = vmatpush1.msra.mxu1 %v3329_v51 }
  0x58   : > { %684 = vmatprep.subr.mxu0 %v3334_v52  ;;  %755 = vmatprep.subr.mxu1 %v3339_v53 }
  0x59   : > { %434 = vmatprep.mubr.f32.mxu0 %v4538_v2  ;;  %547 = vmatprep.mubr.f32.mxu1 %v4538_v2 }
  0x5a   : > { %685 = vmatpush1.msra.mxu0 %v3348_v54  ;;  %756 = vmatpush1.msra.mxu1 %v3353_v55 }
  0x5b   : > { %435 = vmatmul.mubr.f32.gmra.mxu0 %v246_v56  ;;  %548 = vmatmul.mubr.f32.gmra.mxu1 %v246_v56  ;;  %v3441_v56 = vld [vmem:[%s4535_s2 + $0x18] sm:$0xff] }
  0x5c   : > { %686 = vmatprep.subr.mxu0 %v3363_v57  ;;  %757 = vmatprep.subr.mxu1 %v3368_v58  ;;  %4621 = vst [vmem:[#allocation22_spill] sm:$0xff] %v3441_v56 }
  0x5d   : > { %687 = vmatpush1.msra.mxu0 %v3375_v59  ;;  %758 = vmatpush1.msra.mxu1 %v3380_v60 }
  0x5e   : > { %688 = vmatprep.subr.mxu0 %v3385_v61  ;;  %759 = vmatprep.subr.mxu1 %v3390_v62 }
  0x5f   : > { %440 = vmatprep.mubr.f32.mxu0 %v4538_v2  ;;  %553 = vmatprep.mubr.f32.mxu1 %v4538_v2  ;;  %v3448_v2 = vld [vmem:[%s4535_s2] sm:$0xff] }
  0x60   : > { %689 = vmatpush1.msra.mxu0 %v3399_v63  ;;  %760 = vmatpush1.msra.mxu1 %v3404_v0  ;;  %4622 = vst [vmem:[#allocation23_spill] sm:$0xff] %v3448_v2 }
  0x61   : > { %441 = vmatmul.mubr.f32.gmra.mxu0 %v247_v1  ;;  %554 = vmatmul.mubr.f32.gmra.mxu1 %v247_v1  ;;  %v3455_v1 = vld [vmem:[%s4535_s2 + $0x10] sm:$0xff] }
  0x62   : > { %690 = vmatprep.subr.mxu0 %v3414_v11  ;;  %761 = vmatprep.subr.mxu1 %v3419_v20  ;;  %4623 = vst [vmem:[#allocation24_spill] sm:$0xff] %v3455_v1  ;;  %v592_v11 = vld [vmem:[#allocation3] sm:$0xff]  ;;  %v4624_v20 = vmov 0.0  }
  0x63   : > { %691 = vmatpush1.msra.mxu0 %v3426_v29  ;;  %762 = vmatpush1.msra.mxu1 %v3431_v38 }
  0x64   : > { %692 = vmatprep.subr.mxu0 %v3436_v47  ;;  %763 = vmatprep.subr.mxu1 %v3441_v56 }
  0x65   : > { %693 = vmatpush1.msra.mxu0 %v3448_v2  ;;  %726 = vmatprep.mubr.f32.mxu0 %v4624_v20 }
  0x66   : > { %764 = vmatpush1.msra.mxu1 %v3455_v1  ;;  %797 = vmatprep.mubr.f32.mxu1 %v4624_v20 }
  0x67   : > { %727 = vmatmul.mubr.f32.vlgmr.msra.gmra.mxu0 %v592_v11  ;;  %798 = vmatmul.mubr.f32.vlgmr.msra.gmra.mxu1 %v592_v11  ;;  %v4625_v11 = vld [vmem:[#allocation17_spill] sm:$0xff] }
  0x68   : > { %901 = vmatprep.subr.mxu0 %v3058_v3  ;;  %972 = vmatprep.subr.mxu1 %v3063_v4 }
  0x69   : > { %902 = vmatpush1.msra.mxu0 %v3069_v5  ;;  %973 = vmatpush1.msra.mxu1 %v3074_v6 }
  0x6a   : > { %903 = vmatprep.subr.mxu0 %v3079_v7  ;;  %974 = vmatprep.subr.mxu1 %v3084_v8 }
  0x6b   : > { %904 = vmatpush1.msra.mxu0 %v3093_v9  ;;  %975 = vmatpush1.msra.mxu1 %v3098_v10 }
  0x6c   : > { %905 = vmatprep.subr.mxu0 %v3108_v12  ;;  %976 = vmatprep.subr.mxu1 %v3113_v13 }
  0x6d   : > { %906 = vmatpush1.msra.mxu0 %v3120_v14  ;;  %977 = vmatpush1.msra.mxu1 %v3125_v15 }
  0x6e   : > { %907 = vmatprep.subr.mxu0 %v3130_v16  ;;  %978 = vmatprep.subr.mxu1 %v3135_v17 }
  0x6f   : > { %908 = vmatpush1.msra.mxu0 %v3144_v18  ;;  %979 = vmatpush1.msra.mxu1 %v3149_v19 }
  0x70   : > { %909 = vmatprep.subr.mxu0 %v3159_v21  ;;  %980 = vmatprep.subr.mxu1 %v3164_v22 }
  0x71   : > { %910 = vmatpush1.msra.mxu0 %v3171_v23  ;;  %981 = vmatpush1.msra.mxu1 %v3176_v24 }
  0x72   : > { %911 = vmatprep.subr.mxu0 %v3181_v25  ;;  %982 = vmatprep.subr.mxu1 %v3186_v26 }
  0x73   : > { %912 = vmatpush1.msra.mxu0 %v3195_v27  ;;  %983 = vmatpush1.msra.mxu1 %v3200_v28 }
  0x74   : > { %913 = vmatprep.subr.mxu0 %v3210_v30  ;;  %984 = vmatprep.subr.mxu1 %v3215_v31 }
  0x75   : > { %914 = vmatpush1.msra.mxu0 %v3222_v32  ;;  %985 = vmatpush1.msra.mxu1 %v3227_v33 }
  0x76   : > { %915 = vmatprep.subr.mxu0 %v3232_v34  ;;  %986 = vmatprep.subr.mxu1 %v3237_v35 }
  0x77   : > { %916 = vmatpush1.msra.mxu0 %v3246_v36  ;;  %987 = vmatpush1.msra.mxu1 %v3251_v37 }
  0x78   : > { %917 = vmatprep.subr.mxu0 %v3261_v39  ;;  %988 = vmatprep.subr.mxu1 %v3266_v40 }
  0x79   : > { %918 = vmatpush1.msra.mxu0 %v3273_v41  ;;  %989 = vmatpush1.msra.mxu1 %v3278_v42 }
  0x7a   : > { %919 = vmatprep.subr.mxu0 %v3283_v43  ;;  %990 = vmatprep.subr.mxu1 %v3288_v44 }
  0x7b   : > { %920 = vmatpush1.msra.mxu0 %v3297_v45  ;;  %991 = vmatpush1.msra.mxu1 %v3302_v46 }
  0x7c   : > { %921 = vmatprep.subr.mxu0 %v3312_v48  ;;  %992 = vmatprep.subr.mxu1 %v3317_v49 }
  0x7d   : > { %922 = vmatpush1.msra.mxu0 %v3324_v50  ;;  %993 = vmatpush1.msra.mxu1 %v3329_v51 }
  0x7e   : > { %923 = vmatprep.subr.mxu0 %v3334_v52  ;;  %994 = vmatprep.subr.mxu1 %v3339_v53 }
  0x7f   : > { %924 = vmatpush1.msra.mxu0 %v3348_v54  ;;  %995 = vmatpush1.msra.mxu1 %v3353_v55  ;;  %v4626_v54 = vld [vmem:[#allocation18_spill] sm:$0xff] }
  0x80   : > { %925 = vmatprep.subr.mxu0 %v3363_v57  ;;  %996 = vmatprep.subr.mxu1 %v3368_v58 }
  0x81   : > { %926 = vmatpush1.msra.mxu0 %v3375_v59  ;;  %997 = vmatpush1.msra.mxu1 %v3380_v60 }
  0x82   : > { %927 = vmatprep.subr.mxu0 %v3385_v61  ;;  %998 = vmatprep.subr.mxu1 %v3390_v62 }
  0x83   : > { %928 = vmatpush1.msra.mxu0 %v3399_v63  ;;  %999 = vmatpush1.msra.mxu1 %v3404_v0 }
  0x84   : > { %929 = vmatprep.subr.mxu0 %v4625_v11  ;;  %1000 = vmatprep.subr.mxu1 %v4626_v54  ;;  %v314_v54 = vlaneseq }
  0x85   : > { %930 = vmatpush1.msra.mxu0 %v3426_v29  ;;  %1001 = vmatpush1.msra.mxu1 %v3431_v38 }
  0x86   : > { %931 = vmatprep.subr.mxu0 %v3436_v47  ;;  %1002 = vmatprep.subr.mxu1 %v3441_v56  ;;  %v315_v29 = vshrl.u32 %v314_v54, 7 }
  0x87   : > { %932 = vmatpush1.msra.mxu0 %v3448_v2  ;;  %965 = vmatprep.mubr.f32.mxu0 %v4624_v20  ;;  %v312_v2 = vld [vmem:[%s4536_s3] sm:$0xf] }
  0x88   : > { %1003 = vmatpush1.msra.mxu1 %v3455_v1  ;;  %1036 = vmatprep.mubr.f32.mxu1 %v4624_v20  ;;  %v316_v47 = vsub.s32 0, %v315_v29  ;;  %v324_v56 = vsub.s32 2, %v315_v29  ;;  %v320_v20 = vsub.s32 1, %v315_v29 }
  0x89   : > { %1140 = vmatprep.subr.mxu0 %v3058_v3  ;;  %1211 = vmatprep.subr.mxu1 %v3063_v4  ;;  %v328_v3 = vsub.s32 3, %v315_v29 }
  0x8a   : > { %v317_v63 = vrot.slane %v312_v2, %v316_v47  ;;  %v3542_v4 = vrot.slane %v312_v2, %v324_v56  ;;  %v321_v61 = vrot.slane %v312_v2, %v320_v20 }
  0x8b   : > { %v3544_v60 = vrot.slane %v312_v2, %v328_v3 }
  0xf7   : > { %v3531_v11 = vpop.f32.mrf.mxu0  ;;  %v3533_v38 = vpop.f32.mrf.mxu1 }
  0xf9   : > { %v3538_v0 = vpop.f32.mrf.mxu0  ;;  %v3540_v1 = vpop.f32.mrf.mxu1 }
  0xfd   : > { %v406_v54 = vpop.f32.mrf.mxu0  ;;  %v519_v62 = vpop.f32.mrf.mxu1 }
  0xfe   : > { %v3546_v59 = vadd.f32 %v406_v54, %v317_v63  ;;  %v3549_v58 = vadd.f32 %v519_v62, %v3542_v4 }
  0xff   : > { %v408_v57 = vpop.f32.mrf.mxu0  ;;  %v521_v55 = vpop.f32.mrf.mxu1 }
 0x100   : > { %4627 = vst [vmem:[#allocation25_spill] sm:$0xff] %v3546_v59  ;;  %4628 = vst [vmem:[#allocation26_spill] sm:$0xff] %v3549_v58  ;;  %v3551_v53 = vadd.f32 %v408_v57, %v321_v61  ;;  %v3554_v52 = vadd.f32 %v521_v55, %v3544_v60 }
 0x102   : > { %4629 = vst [vmem:[#allocation27_spill] sm:$0xff] %v3551_v53  ;;  %4630 = vst [vmem:[#allocation28_spill] sm:$0xff] %v3554_v52 }
 0x103   : > { %v412_v29 = vpop.f32.mrf.mxu0  ;;  %v525_v47 = vpop.f32.mrf.mxu1 }
 0x104   : > { %v3556_v56 = vadd.f32 %v412_v29, %v317_v63  ;;  %v3559_v20 = vadd.f32 %v525_v47, %v3542_v4 }
 0x105   : > { %v414_v2 = vpop.f32.mrf.mxu0  ;;  %v527_v3 = vpop.f32.mrf.mxu1 }
 0x106   : > { %4631 = vst [vmem:[#allocation29_spill] sm:$0xff] %v3556_v56  ;;  %4632 = vst [vmem:[#allocation30_spill] sm:$0xff] %v3559_v20  ;;  %v3561_v54 = vadd.f32 %v414_v2, %v321_v61  ;;  %v3564_v62 = vadd.f32 %v527_v3, %v3544_v60 }
 0x108   : > { %4633 = vst [vmem:[#allocation31_spill] sm:$0xff] %v3561_v54  ;;  %4634 = vst [vmem:[#allocation32_spill] sm:$0xff] %v3564_v62 }
 0x109   : > { %v418_v58 = vpop.f32.mrf.mxu0  ;;  %v531_v57 = vpop.f32.mrf.mxu1 }
 0x10a   : > { %v3566_v53 = vadd.f32 %v418_v58, %v317_v63  ;;  %v3569_v55 = vadd.f32 %v531_v57, %v3542_v4 }
 0x10b   : > { %v420_v52 = vpop.f32.mrf.mxu0  ;;  %v533_v29 = vpop.f32.mrf.mxu1 }
 0x10c   : > { %4635 = vst [vmem:[#allocation33_spill] sm:$0xff] %v3566_v53  ;;  %4636 = vst [vmem:[#allocation34_spill] sm:$0xff] %v3569_v55  ;;  %v3571_v56 = vadd.f32 %v420_v52, %v321_v61  ;;  %v3574_v47 = vadd.f32 %v533_v29, %v3544_v60 }
 0x10e   : > { %4637 = vst [vmem:[#allocation35_spill] sm:$0xff] %v3571_v56  ;;  %4638 = vst [vmem:[#allocation36_spill] sm:$0xff] %v3574_v47 }
 0x10f   : > { %v424_v20 = vpop.f32.mrf.mxu0  ;;  %v537_v2 = vpop.f32.mrf.mxu1 }
 0x110   : > { %v3576_v54 = vadd.f32 %v424_v20, %v317_v63  ;;  %v3579_v3 = vadd.f32 %v537_v2, %v3542_v4 }
 0x111   : > { %v426_v62 = vpop.f32.mrf.mxu0  ;;  %v539_v58 = vpop.f32.mrf.mxu1 }
 0x112   : > { %4639 = vst [vmem:[#allocation37_spill] sm:$0xff] %v3576_v54  ;;  %4640 = vst [vmem:[#allocation38_spill] sm:$0xff] %v3579_v3  ;;  %v3581_v53 = vadd.f32 %v426_v62, %v321_v61  ;;  %v3584_v57 = vadd.f32 %v539_v58, %v3544_v60 }
 0x114   : > { %4641 = vst [vmem:[#allocation39_spill] sm:$0xff] %v3581_v53  ;;  %4642 = vst [vmem:[#allocation40_spill] sm:$0xff] %v3584_v57 }
 0x115   : > { %v430_v55 = vpop.f32.mrf.mxu0  ;;  %v543_v52 = vpop.f32.mrf.mxu1 }
 0x116   : > { %v3586_v56 = vadd.f32 %v430_v55, %v317_v63  ;;  %v3589_v29 = vadd.f32 %v543_v52, %v3542_v4 }
 0x117   : > { %v432_v47 = vpop.f32.mrf.mxu0  ;;  %v545_v20 = vpop.f32.mrf.mxu1 }
 0x118   : > { %4643 = vst [vmem:[#allocation41_spill] sm:$0xff] %v3586_v56  ;;  %4644 = vst [vmem:[#allocation42_spill] sm:$0xff] %v3589_v29  ;;  %v3591_v54 = vadd.f32 %v432_v47, %v321_v61  ;;  %v3594_v2 = vadd.f32 %v545_v20, %v3544_v60 }
 0x11a   : > { %4645 = vst [vmem:[#allocation43_spill] sm:$0xff] %v3591_v54  ;;  %4646 = vst [vmem:[#allocation44_spill] sm:$0xff] %v3594_v2 }
 0x11b   : > { %v436_v3 = vpop.f32.mrf.mxu0  ;;  %v549_v62 = vpop.f32.mrf.mxu1 }
 0x11c   : > { %v3596_v53 = vadd.f32 %v436_v3, %v317_v63  ;;  %v3599_v58 = vadd.f32 %v549_v62, %v3542_v4 }
 0x11d   : > { %v438_v57 = vpop.f32.mrf.mxu0  ;;  %v551_v55 = vpop.f32.mrf.mxu1 }
 0x11e   : > { %4647 = vst [vmem:[#allocation45_spill] sm:$0xff] %v3596_v53  ;;  %4648 = vst [vmem:[#allocation46_spill] sm:$0xff] %v3599_v58  ;;  %v3601_v56 = vadd.f32 %v438_v57, %v321_v61  ;;  %v3604_v52 = vadd.f32 %v551_v55, %v3544_v60  ;;  %v401_v57 = vadd.f32 %v3531_v11, %v317_v63 }
 0x11f   : > { %v403_v55 = vadd.f32 %v3538_v0, %v321_v61 }
 0x120   : > { %4649 = vst [vmem:[#allocation47_spill] sm:$0xff] %v3601_v56  ;;  %4650 = vst [vmem:[#allocation48_spill] sm:$0xff] %v3604_v52 }
 0x121   : > { %v442_v29 = vpop.f32.mrf.mxu0  ;;  %v555_v47 = vpop.f32.mrf.mxu1 }
 0x122   : > { %v3606_v54 = vadd.f32 %v442_v29, %v317_v63  ;;  %v3609_v20 = vadd.f32 %v555_v47, %v3542_v4 }
 0x123   : > { %v444_v2 = vpop.f32.mrf.mxu0  ;;  %v557_v3 = vpop.f32.mrf.mxu1 }
 0x124   : > { %4651 = vst [vmem:[#allocation49_spill] sm:$0xff] %v3606_v54  ;;  %4652 = vst [vmem:[#allocation50_spill] sm:$0xff] %v3609_v20  ;;  %v3611_v53 = vadd.f32 %v444_v2, %v321_v61  ;;  %v3614_v62 = vadd.f32 %v557_v3, %v3544_v60  ;;  %v516_v2 = vadd.f32 %v3540_v1, %v3544_v60 }
 0x125   : > { %v514_v3 = vadd.f32 %v3533_v38, %v3542_v4 }
 0x126   : > { %4653 = vst [vmem:[#allocation51_spill] sm:$0xff] %v3611_v53  ;;  %4654 = vst [vmem:[#allocation52_spill] sm:$0xff] %v3614_v62 }
 0x127   : > { %v728_v58 = vpop.f32.mrf.mxu0  ;;  %v799_v54 = vpop.f32.mrf.mxu1 }
 0x128   : > { %v804_v52 = vadd.f32 %v728_v58, %v401_v57  ;;  %v806_v62 = vadd.f32 %v799_v54, %v514_v3 }
 0x129   : > { %v730_v56 = vpop.f32.mrf.mxu0  ;;  %v801_v20 = vpop.f32.mrf.mxu1 }
 0x12a   : > { %v2602_v59 = vmul.f32 -1.442695, %v804_v52  ;;  %v805_v29 = vadd.f32 %v730_v56, %v403_v55  ;;  %v807_v53 = vadd.f32 %v801_v20, %v516_v2  ;;  %v593_v52 = vld [vmem:[#allocation4] sm:$0xff] }
 0x12c   : > { %2654 = vpow2.f32 %v2602_v59  ;;  %v2603_v47 = vmul.f32 -1.442695, %v805_v29  ;;  %v2604_v63 = vmul.f32 -1.442695, %v807_v53 }
 0x12e   : > { %2656 = vpow2.f32 %v2603_v47 }
 0x12f   : > { %2658 = vpow2.f32 %v2604_v63 }
 0x139   : > { %v2655_v11 = vpop.eup %2654 }
 0x13a   : > { %v811_v61 = vadd.f32 1.0, %v2655_v11 }
 0x13b   : > { %v2657_v0 = vpop.eup %2656 }
 0x13c   : > { %2660 = vrcp.f32 %v811_v61  ;;  %v817_v56 = vadd.f32 1.0, %v2657_v0  ;;  %v2659_v59 = vpop.eup %2658 }
 0x13d   : > { %2662 = vtanh.f32 %v806_v62  ;;  %v824_v1 = vadd.f32 1.0, %v2659_v59  ;;  %v3709_v59 = vld [vmem:[%s4535_s2 + $0x1f8] sm:$0xff] }
 0x13e   : > { %2664 = vrcp.f32 %v817_v56  ;;  %v3704_v56 = vld [vmem:[%s4535_s2 + $0x1e8] sm:$0xff] }
 0x13f   : > { %2666 = vrcp.f32 %v824_v1  ;;  %v3740_v1 = vld [vmem:[%s4535_s2 + $0x1c0] sm:$0xff] }
 0x149   : > { %v2661_v58 = vpop.eup %2660 }
 0x14a   : > { %v2663_v57 = vpop.eup %2662 }
 0x14b   : > { %v2665_v60 = vpop.eup %2664  ;;  %v828_v20 = vmul.f32 %v2663_v57, %v2661_v58  ;;  %v3716_v58 = vld [vmem:[%s4535_s2 + $0x1e0] sm:$0xff]  ;;  %v3728_v57 = vld [vmem:[%s4535_s2 + $0x1c8] sm:$0xff] }
 0x14c   : > { %v827_v55 = vmul.f32 %v2665_v60, %v593_v52  ;;  %v2667_v53 = vpop.eup %2666  ;;  %v3721_v52 = vld [vmem:[%s4535_s2 + $0x1f0] sm:$0xff]  ;;  %v3733_v60 = vld [vmem:[%s4535_s2 + $0x1d8] sm:$0xff] }
 0x14e   : > { %v3622_v38 = vadd.f32 %v828_v20, %v827_v55  ;;  %v3745_v20 = vld [vmem:[%s4535_s2 + $0x1d0] sm:$0xff]  ;;  %v3752_v55 = vld [vmem:[%s4535_s2 + $0x1a8] sm:$0xff] }
 0x150   : > { %2668 = vtanh.f32 %v3622_v38 }
 0x15d   : > { %v2669_v4 = vpop.eup %2668 }
 0x15e   : > { %v831_v54 = vmul.f32 %v2669_v4, %v2667_v53  ;;  %v3764_v53 = vld [vmem:[%s4535_s2 + $0x1a0] sm:$0xff]  ;;  %v3769_v4 = vld [vmem:[%s4535_s2 + $0x1b0] sm:$0xff] }
 0x160   : > { %832 = vst [vmem:[%s2859_s26] sm:$0xff] %v831_v54  ;;  %966 = vmatmul.mubr.f32.vlgmr.msra.gmra.mxu0 %v831_v54  ;;  %1037 = vmatmul.mubr.f32.vlgmr.msra.gmra.mxu1 %v831_v54  ;;  %v3776_v54 = vld [vmem:[%s4535_s2 + $0x188] sm:$0xff] }
 0x161   : > { %1141 = vmatpush1.msra.mxu0 %v3069_v5  ;;  %1212 = vmatpush1.msra.mxu1 %v3074_v6  ;;  %v4655_v5 = vld [vmem:[#allocation5_spill] sm:$0xff]  ;;  %v4656_v6 = vld [vmem:[#allocation6_spill] sm:$0xff] }
 0x162   : > { %1142 = vmatprep.subr.mxu0 %v3079_v7  ;;  %1213 = vmatprep.subr.mxu1 %v3084_v8  ;;  %v4657_v7 = vld [vmem:[#allocation7_spill] sm:$0xff]  ;;  %v4658_v8 = vld [vmem:[#allocation8_spill] sm:$0xff]  ;;  %4680 = vst [vmem:[#allocation5_spill] sm:$0xff] %v3704_v56  ;;  %4681 = vst [vmem:[#allocation6_spill] sm:$0xff] %v3709_v59 }
 0x163   : > { %1143 = vmatpush1.msra.mxu0 %v3093_v9  ;;  %1214 = vmatpush1.msra.mxu1 %v3098_v10  ;;  %v4659_v9 = vld [vmem:[#allocation9_spill] sm:$0xff]  ;;  %v4660_v10 = vld [vmem:[#allocation10_spill] sm:$0xff] }
 0x164   : > { %1144 = vmatprep.subr.mxu0 %v3108_v12  ;;  %1215 = vmatprep.subr.mxu1 %v3113_v13  ;;  %v4661_v12 = vld [vmem:[#allocation11_spill] sm:$0xff]  ;;  %v4662_v13 = vld [vmem:[#allocation12_spill] sm:$0xff] }
 0x165   : > { %1145 = vmatpush1.msra.mxu0 %v3120_v14  ;;  %1216 = vmatpush1.msra.mxu1 %v3125_v15  ;;  %v4663_v14 = vld [vmem:[#allocation13_spill] sm:$0xff]  ;;  %v4664_v15 = vld [vmem:[#allocation14_spill] sm:$0xff] }
 0x166   : > { %1146 = vmatprep.subr.mxu0 %v3130_v16  ;;  %1217 = vmatprep.subr.mxu1 %v3135_v17  ;;  %v4665_v16 = vld [vmem:[#allocation15_spill] sm:$0xff]  ;;  %v4666_v17 = vld [vmem:[#allocation16_spill] sm:$0xff] }
 0x167   : > { %1147 = vmatpush1.msra.mxu0 %v3144_v18  ;;  %1218 = vmatpush1.msra.mxu1 %v3149_v19  ;;  %v4667_v18 = vld [vmem:[#allocation17_spill] sm:$0xff]  ;;  %v4668_v19 = vld [vmem:[#allocation18_spill] sm:$0xff] }
 0x168   : > { %1148 = vmatprep.subr.mxu0 %v3159_v21  ;;  %1219 = vmatprep.subr.mxu1 %v3164_v22  ;;  %v4669_v21 = vld [vmem:[#allocation19_spill] sm:$0xff]  ;;  %v4670_v22 = vld [vmem:[#allocation20_spill] sm:$0xff] }
 0x169   : > { %1149 = vmatpush1.msra.mxu0 %v3171_v23  ;;  %1220 = vmatpush1.msra.mxu1 %v3176_v24  ;;  %v4671_v23 = vld [vmem:[#allocation21_spill] sm:$0xff]  ;;  %v4672_v24 = vld [vmem:[#allocation22_spill] sm:$0xff] }
 0x16a   : > { %1150 = vmatprep.subr.mxu0 %v3181_v25  ;;  %1221 = vmatprep.subr.mxu1 %v3186_v26  ;;  %v4673_v25 = vld [vmem:[#allocation23_spill] sm:$0xff]  ;;  %v4674_v26 = vmov 0.0  }
 0x16b   : > { %1151 = vmatpush1.msra.mxu0 %v3195_v27  ;;  %1222 = vmatpush1.msra.mxu1 %v3200_v28  ;;  %v4675_v27 = vld [vmem:[#allocation24_spill] sm:$0xff] }
 0x16c   : > { %1152 = vmatprep.subr.mxu0 %v3210_v30  ;;  %1223 = vmatprep.subr.mxu1 %v3215_v31  ;;  %v4676_v30 = vld [vmem:[#allocation25_spill] sm:$0xff] }
 0x16d   : > { %1153 = vmatpush1.msra.mxu0 %v3222_v32  ;;  %1224 = vmatpush1.msra.mxu1 %v3227_v33 }
 0x16e   : > { %1154 = vmatprep.subr.mxu0 %v3232_v34  ;;  %1225 = vmatprep.subr.mxu1 %v3237_v35  ;;  %v4677_v34 = vld [vmem:[#allocation27_spill] sm:$0xff] }
 0x16f   : > { %1155 = vmatpush1.msra.mxu0 %v3246_v36  ;;  %1226 = vmatpush1.msra.mxu1 %v3251_v37 }
 0x170   : > { %1156 = vmatprep.subr.mxu0 %v3261_v39  ;;  %1227 = vmatprep.subr.mxu1 %v3266_v40  ;;  %v4678_v40 = vld [vmem:[#allocation28_spill] sm:$0xff] }
 0x171   : > { %1157 = vmatpush1.msra.mxu0 %v3273_v41  ;;  %1228 = vmatpush1.msra.mxu1 %v3278_v42  ;;  %v4679_v42 = vld [vmem:[#allocation26_spill] sm:$0xff] }
 0x172   : > { %1158 = vmatprep.subr.mxu0 %v3283_v43  ;;  %1229 = vmatprep.subr.mxu1 %v3288_v44 }
 0x173   : > { %1159 = vmatpush1.msra.mxu0 %v3297_v45  ;;  %1230 = vmatpush1.msra.mxu1 %v3302_v46 }
 0x174   : > { %1160 = vmatprep.subr.mxu0 %v3312_v48  ;;  %1231 = vmatprep.subr.mxu1 %v3317_v49 }
 0x175   : > { %1161 = vmatpush1.msra.mxu0 %v3324_v50  ;;  %1232 = vmatpush1.msra.mxu1 %v3329_v51 }
 0x176   : > { %1162 = vmatprep.subr.mxu0 %v4655_v5  ;;  %1233 = vmatprep.subr.mxu1 %v4656_v6  ;;  %v3781_v5 = vld [vmem:[%s4535_s2 + $0x198] sm:$0xff]  ;;  %v3788_v6 = vld [vmem:[%s4535_s2 + $0x180] sm:$0xff] }
 0x177   : > { %1163 = vmatpush1.msra.mxu0 %v4657_v7  ;;  %1234 = vmatpush1.msra.mxu1 %v4658_v8  ;;  %v3793_v7 = vld [vmem:[%s4535_s2 + $0x190] sm:$0xff]  ;;  %v3800_v8 = vld [vmem:[%s4535_s2 + $0x168] sm:$0xff] }
 0x178   : > { %1164 = vmatprep.subr.mxu0 %v4659_v9  ;;  %1235 = vmatprep.subr.mxu1 %v4660_v10  ;;  %v3805_v9 = vld [vmem:[%s4535_s2 + $0x178] sm:$0xff]  ;;  %v3812_v10 = vld [vmem:[%s4535_s2 + $0x160] sm:$0xff] }
 0x179   : > { %1165 = vmatpush1.msra.mxu0 %v4661_v12  ;;  %1236 = vmatpush1.msra.mxu1 %v4662_v13  ;;  %v3817_v12 = vld [vmem:[%s4535_s2 + $0x170] sm:$0xff]  ;;  %v3824_v13 = vld [vmem:[%s4535_s2 + $0x148] sm:$0xff] }
 0x17a   : > { %1166 = vmatprep.subr.mxu0 %v4663_v14  ;;  %1237 = vmatprep.subr.mxu1 %v4664_v15  ;;  %v3829_v14 = vld [vmem:[%s4535_s2 + $0x158] sm:$0xff]  ;;  %v3836_v15 = vld [vmem:[%s4535_s2 + $0x140] sm:$0xff] }
 0x17b   : > { %1167 = vmatpush1.msra.mxu0 %v4665_v16  ;;  %1238 = vmatpush1.msra.mxu1 %v4666_v17  ;;  %v3841_v16 = vld [vmem:[%s4535_s2 + $0x150] sm:$0xff]  ;;  %v3848_v17 = vld [vmem:[%s4535_s2 + $0x128] sm:$0xff] }
 0x17c   : > { %1168 = vmatprep.subr.mxu0 %v4667_v18  ;;  %1239 = vmatprep.subr.mxu1 %v4668_v19  ;;  %v3853_v18 = vld [vmem:[%s4535_s2 + $0x138] sm:$0xff]  ;;  %v3860_v19 = vld [vmem:[%s4535_s2 + $0x120] sm:$0xff] }
 0x17d   : > { %1169 = vmatpush1.msra.mxu0 %v4669_v21  ;;  %1240 = vmatpush1.msra.mxu1 %v4670_v22  ;;  %v3865_v21 = vld [vmem:[%s4535_s2 + $0x130] sm:$0xff]  ;;  %v3872_v22 = vld [vmem:[%s4535_s2 + $0x108] sm:$0xff] }
 0x17e   : > { %1170 = vmatprep.subr.mxu0 %v4671_v23  ;;  %1241 = vmatprep.subr.mxu1 %v4672_v24  ;;  %v3877_v23 = vld [vmem:[%s4535_s2 + $0x118] sm:$0xff]  ;;  %v3882_v24 = vld [vmem:[%s4535_s2 + $0x100] sm:$0xff] }
 0x17f   : > { %1171 = vmatpush1.msra.mxu0 %v4673_v25  ;;  %1204 = vmatprep.mubr.f32.mxu0 %v4674_v26  ;;  %v3889_v25 = vld [vmem:[%s4535_s2 + $0x110] sm:$0xff] }
 0x180   : > { %1242 = vmatpush1.msra.mxu1 %v4675_v27  ;;  %1275 = vmatprep.mubr.f32.mxu1 %v4674_v26  ;;  %v3894_v27 = vld [vmem:[%s4535_s2 + $0xe8] sm:$0xff] }
 0x181   : > { %1379 = vmatprep.subr.mxu0 %v3704_v56  ;;  %1450 = vmatprep.subr.mxu1 %v3709_v59 }
 0x220   : > { %v967_v28 = vpop.f32.mrf.mxu0  ;;  %v1038_v36 = vpop.f32.mrf.mxu1 }
 0x221   : > { %v1043_v31 = vadd.f32 %v967_v28, %v4676_v30  ;;  %v1045_v43 = vadd.f32 %v1038_v36, %v4679_v42  ;;  %v3899_v28 = vld [vmem:[%s4535_s2 + $0xf8] sm:$0xff]  ;;  %v3906_v30 = vld [vmem:[%s4535_s2 + $0xe0] sm:$0xff]  ;;  %v3940_v36 = vld [vmem:[%s4535_s2 + $0xa8] sm:$0xff] }
 0x222   : > { %v969_v32 = vpop.f32.mrf.mxu0  ;;  %v1040_v39 = vpop.f32.mrf.mxu1  ;;  %v3969_v42 = vld [vmem:[%s4535_s2 + $0x98] sm:$0xff] }
 0x223   : > { %v2605_v33 = vmul.f32 -1.442695, %v1043_v31  ;;  %v1044_v35 = vadd.f32 %v969_v32, %v4677_v34  ;;  %v1046_v41 = vadd.f32 %v1040_v39, %v4678_v40  ;;  %v3911_v31 = vld [vmem:[%s4535_s2 + $0xf0] sm:$0xff]  ;;  %v3916_v32 = vld [vmem:[%s4535_s2 + $0xc8] sm:$0xff]  ;;  %v3928_v34 = vld [vmem:[%s4535_s2 + $0xc0] sm:$0xff] }
 0x224   : > { %v3952_v39 = vld [vmem:[%s4535_s2 + $0xa0] sm:$0xff]  ;;  %v3957_v40 = vld [vmem:[%s4535_s2 + $0xb0] sm:$0xff] }
 0x225   : > { %2670 = vpow2.f32 %v2605_v33  ;;  %v2606_v37 = vmul.f32 -1.442695, %v1044_v35  ;;  %v2607_v44 = vmul.f32 -1.442695, %v1046_v41  ;;  %v3923_v33 = vld [vmem:[%s4535_s2 + $0xd8] sm:$0xff]  ;;  %v3933_v35 = vld [vmem:[%s4535_s2 + $0xd0] sm:$0xff] }
 0x226   : > { %v3964_v41 = vld [vmem:[%s4535_s2 + $0x88] sm:$0xff] }
 0x227   : > { %2672 = vpow2.f32 %v2606_v37  ;;  %v3945_v37 = vld [vmem:[%s4535_s2 + $0xb8] sm:$0xff] }
 0x228   : > { %2674 = vtanh.f32 %v1045_v43  ;;  %v3976_v43 = vld [vmem:[%s4535_s2 + $0x80] sm:$0xff] }
 0x229   : > { %2676 = vpow2.f32 %v2607_v44  ;;  %v3981_v44 = vld [vmem:[%s4535_s2 + $0x90] sm:$0xff] }
 0x22a   : > { %4682 = vst [vmem:[#allocation7_spill] sm:$0xff] %v3981_v44 }
 0x232   : > { %v2671_v45 = vpop.eup %2670 }
 0x233   : > { %v1050_v46 = vadd.f32 1.0, %v2671_v45  ;;  %v3988_v45 = vld [vmem:[%s4535_s2 + $0x68] sm:$0xff] }
 0x234   : > { %v2673_v48 = vpop.eup %2672  ;;  %4683 = vst [vmem:[#allocation8_spill] sm:$0xff] %v3988_v45 }
 0x235   : > { %2678 = vrcp.f32 %v1050_v46  ;;  %v1056_v49 = vadd.f32 1.0, %v2673_v48  ;;  %v2675_v50 = vpop.eup %2674  ;;  %v3993_v46 = vld [vmem:[%s4535_s2 + $0x78] sm:$0xff]  ;;  %v4000_v48 = vld [vmem:[%s4535_s2 + $0x60] sm:$0xff] }
 0x236   : > { %v2677_v51 = vpop.eup %2676  ;;  %4684 = vst [vmem:[#allocation9_spill] sm:$0xff] %v3993_v46  ;;  %4685 = vst [vmem:[#allocation10_spill] sm:$0xff] %v4000_v48 }
 0x237   : > { %2680 = vrcp.f32 %v1056_v49  ;;  %v1063_v2 = vadd.f32 1.0, %v2677_v51  ;;  %v4005_v49 = vld [vmem:[%s4535_s2 + $0x70] sm:$0xff]  ;;  %v4017_v51 = vld [vmem:[%s4535_s2 + $0x58] sm:$0xff] }
 0x238   : > { %4686 = vst [vmem:[#allocation11_spill] sm:$0xff] %v4005_v49  ;;  %4688 = vst [vmem:[#allocation13_spill] sm:$0xff] %v4017_v51 }
 0x239   : > { %2682 = vrcp.f32 %v1063_v2  ;;  %v4041_v2 = vld [vmem:[%s4535_s2 + $0x38] sm:$0xff] }
 0x23a   : > { %4692 = vst [vmem:[#allocation17_spill] sm:$0xff] %v4041_v2 }
 0x242   : > { %v2679_v62 = vpop.eup %2678 }
 0x243   : > { %v1067_v29 = vmul.f32 %v2679_v62, %v2675_v50  ;;  %v4012_v50 = vld [vmem:[%s4535_s2 + $0x48] sm:$0xff]  ;;  %v4024_v62 = vld [vmem:[%s4535_s2 + $0x40] sm:$0xff] }
 0x244   : > { %v2681_v47 = vpop.eup %2680  ;;  %4687 = vst [vmem:[#allocation12_spill] sm:$0xff] %v4012_v50  ;;  %4689 = vst [vmem:[#allocation14_spill] sm:$0xff] %v4024_v62 }
 0x245   : > { %v1066_v3 = vmul.f32 %v2681_v47, %v3622_v38  ;;  %v3757_v38 = vld [vmem:[%s4535_s2 + $0x1b8] sm:$0xff]  ;;  %v4036_v47 = vld [vmem:[%s4535_s2 + $0x28] sm:$0xff] }
 0x246   : > { %v2683_v11 = vpop.eup %2682  ;;  %4691 = vst [vmem:[#allocation16_spill] sm:$0xff] %v4036_v47 }
 0x247   : > { %v3695_v63 = vadd.f32 %v1067_v29, %v1066_v3  ;;  %v4029_v29 = vld [vmem:[%s4535_s2 + $0x50] sm:$0xff]  ;;  %v4048_v3 = vld [vmem:[%s4535_s2 + $0x20] sm:$0xff] }
 0x248   : > { %4690 = vst [vmem:[#allocation15_spill] sm:$0xff] %v4029_v29  ;;  %4693 = vst [vmem:[#allocation18_spill] sm:$0xff] %v4048_v3 }
 0x249   : > { %2684 = vtanh.f32 %v3695_v63 }
 0x256   : > { %v2685_v61 = vpop.eup %2684 }
 0x257   : > { %v1070_v0 = vmul.f32 %v2685_v61, %v2683_v11  ;;  %v4053_v11 = vld [vmem:[%s4535_s2 + $0x30] sm:$0xff]  ;;  %v4060_v61 = vld [vmem:[%s4535_s2 + $0x8] sm:$0xff] }
 0x258   : > { %4694 = vst [vmem:[#allocation19_spill] sm:$0xff] %v4053_v11  ;;  %4695 = vst [vmem:[#allocation20_spill] sm:$0xff] %v4060_v61 }
 0x259   : > { %1071 = vst [vmem:[%s2859_s26 + $0x8] sm:$0xff] %v1070_v0  ;;  %1205 = vmatmul.mubr.f32.vlgmr.msra.gmra.mxu0 %v1070_v0  ;;  %1276 = vmatmul.mubr.f32.vlgmr.msra.gmra.mxu1 %v1070_v0  ;;  %v4065_v0 = vld [vmem:[%s4535_s2 + $0x18] sm:$0xff] }
 0x25a   : > { %1443 = vmatprep.mubr.f32.mxu0 %v4674_v26  ;;  %1514 = vmatprep.mubr.f32.mxu1 %v4674_v26  ;;  %4696 = vst [vmem:[#allocation21_spill] sm:$0xff] %v4065_v0  ;;  %v4072_v26 = vld [vmem:[%s4535_s2] sm:$0xff] }
 0x25b   : > { %1380 = vmatpush1.msra.mxu0 %v3716_v58  ;;  %1451 = vmatpush1.msra.mxu1 %v3721_v52  ;;  %4697 = vst [vmem:[#allocation22_spill] sm:$0xff] %v4072_v26 }
 0x25c   : > { %1381 = vmatprep.subr.mxu0 %v3728_v57  ;;  %1452 = vmatprep.subr.mxu1 %v3733_v60 }
 0x25d   : > { %1382 = vmatpush1.msra.mxu0 %v3740_v1  ;;  %1453 = vmatpush1.msra.mxu1 %v3745_v20 }
 0x25e   : > { %1383 = vmatprep.subr.mxu0 %v3752_v55  ;;  %1454 = vmatprep.subr.mxu1 %v3757_v38 }
 0x25f   : > { %1384 = vmatpush1.msra.mxu0 %v3764_v53  ;;  %1455 = vmatpush1.msra.mxu1 %v3769_v4 }
 0x260   : > { %1385 = vmatprep.subr.mxu0 %v3776_v54  ;;  %1456 = vmatprep.subr.mxu1 %v3781_v5 }
 0x261   : > { %1386 = vmatpush1.msra.mxu0 %v3788_v6  ;;  %1457 = vmatpush1.msra.mxu1 %v3793_v7 }
 0x262   : > { %1387 = vmatprep.subr.mxu0 %v3800_v8  ;;  %1458 = vmatprep.subr.mxu1 %v3805_v9 }
 0x263   : > { %1388 = vmatpush1.msra.mxu0 %v3812_v10  ;;  %1459 = vmatpush1.msra.mxu1 %v3817_v12 }
 0x264   : > { %1389 = vmatprep.subr.mxu0 %v3824_v13  ;;  %1460 = vmatprep.subr.mxu1 %v3829_v14 }
 0x265   : > { %1390 = vmatpush1.msra.mxu0 %v3836_v15  ;;  %1461 = vmatpush1.msra.mxu1 %v3841_v16 }
 0x266   : > { %1391 = vmatprep.subr.mxu0 %v3848_v17  ;;  %1462 = vmatprep.subr.mxu1 %v3853_v18 }
 0x267   : > { %1392 = vmatpush1.msra.mxu0 %v3860_v19  ;;  %1463 = vmatpush1.msra.mxu1 %v3865_v21 }
 0x268   : > { %1393 = vmatprep.subr.mxu0 %v3872_v22  ;;  %1464 = vmatprep.subr.mxu1 %v3877_v23 }
 0x269   : > { %1394 = vmatpush1.msra.mxu0 %v3882_v24  ;;  %1465 = vmatpush1.msra.mxu1 %v3889_v25 }
 0x26a   : > { %1395 = vmatprep.subr.mxu0 %v3894_v27  ;;  %1466 = vmatprep.subr.mxu1 %v3899_v28 }
 0x26b   : > { %1396 = vmatpush1.msra.mxu0 %v3906_v30  ;;  %1467 = vmatpush1.msra.mxu1 %v3911_v31 }
 0x26c   : > { %1397 = vmatprep.subr.mxu0 %v3916_v32  ;;  %1468 = vmatprep.subr.mxu1 %v3923_v33 }
 0x26d   : > { %1398 = vmatpush1.msra.mxu0 %v3928_v34  ;;  %1469 = vmatpush1.msra.mxu1 %v3933_v35 }
 0x26e   : > { %1399 = vmatprep.subr.mxu0 %v3940_v36  ;;  %1470 = vmatprep.subr.mxu1 %v3945_v37 }
 0x26f   : > { %1400 = vmatpush1.msra.mxu0 %v3952_v39  ;;  %1471 = vmatpush1.msra.mxu1 %v3957_v40 }
 0x270   : > { %1401 = vmatprep.subr.mxu0 %v3964_v41  ;;  %1472 = vmatprep.subr.mxu1 %v3969_v42 }
 0x271   : > { %1402 = vmatpush1.msra.mxu0 %v3976_v43  ;;  %1473 = vmatpush1.msra.mxu1 %v3981_v44 }
 0x272   : > { %1403 = vmatprep.subr.mxu0 %v3988_v45  ;;  %1474 = vmatprep.subr.mxu1 %v3993_v46  ;;  %v4702_v46 = vld [vmem:[#allocation30_spill] sm:$0xff] }
 0x273   : > { %1404 = vmatpush1.msra.mxu0 %v4000_v48  ;;  %1475 = vmatpush1.msra.mxu1 %v4005_v49  ;;  %v4701_v48 = vld [vmem:[#allocation32_spill] sm:$0xff] }
 0x274   : > { %1405 = vmatprep.subr.mxu0 %v4012_v50  ;;  %1476 = vmatprep.subr.mxu1 %v4017_v51 }
 0x275   : > { %1406 = vmatpush1.msra.mxu0 %v4024_v62  ;;  %1477 = vmatpush1.msra.mxu1 %v4029_v29  ;;  %v4077_v29 = vld [vmem:[%s4535_s2 + $0x10] sm:$0xff] }
 0x276   : > { %1407 = vmatprep.subr.mxu0 %v4036_v47  ;;  %1478 = vmatprep.subr.mxu1 %v4041_v2  ;;  %4698 = vst [vmem:[#allocation23_spill] sm:$0xff] %v4077_v29  ;;  %v4699_v47 = vld [vmem:[#allocation29_spill] sm:$0xff] }
 0x277   : > { %1408 = vmatpush1.msra.mxu0 %v4048_v3  ;;  %1479 = vmatpush1.msra.mxu1 %v4053_v11  ;;  %v4700_v3 = vld [vmem:[#allocation31_spill] sm:$0xff] }
 0x278   : > { %1409 = vmatprep.subr.mxu0 %v4060_v61  ;;  %1480 = vmatprep.subr.mxu1 %v4065_v0 }
 0x279   : > { %1410 = vmatpush1.msra.mxu0 %v4072_v26  ;;  %1481 = vmatpush1.msra.mxu1 %v4077_v29 }
 0x27a   : > { %1618 = vmatprep.subr.mxu0 %v3704_v56  ;;  %1689 = vmatprep.subr.mxu1 %v3709_v59 }
 0x319   : > { %v1206_v2 = vpop.f32.mrf.mxu0  ;;  %v1277_v11 = vpop.f32.mrf.mxu1 }
 0x31a   : > { %v1282_v62 = vadd.f32 %v1206_v2, %v4699_v47  ;;  %v1284_v29 = vadd.f32 %v1277_v11, %v4702_v46  ;;  %v4706_v46 = vld [vmem:[#allocation10_spill] sm:$0xff]  ;;  %v4708_v11 = vld [vmem:[#allocation12_spill] sm:$0xff] }
 0x31b   : > { %v1208_v51 = vpop.f32.mrf.mxu0  ;;  %v1279_v0 = vpop.f32.mrf.mxu1 }
 0x31c   : > { %v2608_v50 = vmul.f32 -1.442695, %v1282_v62  ;;  %v1283_v49 = vadd.f32 %v1208_v51, %v4700_v3  ;;  %v1285_v26 = vadd.f32 %v1279_v0, %v4701_v48  ;;  %v4709_v0 = vld [vmem:[#allocation13_spill] sm:$0xff] }
 0x31e   : > { %2686 = vpow2.f32 %v2608_v50  ;;  %v2609_v61 = vmul.f32 -1.442695, %v1283_v49  ;;  %v2610_v45 = vmul.f32 -1.442695, %v1285_v26 }
 0x320   : > { %2688 = vpow2.f32 %v2609_v61 }
 0x321   : > { %2690 = vtanh.f32 %v1284_v29  ;;  %v4707_v29 = vld [vmem:[#allocation11_spill] sm:$0xff] }
 0x322   : > { %2692 = vpow2.f32 %v2610_v45 }
 0x32b   : > { %v2687_v56 = vpop.eup %2686 }
 0x32c   : > { %v1289_v44 = vadd.f32 1.0, %v2687_v56 }
 0x32d   : > { %v2689_v59 = vpop.eup %2688 }
 0x32e   : > { %2694 = vrcp.f32 %v1289_v44  ;;  %v1295_v62 = vadd.f32 1.0, %v2689_v59  ;;  %v2691_v51 = vpop.eup %2690  ;;  %v4704_v59 = vld [vmem:[#allocation8_spill] sm:$0xff]  ;;  %v4705_v44 = vld [vmem:[#allocation9_spill] sm:$0xff] }
 0x32f   : > { %v2693_v50 = vpop.eup %2692 }
 0x330   : > { %2696 = vrcp.f32 %v1295_v62  ;;  %v1302_v3 = vadd.f32 1.0, %v2693_v50  ;;  %v4710_v62 = vld [vmem:[#allocation14_spill] sm:$0xff]  ;;  %v4712_v50 = vld [vmem:[#allocation16_spill] sm:$0xff] }
 0x332   : > { %2698 = vrcp.f32 %v1302_v3  ;;  %v4716_v3 = vld [vmem:[#allocation20_spill] sm:$0xff] }
 0x33b   : > { %v2695_v47 = vpop.eup %2694 }
 0x33c   : > { %v1306_v49 = vmul.f32 %v2695_v47, %v2691_v51  ;;  %v4711_v51 = vld [vmem:[#allocation15_spill] sm:$0xff]  ;;  %v4713_v47 = vld [vmem:[#allocation17_spill] sm:$0xff] }
 0x33d   : > { %v2697_v2 = vpop.eup %2696 }
 0x33e   : > { %v1305_v48 = vmul.f32 %v2697_v2, %v3695_v63  ;;  %v4703_v63 = vld [vmem:[#allocation7_spill] sm:$0xff] }
 0x33f   : > { %v2699_v26 = vpop.eup %2698  ;;  %v4715_v2 = vld [vmem:[#allocation19_spill] sm:$0xff] }
 0x340   : > { %v4092_v61 = vadd.f32 %v1306_v49, %v1305_v48  ;;  %v4714_v49 = vld [vmem:[#allocation18_spill] sm:$0xff]  ;;  %v4717_v48 = vld [vmem:[#allocation21_spill] sm:$0xff] }
 0x342   : > { %2700 = vtanh.f32 %v4092_v61 }
 0x34f   : > { %v2701_v56 = vpop.eup %2700 }
 0x350   : > { %v1309_v45 = vmul.f32 %v2701_v56, %v2699_v26  ;;  %v4718_v26 = vld [vmem:[#allocation22_spill] sm:$0xff]  ;;  %v4719_v56 = vmov 0.0  }
 0x352   : > { %1310 = vst [vmem:[%s2859_s26 + $0x10] sm:$0xff] %v1309_v45  ;;  %1444 = vmatmul.mubr.f32.vlgmr.msra.gmra.mxu0 %v1309_v45  ;;  %1515 = vmatmul.mubr.f32.vlgmr.msra.gmra.mxu1 %v1309_v45  ;;  %v4720_v45 = vld [vmem:[#allocation23_spill] sm:$0xff] }
 0x353   : > { %1619 = vmatpush1.msra.mxu0 %v3716_v58  ;;  %1690 = vmatpush1.msra.mxu1 %v3721_v52 }
 0x354   : > { %1620 = vmatprep.subr.mxu0 %v3728_v57  ;;  %1691 = vmatprep.subr.mxu1 %v3733_v60 }
 0x355   : > { %1621 = vmatpush1.msra.mxu0 %v3740_v1  ;;  %1692 = vmatpush1.msra.mxu1 %v3745_v20 }
 0x356   : > { %1622 = vmatprep.subr.mxu0 %v3752_v55  ;;  %1693 = vmatprep.subr.mxu1 %v3757_v38 }
 0x357   : > { %1623 = vmatpush1.msra.mxu0 %v3764_v53  ;;  %1694 = vmatpush1.msra.mxu1 %v3769_v4 }
 0x358   : > { %1624 = vmatprep.subr.mxu0 %v3776_v54  ;;  %1695 = vmatprep.subr.mxu1 %v3781_v5 }
 0x359   : > { %1625 = vmatpush1.msra.mxu0 %v3788_v6  ;;  %1696 = vmatpush1.msra.mxu1 %v3793_v7 }
 0x35a   : > { %1626 = vmatprep.subr.mxu0 %v3800_v8  ;;  %1697 = vmatprep.subr.mxu1 %v3805_v9 }
 0x35b   : > { %1627 = vmatpush1.msra.mxu0 %v3812_v10  ;;  %1698 = vmatpush1.msra.mxu1 %v3817_v12 }
 0x35c   : > { %1628 = vmatprep.subr.mxu0 %v3824_v13  ;;  %1699 = vmatprep.subr.mxu1 %v3829_v14 }
 0x35d   : > { %1629 = vmatpush1.msra.mxu0 %v3836_v15  ;;  %1700 = vmatpush1.msra.mxu1 %v3841_v16 }
 0x35e   : > { %1630 = vmatprep.subr.mxu0 %v3848_v17  ;;  %1701 = vmatprep.subr.mxu1 %v3853_v18 }
 0x35f   : > { %1631 = vmatpush1.msra.mxu0 %v3860_v19  ;;  %1702 = vmatpush1.msra.mxu1 %v3865_v21 }
 0x360   : > { %1632 = vmatprep.subr.mxu0 %v3872_v22  ;;  %1703 = vmatprep.subr.mxu1 %v3877_v23 }
 0x361   : > { %1633 = vmatpush1.msra.mxu0 %v3882_v24  ;;  %1704 = vmatpush1.msra.mxu1 %v3889_v25 }
 0x362   : > { %1634 = vmatprep.subr.mxu0 %v3894_v27  ;;  %1705 = vmatprep.subr.mxu1 %v3899_v28 }
 0x363   : > { %1635 = vmatpush1.msra.mxu0 %v3906_v30  ;;  %1706 = vmatpush1.msra.mxu1 %v3911_v31 }
 0x364   : > { %1636 = vmatprep.subr.mxu0 %v3916_v32  ;;  %1707 = vmatprep.subr.mxu1 %v3923_v33 }
 0x365   : > { %1637 = vmatpush1.msra.mxu0 %v3928_v34  ;;  %1708 = vmatpush1.msra.mxu1 %v3933_v35 }
 0x366   : > { %1638 = vmatprep.subr.mxu0 %v3940_v36  ;;  %1709 = vmatprep.subr.mxu1 %v3945_v37 }
 0x367   : > { %1639 = vmatpush1.msra.mxu0 %v3952_v39  ;;  %1710 = vmatpush1.msra.mxu1 %v3957_v40 }
 0x368   : > { %1640 = vmatprep.subr.mxu0 %v3964_v41  ;;  %1711 = vmatprep.subr.mxu1 %v3969_v42 }
 0x369   : > { %1641 = vmatpush1.msra.mxu0 %v3976_v43  ;;  %1712 = vmatpush1.msra.mxu1 %v4703_v63 }
 0x36a   : > { %1642 = vmatprep.subr.mxu0 %v4704_v59  ;;  %1713 = vmatprep.subr.mxu1 %v4705_v44  ;;  %v4726_v44 = vld [vmem:[#allocation34_spill] sm:$0xff] }
 0x36b   : > { %1643 = vmatpush1.msra.mxu0 %v4706_v46  ;;  %1714 = vmatpush1.msra.mxu1 %v4707_v29  ;;  %v4725_v46 = vld [vmem:[#allocation36_spill] sm:$0xff] }
 0x36c   : > { %1644 = vmatprep.subr.mxu0 %v4708_v11  ;;  %1715 = vmatprep.subr.mxu1 %v4709_v0 }
 0x36d   : > { %1645 = vmatpush1.msra.mxu0 %v4710_v62  ;;  %1716 = vmatpush1.msra.mxu1 %v4711_v51  ;;  %v4721_v51 = vld [vmem:[#allocation5_spill] sm:$0xff] }
 0x36e   : > { %1646 = vmatprep.subr.mxu0 %v4712_v50  ;;  %1717 = vmatprep.subr.mxu1 %v4713_v47  ;;  %v4722_v50 = vld [vmem:[#allocation6_spill] sm:$0xff] }
 0x36f   : > { %1647 = vmatpush1.msra.mxu0 %v4714_v49  ;;  %1718 = vmatpush1.msra.mxu1 %v4715_v2  ;;  %v4723_v49 = vld [vmem:[#allocation33_spill] sm:$0xff] }
 0x370   : > { %1648 = vmatprep.subr.mxu0 %v4716_v3  ;;  %1719 = vmatprep.subr.mxu1 %v4717_v48  ;;  %v4724_v3 = vld [vmem:[#allocation35_spill] sm:$0xff] }
 0x371   : > { %1649 = vmatpush1.msra.mxu0 %v4718_v26  ;;  %1682 = vmatprep.mubr.f32.mxu0 %v4719_v56 }
 0x372   : > { %1720 = vmatpush1.msra.mxu1 %v4720_v45  ;;  %1753 = vmatprep.mubr.f32.mxu1 %v4719_v56 }
 0x373   : > { %1857 = vmatprep.subr.mxu0 %v4721_v51  ;;  %1928 = vmatprep.subr.mxu1 %v4722_v50 }
 0x412   : > { %v1445_v47 = vpop.f32.mrf.mxu0  ;;  %v1516_v48 = vpop.f32.mrf.mxu1 }
 0x413   : > { %v1521_v62 = vadd.f32 %v1445_v47, %v4723_v49  ;;  %v1523_v56 = vadd.f32 %v1516_v48, %v4726_v44  ;;  %v4730_v48 = vld [vmem:[#allocation10_spill] sm:$0xff] }
 0x414   : > { %v1447_v2 = vpop.f32.mrf.mxu0  ;;  %v1518_v29 = vpop.f32.mrf.mxu1 }
 0x415   : > { %v2611_v0 = vmul.f32 -1.442695, %v1521_v62  ;;  %v1522_v11 = vadd.f32 %v1447_v2, %v4724_v3  ;;  %v1524_v45 = vadd.f32 %v1518_v29, %v4725_v46 }
 0x417   : > { %2702 = vpow2.f32 %v2611_v0  ;;  %v2612_v26 = vmul.f32 -1.442695, %v1522_v11  ;;  %v2613_v59 = vmul.f32 -1.442695, %v1524_v45  ;;  %v4733_v45 = vld [vmem:[#allocation13_spill] sm:$0xff] }
 0x419   : > { %2704 = vpow2.f32 %v2612_v26  ;;  %v4731_v26 = vld [vmem:[#allocation11_spill] sm:$0xff] }
 0x41a   : > { %2706 = vtanh.f32 %v1523_v56  ;;  %v4732_v56 = vld [vmem:[#allocation12_spill] sm:$0xff] }
 0x41b   : > { %2708 = vpow2.f32 %v2613_v59 }
 0x424   : > { %v2703_v51 = vpop.eup %2702 }
 0x425   : > { %v1528_v63 = vadd.f32 1.0, %v2703_v51 }
 0x426   : > { %v2705_v50 = vpop.eup %2704 }
 0x427   : > { %2710 = vrcp.f32 %v1528_v63  ;;  %v1534_v62 = vadd.f32 1.0, %v2705_v50  ;;  %v2707_v47 = vpop.eup %2706  ;;  %v4728_v63 = vld [vmem:[#allocation8_spill] sm:$0xff]  ;;  %v4729_v50 = vld [vmem:[#allocation9_spill] sm:$0xff] }
 0x428   : > { %v2709_v0 = vpop.eup %2708 }
 0x429   : > { %2712 = vrcp.f32 %v1534_v62  ;;  %v1541_v3 = vadd.f32 1.0, %v2709_v0  ;;  %v4734_v62 = vld [vmem:[#allocation14_spill] sm:$0xff]  ;;  %v4736_v0 = vld [vmem:[#allocation16_spill] sm:$0xff] }
 0x42b   : > { %2714 = vrcp.f32 %v1541_v3  ;;  %v4740_v3 = vld [vmem:[#allocation20_spill] sm:$0xff] }
 0x434   : > { %v2711_v49 = vpop.eup %2710 }
 0x435   : > { %v1545_v11 = vmul.f32 %v2711_v49, %v2707_v47  ;;  %v4735_v47 = vld [vmem:[#allocation15_spill] sm:$0xff]  ;;  %v4737_v49 = vld [vmem:[#allocation17_spill] sm:$0xff] }
 0x436   : > { %v2713_v2 = vpop.eup %2712 }
 0x437   : > { %v1544_v46 = vmul.f32 %v2713_v2, %v4092_v61  ;;  %v4727_v61 = vld [vmem:[#allocation7_spill] sm:$0xff] }
 0x438   : > { %v2715_v44 = vpop.eup %2714  ;;  %v4739_v2 = vld [vmem:[#allocation19_spill] sm:$0xff] }
 0x439   : > { %v4167_v29 = vadd.f32 %v1545_v11, %v1544_v46  ;;  %v4738_v11 = vld [vmem:[#allocation18_spill] sm:$0xff]  ;;  %v4741_v46 = vld [vmem:[#allocation21_spill] sm:$0xff] }
 0x43b   : > { %2716 = vtanh.f32 %v4167_v29 }
 0x448   : > { %v2717_v51 = vpop.eup %2716 }
 0x449   : > { %v1548_v59 = vmul.f32 %v2717_v51, %v2715_v44  ;;  %v4742_v44 = vld [vmem:[#allocation22_spill] sm:$0xff]  ;;  %v4743_v51 = vmov 0.0  }
 0x44b   : > { %1549 = vst [vmem:[%s2859_s26 + $0x18] sm:$0xff] %v1548_v59  ;;  %1683 = vmatmul.mubr.f32.vlgmr.msra.gmra.mxu0 %v1548_v59  ;;  %1754 = vmatmul.mubr.f32.vlgmr.msra.gmra.mxu1 %v1548_v59  ;;  %v4744_v59 = vld [vmem:[#allocation23_spill] sm:$0xff] }
 0x44c   : > { %1858 = vmatpush1.msra.mxu0 %v3716_v58  ;;  %1929 = vmatpush1.msra.mxu1 %v3721_v52 }
 0x44d   : > { %1859 = vmatprep.subr.mxu0 %v3728_v57  ;;  %1930 = vmatprep.subr.mxu1 %v3733_v60 }
 0x44e   : > { %1860 = vmatpush1.msra.mxu0 %v3740_v1  ;;  %1931 = vmatpush1.msra.mxu1 %v3745_v20 }
 0x44f   : > { %1861 = vmatprep.subr.mxu0 %v3752_v55  ;;  %1932 = vmatprep.subr.mxu1 %v3757_v38 }
 0x450   : > { %1862 = vmatpush1.msra.mxu0 %v3764_v53  ;;  %1933 = vmatpush1.msra.mxu1 %v3769_v4 }
 0x451   : > { %1863 = vmatprep.subr.mxu0 %v3776_v54  ;;  %1934 = vmatprep.subr.mxu1 %v3781_v5 }
 0x452   : > { %1864 = vmatpush1.msra.mxu0 %v3788_v6  ;;  %1935 = vmatpush1.msra.mxu1 %v3793_v7 }
 0x453   : > { %1865 = vmatprep.subr.mxu0 %v3800_v8  ;;  %1936 = vmatprep.subr.mxu1 %v3805_v9 }
 0x454   : > { %1866 = vmatpush1.msra.mxu0 %v3812_v10  ;;  %1937 = vmatpush1.msra.mxu1 %v3817_v12 }
 0x455   : > { %1867 = vmatprep.subr.mxu0 %v3824_v13  ;;  %1938 = vmatprep.subr.mxu1 %v3829_v14 }
 0x456   : > { %1868 = vmatpush1.msra.mxu0 %v3836_v15  ;;  %1939 = vmatpush1.msra.mxu1 %v3841_v16 }
 0x457   : > { %1869 = vmatprep.subr.mxu0 %v3848_v17  ;;  %1940 = vmatprep.subr.mxu1 %v3853_v18 }
 0x458   : > { %1870 = vmatpush1.msra.mxu0 %v3860_v19  ;;  %1941 = vmatpush1.msra.mxu1 %v3865_v21 }
 0x459   : > { %1871 = vmatprep.subr.mxu0 %v3872_v22  ;;  %1942 = vmatprep.subr.mxu1 %v3877_v23 }
 0x45a   : > { %1872 = vmatpush1.msra.mxu0 %v3882_v24  ;;  %1943 = vmatpush1.msra.mxu1 %v3889_v25 }
 0x45b   : > { %1873 = vmatprep.subr.mxu0 %v3894_v27  ;;  %1944 = vmatprep.subr.mxu1 %v3899_v28 }
 0x45c   : > { %1874 = vmatpush1.msra.mxu0 %v3906_v30  ;;  %1945 = vmatpush1.msra.mxu1 %v3911_v31 }
 0x45d   : > { %1875 = vmatprep.subr.mxu0 %v3916_v32  ;;  %1946 = vmatprep.subr.mxu1 %v3923_v33 }
 0x45e   : > { %1876 = vmatpush1.msra.mxu0 %v3928_v34  ;;  %1947 = vmatpush1.msra.mxu1 %v3933_v35 }
 0x45f   : > { %1877 = vmatprep.subr.mxu0 %v3940_v36  ;;  %1948 = vmatprep.subr.mxu1 %v3945_v37 }
 0x460   : > { %1878 = vmatpush1.msra.mxu0 %v3952_v39  ;;  %1949 = vmatpush1.msra.mxu1 %v3957_v40 }
 0x461   : > { %1879 = vmatprep.subr.mxu0 %v3964_v41  ;;  %1950 = vmatprep.subr.mxu1 %v3969_v42 }
 0x462   : > { %1880 = vmatpush1.msra.mxu0 %v3976_v43  ;;  %1951 = vmatpush1.msra.mxu1 %v4727_v61 }
 0x463   : > { %1881 = vmatprep.subr.mxu0 %v4728_v63  ;;  %1952 = vmatprep.subr.mxu1 %v4729_v50  ;;  %v4750_v50 = vld [vmem:[#allocation38_spill] sm:$0xff] }
 0x464   : > { %1882 = vmatpush1.msra.mxu0 %v4730_v48  ;;  %1953 = vmatpush1.msra.mxu1 %v4731_v26  ;;  %v4749_v48 = vld [vmem:[#allocation40_spill] sm:$0xff] }
 0x465   : > { %1883 = vmatprep.subr.mxu0 %v4732_v56  ;;  %1954 = vmatprep.subr.mxu1 %v4733_v45 }
 0x466   : > { %1884 = vmatpush1.msra.mxu0 %v4734_v62  ;;  %1955 = vmatpush1.msra.mxu1 %v4735_v47  ;;  %v4745_v47 = vld [vmem:[#allocation5_spill] sm:$0xff] }
 0x467   : > { %1885 = vmatprep.subr.mxu0 %v4736_v0  ;;  %1956 = vmatprep.subr.mxu1 %v4737_v49  ;;  %v4746_v0 = vld [vmem:[#allocation6_spill] sm:$0xff] }
 0x468   : > { %1886 = vmatpush1.msra.mxu0 %v4738_v11  ;;  %1957 = vmatpush1.msra.mxu1 %v4739_v2  ;;  %v4747_v11 = vld [vmem:[#allocation37_spill] sm:$0xff] }
 0x469   : > { %1887 = vmatprep.subr.mxu0 %v4740_v3  ;;  %1958 = vmatprep.subr.mxu1 %v4741_v46  ;;  %v4748_v3 = vld [vmem:[#allocation39_spill] sm:$0xff] }
 0x46a   : > { %1888 = vmatpush1.msra.mxu0 %v4742_v44  ;;  %1921 = vmatprep.mubr.f32.mxu0 %v4743_v51 }
 0x46b   : > { %1959 = vmatpush1.msra.mxu1 %v4744_v59  ;;  %1992 = vmatprep.mubr.f32.mxu1 %v4743_v51 }
 0x46c   : > { %2096 = vmatprep.subr.mxu0 %v4745_v47  ;;  %2167 = vmatprep.subr.mxu1 %v4746_v0 }
 0x50b   : > { %v1684_v49 = vpop.f32.mrf.mxu0  ;;  %v1755_v46 = vpop.f32.mrf.mxu1 }
 0x50c   : > { %v1760_v62 = vadd.f32 %v1684_v49, %v4747_v11  ;;  %v1762_v51 = vadd.f32 %v1755_v46, %v4750_v50 }
 0x50d   : > { %v1686_v2 = vpop.f32.mrf.mxu0  ;;  %v1757_v26 = vpop.f32.mrf.mxu1 }
 0x50e   : > { %v2614_v45 = vmul.f32 -1.442695, %v1760_v62  ;;  %v1761_v56 = vadd.f32 %v1686_v2, %v4748_v3  ;;  %v1763_v59 = vadd.f32 %v1757_v26, %v4749_v48 }
 0x510   : > { %2718 = vpow2.f32 %v2614_v45  ;;  %v2615_v44 = vmul.f32 -1.442695, %v1761_v56  ;;  %v2616_v63 = vmul.f32 -1.442695, %v1763_v59  ;;  %v2334_v59 = vld [vmem:[%s4535_s2 + $0x1f8] sm:$0xff] }
 0x512   : > { %2720 = vpow2.f32 %v2615_v44 }
 0x513   : > { %2722 = vtanh.f32 %v1762_v51  ;;  %v2332_v51 = vld [vmem:[%s4535_s2 + $0x1e8] sm:$0xff] }
 0x514   : > { %2724 = vpow2.f32 %v2616_v63 }
 0x51d   : > { %v2719_v47 = vpop.eup %2718 }
 0x51e   : > { %v1767_v61 = vadd.f32 1.0, %v2719_v47  ;;  %v2331_v47 = vld [vmem:[%s4535_s2 + $0x1e0] sm:$0xff] }
 0x51f   : > { %v2721_v0 = vpop.eup %2720 }
 0x520   : > { %2726 = vrcp.f32 %v1767_v61  ;;  %v1773_v62 = vadd.f32 1.0, %v2721_v0  ;;  %v2723_v49 = vpop.eup %2722  ;;  %v2333_v0 = vld [vmem:[%s4535_s2 + $0x1f0] sm:$0xff] }
 0x521   : > { %v2725_v45 = vpop.eup %2724 }
 0x522   : > { %2728 = vrcp.f32 %v1773_v62  ;;  %v1780_v3 = vadd.f32 1.0, %v2725_v45  ;;  %v2328_v62 = vld [vmem:[%s4535_s2 + $0x1c8] sm:$0xff]  ;;  %v2327_v45 = vld [vmem:[%s4535_s2 + $0x1c0] sm:$0xff] }
 0x524   : > { %2730 = vrcp.f32 %v1780_v3  ;;  %v2323_v3 = vld [vmem:[%s4535_s2 + $0x1a0] sm:$0xff] }
 0x52d   : > { %v2727_v11 = vpop.eup %2726 }
 0x52e   : > { %v1784_v56 = vmul.f32 %v2727_v11, %v2723_v49  ;;  %v2330_v49 = vld [vmem:[%s4535_s2 + $0x1d8] sm:$0xff]  ;;  %v2329_v11 = vld [vmem:[%s4535_s2 + $0x1d0] sm:$0xff] }
 0x52f   : > { %v2729_v2 = vpop.eup %2728 }
 0x530   : > { %v1783_v48 = vmul.f32 %v2729_v2, %v4167_v29  ;;  %v2326_v2 = vld [vmem:[%s4535_s2 + $0x1b8] sm:$0xff] }
 0x531   : > { %v2731_v50 = vpop.eup %2730 }
 0x532   : > { %v4242_v26 = vadd.f32 %v1784_v56, %v1783_v48  ;;  %v2324_v56 = vld [vmem:[%s4535_s2 + $0x1a8] sm:$0xff]  ;;  %v2325_v48 = vld [vmem:[%s4535_s2 + $0x1b0] sm:$0xff] }
 0x534   : > { %2732 = vtanh.f32 %v4242_v26 }
 0x541   : > { %v2733_v46 = vpop.eup %2732 }
 0x542   : > { %v1787_v63 = vmul.f32 %v2733_v46, %v2731_v50  ;;  %v2322_v50 = vld [vmem:[%s4535_s2 + $0x198] sm:$0xff]  ;;  %v2319_v46 = vld [vmem:[%s4535_s2 + $0x180] sm:$0xff] }
 0x544   : > { %1788 = vst [vmem:[%s2859_s26 + $0x20] sm:$0xff] %v1787_v63  ;;  %1922 = vmatmul.mubr.f32.vlgmr.msra.gmra.mxu0 %v1787_v63  ;;  %1993 = vmatmul.mubr.f32.vlgmr.msra.gmra.mxu1 %v1787_v63  ;;  %v2321_v63 = vld [vmem:[%s4535_s2 + $0x190] sm:$0xff] }
 0x545   : > { %2097 = vmatpush1.msra.mxu0 %v3716_v58  ;;  %2168 = vmatpush1.msra.mxu1 %v3721_v52  ;;  %v4751_v58 = vld [vmem:[#allocation7_spill] sm:$0xff]  ;;  %v4752_v52 = vld [vmem:[#allocation8_spill] sm:$0xff] }
 0x546   : > { %2098 = vmatprep.subr.mxu0 %v3728_v57  ;;  %2169 = vmatprep.subr.mxu1 %v3733_v60  ;;  %v4753_v57 = vld [vmem:[#allocation9_spill] sm:$0xff]  ;;  %v4754_v60 = vld [vmem:[#allocation10_spill] sm:$0xff] }
 0x547   : > { %2099 = vmatpush1.msra.mxu0 %v3740_v1  ;;  %2170 = vmatpush1.msra.mxu1 %v3745_v20  ;;  %v4755_v1 = vld [vmem:[#allocation11_spill] sm:$0xff]  ;;  %v4756_v20 = vld [vmem:[#allocation12_spill] sm:$0xff] }
 0x548   : > { %2100 = vmatprep.subr.mxu0 %v3752_v55  ;;  %2171 = vmatprep.subr.mxu1 %v3757_v38  ;;  %v4757_v55 = vld [vmem:[#allocation13_spill] sm:$0xff]  ;;  %v4758_v38 = vld [vmem:[#allocation14_spill] sm:$0xff] }
 0x549   : > { %2101 = vmatpush1.msra.mxu0 %v3764_v53  ;;  %2172 = vmatpush1.msra.mxu1 %v3769_v4  ;;  %v4759_v53 = vld [vmem:[#allocation15_spill] sm:$0xff]  ;;  %v4760_v4 = vld [vmem:[#allocation16_spill] sm:$0xff] }
 0x54a   : > { %2102 = vmatprep.subr.mxu0 %v3776_v54  ;;  %2173 = vmatprep.subr.mxu1 %v3781_v5  ;;  %v4761_v54 = vld [vmem:[#allocation17_spill] sm:$0xff]  ;;  %v4762_v5 = vld [vmem:[#allocation18_spill] sm:$0xff] }
 0x54b   : > { %2103 = vmatpush1.msra.mxu0 %v3788_v6  ;;  %2174 = vmatpush1.msra.mxu1 %v3793_v7  ;;  %v4763_v6 = vld [vmem:[#allocation19_spill] sm:$0xff]  ;;  %v4764_v7 = vld [vmem:[#allocation20_spill] sm:$0xff] }
 0x54c   : > { %2104 = vmatprep.subr.mxu0 %v3800_v8  ;;  %2175 = vmatprep.subr.mxu1 %v3805_v9  ;;  %v4765_v8 = vld [vmem:[#allocation21_spill] sm:$0xff]  ;;  %v4766_v9 = vld [vmem:[#allocation22_spill] sm:$0xff] }
 0x54d   : > { %2105 = vmatpush1.msra.mxu0 %v3812_v10  ;;  %2176 = vmatpush1.msra.mxu1 %v3817_v12  ;;  %v4767_v10 = vmov 0.0   ;;  %v4768_v12 = vld [vmem:[#allocation23_spill] sm:$0xff] }
 0x54e   : > { %2106 = vmatprep.subr.mxu0 %v3824_v13  ;;  %2177 = vmatprep.subr.mxu1 %v3829_v14  ;;  %v4769_v14 = vld [vmem:[#allocation41_spill] sm:$0xff] }
 0x54f   : > { %2107 = vmatpush1.msra.mxu0 %v3836_v15  ;;  %2178 = vmatpush1.msra.mxu1 %v3841_v16 }
 0x550   : > { %2108 = vmatprep.subr.mxu0 %v3848_v17  ;;  %2179 = vmatprep.subr.mxu1 %v3853_v18  ;;  %v4770_v18 = vld [vmem:[#allocation43_spill] sm:$0xff] }
 0x551   : > { %2109 = vmatpush1.msra.mxu0 %v3860_v19  ;;  %2180 = vmatpush1.msra.mxu1 %v3865_v21 }
 0x552   : > { %2110 = vmatprep.subr.mxu0 %v3872_v22  ;;  %2181 = vmatprep.subr.mxu1 %v3877_v23 }
 0x553   : > { %2111 = vmatpush1.msra.mxu0 %v3882_v24  ;;  %2182 = vmatpush1.msra.mxu1 %v3889_v25  ;;  %v4771_v24 = vld [vmem:[#allocation44_spill] sm:$0xff] }
 0x554   : > { %2112 = vmatprep.subr.mxu0 %v3894_v27  ;;  %2183 = vmatprep.subr.mxu1 %v3899_v28  ;;  %v4772_v27 = vld [vmem:[#allocation42_spill] sm:$0xff] }
 0x555   : > { %2113 = vmatpush1.msra.mxu0 %v3906_v30  ;;  %2184 = vmatpush1.msra.mxu1 %v3911_v31 }
 0x556   : > { %2114 = vmatprep.subr.mxu0 %v3916_v32  ;;  %2185 = vmatprep.subr.mxu1 %v3923_v33 }
 0x557   : > { %2115 = vmatpush1.msra.mxu0 %v3928_v34  ;;  %2186 = vmatpush1.msra.mxu1 %v3933_v35 }
 0x558   : > { %2116 = vmatprep.subr.mxu0 %v3940_v36  ;;  %2187 = vmatprep.subr.mxu1 %v3945_v37 }
 0x559   : > { %2117 = vmatpush1.msra.mxu0 %v3952_v39  ;;  %2188 = vmatpush1.msra.mxu1 %v3957_v40 }
 0x55a   : > { %2118 = vmatprep.subr.mxu0 %v3964_v41  ;;  %2189 = vmatprep.subr.mxu1 %v3969_v42 }
 0x55b   : > { %2119 = vmatpush1.msra.mxu0 %v3976_v43  ;;  %2190 = vmatpush1.msra.mxu1 %v4751_v58  ;;  %v2316_v58 = vld [vmem:[%s4535_s2 + $0x168] sm:$0xff] }
 0x55c   : > { %2120 = vmatprep.subr.mxu0 %v4752_v52  ;;  %2191 = vmatprep.subr.mxu1 %v4753_v57  ;;  %v2318_v52 = vld [vmem:[%s4535_s2 + $0x178] sm:$0xff]  ;;  %v2315_v57 = vld [vmem:[%s4535_s2 + $0x160] sm:$0xff] }
 0x55d   : > { %2121 = vmatpush1.msra.mxu0 %v4754_v60  ;;  %2192 = vmatpush1.msra.mxu1 %v4755_v1  ;;  %v2317_v60 = vld [vmem:[%s4535_s2 + $0x170] sm:$0xff]  ;;  %v2312_v1 = vld [vmem:[%s4535_s2 + $0x148] sm:$0xff] }
 0x55e   : > { %2122 = vmatprep.subr.mxu0 %v4756_v20  ;;  %2193 = vmatprep.subr.mxu1 %v4757_v55  ;;  %v2314_v20 = vld [vmem:[%s4535_s2 + $0x158] sm:$0xff]  ;;  %v2311_v55 = vld [vmem:[%s4535_s2 + $0x140] sm:$0xff] }
 0x55f   : > { %2123 = vmatpush1.msra.mxu0 %v4758_v38  ;;  %2194 = vmatpush1.msra.mxu1 %v4759_v53  ;;  %v2313_v38 = vld [vmem:[%s4535_s2 + $0x150] sm:$0xff]  ;;  %v2308_v53 = vld [vmem:[%s4535_s2 + $0x128] sm:$0xff] }
 0x560   : > { %2124 = vmatprep.subr.mxu0 %v4760_v4  ;;  %2195 = vmatprep.subr.mxu1 %v4761_v54  ;;  %v2310_v4 = vld [vmem:[%s4535_s2 + $0x138] sm:$0xff]  ;;  %v2307_v54 = vld [vmem:[%s4535_s2 + $0x120] sm:$0xff] }
 0x561   : > { %2125 = vmatpush1.msra.mxu0 %v4762_v5  ;;  %2196 = vmatpush1.msra.mxu1 %v4763_v6  ;;  %v2309_v5 = vld [vmem:[%s4535_s2 + $0x130] sm:$0xff]  ;;  %v2304_v6 = vld [vmem:[%s4535_s2 + $0x108] sm:$0xff] }
 0x562   : > { %2126 = vmatprep.subr.mxu0 %v4764_v7  ;;  %2197 = vmatprep.subr.mxu1 %v4765_v8  ;;  %v2306_v7 = vld [vmem:[%s4535_s2 + $0x118] sm:$0xff]  ;;  %v2303_v8 = vld [vmem:[%s4535_s2 + $0x100] sm:$0xff] }
 0x563   : > { %2127 = vmatpush1.msra.mxu0 %v4766_v9  ;;  %2160 = vmatprep.mubr.f32.mxu0 %v4767_v10  ;;  %v2305_v9 = vld [vmem:[%s4535_s2 + $0x110] sm:$0xff] }
 0x564   : > { %2198 = vmatpush1.msra.mxu1 %v4768_v12  ;;  %2231 = vmatprep.mubr.f32.mxu1 %v4767_v10  ;;  %v2302_v12 = vld [vmem:[%s4535_s2 + $0xf8] sm:$0xff] }
 0x565   : > { %2335 = vmatprep.subr.mxu0 %v2332_v51  ;;  %2406 = vmatprep.subr.mxu1 %v2334_v59  ;;  %v2273_v51 = vld [vmem:[%s4535_s2 + $0x10] sm:$0xff] }
 0x604   : > { %v1923_v13 = vpop.f32.mrf.mxu0  ;;  %v1994_v21 = vpop.f32.mrf.mxu1 }
 0x605   : > { %v1999_v15 = vadd.f32 %v1923_v13, %v4769_v14  ;;  %v2001_v28 = vadd.f32 %v1994_v21, %v4772_v27  ;;  %v2299_v13 = vld [vmem:[%s4535_s2 + $0xe0] sm:$0xff]  ;;  %v2301_v14 = vld [vmem:[%s4535_s2 + $0xf0] sm:$0xff]  ;;  %v2294_v21 = vld [vmem:[%s4535_s2 + $0xb8] sm:$0xff] }
 0x606   : > { %v1925_v16 = vpop.f32.mrf.mxu0  ;;  %v1996_v23 = vpop.f32.mrf.mxu1  ;;  %v2287_v27 = vld [vmem:[%s4535_s2 + $0x80] sm:$0xff] }
 0x607   : > { %v2617_v17 = vmul.f32 -1.442695, %v1999_v15  ;;  %v2000_v19 = vadd.f32 %v1925_v16, %v4770_v18  ;;  %v2002_v25 = vadd.f32 %v1996_v23, %v4771_v24  ;;  %v2296_v15 = vld [vmem:[%s4535_s2 + $0xc8] sm:$0xff]  ;;  %v2298_v16 = vld [vmem:[%s4535_s2 + $0xd8] sm:$0xff]  ;;  %v2297_v18 = vld [vmem:[%s4535_s2 + $0xd0] sm:$0xff] }
 0x608   : > { %v2293_v23 = vld [vmem:[%s4535_s2 + $0xb0] sm:$0xff]  ;;  %v2288_v24 = vld [vmem:[%s4535_s2 + $0x88] sm:$0xff] }
 0x609   : > { %2734 = vpow2.f32 %v2617_v17  ;;  %v2618_v22 = vmul.f32 -1.442695, %v2000_v19  ;;  %v2619_v30 = vmul.f32 -1.442695, %v2002_v25  ;;  %v2295_v17 = vld [vmem:[%s4535_s2 + $0xc0] sm:$0xff]  ;;  %v2292_v19 = vld [vmem:[%s4535_s2 + $0xa8] sm:$0xff] }
 0x60a   : > { %v2290_v25 = vld [vmem:[%s4535_s2 + $0x98] sm:$0xff] }
 0x60b   : > { %2736 = vpow2.f32 %v2618_v22  ;;  %v2291_v22 = vld [vmem:[%s4535_s2 + $0xa0] sm:$0xff] }
 0x60c   : > { %2738 = vtanh.f32 %v2001_v28  ;;  %v2289_v28 = vld [vmem:[%s4535_s2 + $0x90] sm:$0xff] }
 0x60d   : > { %2740 = vpow2.f32 %v2619_v30  ;;  %v2284_v30 = vld [vmem:[%s4535_s2 + $0x68] sm:$0xff] }
 0x616   : > { %v2735_v31 = vpop.eup %2734 }
 0x617   : > { %v2006_v32 = vadd.f32 1.0, %v2735_v31  ;;  %v2286_v31 = vld [vmem:[%s4535_s2 + $0x78] sm:$0xff] }
 0x618   : > { %v2737_v33 = vpop.eup %2736 }
 0x619   : > { %2742 = vrcp.f32 %v2006_v32  ;;  %v2012_v34 = vadd.f32 1.0, %v2737_v33  ;;  %v2739_v35 = vpop.eup %2738  ;;  %v2283_v32 = vld [vmem:[%s4535_s2 + $0x60] sm:$0xff]  ;;  %v2285_v33 = vld [vmem:[%s4535_s2 + $0x70] sm:$0xff] }
 0x61a   : > { %v2741_v36 = vpop.eup %2740 }
 0x61b   : > { %2744 = vrcp.f32 %v2012_v34  ;;  %v2019_v41 = vadd.f32 1.0, %v2741_v36  ;;  %v2280_v34 = vld [vmem:[%s4535_s2 + $0x48] sm:$0xff]  ;;  %v2279_v36 = vld [vmem:[%s4535_s2 + $0x40] sm:$0xff] }
 0x61d   : > { %2746 = vrcp.f32 %v2019_v41  ;;  %v2275_v41 = vld [vmem:[%s4535_s2 + $0x20] sm:$0xff] }
 0x626   : > { %v2743_v37 = vpop.eup %2742 }
 0x627   : > { %v2023_v39 = vmul.f32 %v2743_v37, %v2739_v35  ;;  %v2282_v35 = vld [vmem:[%s4535_s2 + $0x58] sm:$0xff]  ;;  %v2281_v37 = vld [vmem:[%s4535_s2 + $0x50] sm:$0xff] }
 0x628   : > { %v2745_v40 = vpop.eup %2744 }
 0x629   : > { %v2022_v42 = vmul.f32 %v2745_v40, %v4242_v26  ;;  %v2320_v26 = vld [vmem:[%s4535_s2 + $0x188] sm:$0xff]  ;;  %v2278_v40 = vld [vmem:[%s4535_s2 + $0x38] sm:$0xff] }
 0x62a   : > { %v2747_v29 = vpop.eup %2746 }
 0x62b   : > { %v4315_v43 = vadd.f32 %v2023_v39, %v2022_v42  ;;  %v2276_v39 = vld [vmem:[%s4535_s2 + $0x28] sm:$0xff]  ;;  %v2277_v42 = vld [vmem:[%s4535_s2 + $0x30] sm:$0xff] }
 0x62d   : > { %2748 = vtanh.f32 %v4315_v43 }
 0x63a   : > { %v2749_v61 = vpop.eup %2748 }
 0x63b   : > { %v2026_v44 = vmul.f32 %v2749_v61, %v2747_v29  ;;  %v2272_v29 = vld [vmem:[%s4535_s2 + $0x8] sm:$0xff]  ;;  %v2274_v61 = vld [vmem:[%s4535_s2 + $0x18] sm:$0xff] }
 0x63d   : > { %2027 = vst [vmem:[%s2859_s26 + $0x28] sm:$0xff] %v2026_v44  ;;  %2161 = vmatmul.mubr.f32.vlgmr.msra.gmra.mxu0 %v2026_v44  ;;  %2232 = vmatmul.mubr.f32.vlgmr.msra.gmra.mxu1 %v2026_v44  ;;  %v2271_v44 = vld [vmem:[%s4535_s2] sm:$0xff] }
 0x63e   : > { %2399 = vmatprep.mubr.f32.mxu0 %v4767_v10  ;;  %2470 = vmatprep.mubr.f32.mxu1 %v4767_v10  ;;  %v2300_v10 = vld [vmem:[%s4535_s2 + $0xe8] sm:$0xff] }
 0x63f   : > { %2336 = vmatpush1.msra.mxu0 %v2331_v47  ;;  %2407 = vmatpush1.msra.mxu1 %v2333_v0  ;;  %v4773_v47 = vld [vmem:[#allocation45_spill] sm:$0xff] }
 0x640   : > { %2337 = vmatprep.subr.mxu0 %v2328_v62  ;;  %2408 = vmatprep.subr.mxu1 %v2330_v49 }
 0x641   : > { %2338 = vmatpush1.msra.mxu0 %v2327_v45  ;;  %2409 = vmatpush1.msra.mxu1 %v2329_v11  ;;  %v4774_v45 = vld [vmem:[#allocation47_spill] sm:$0xff] }
 0x642   : > { %2339 = vmatprep.subr.mxu0 %v2324_v56  ;;  %2410 = vmatprep.subr.mxu1 %v2326_v2 }
 0x643   : > { %2340 = vmatpush1.msra.mxu0 %v2323_v3  ;;  %2411 = vmatpush1.msra.mxu1 %v2325_v48  ;;  %v4775_v48 = vld [vmem:[#allocation48_spill] sm:$0xff] }
 0x644   : > { %2341 = vmatprep.subr.mxu0 %v2320_v26  ;;  %2412 = vmatprep.subr.mxu1 %v2322_v50  ;;  %v4776_v50 = vld [vmem:[#allocation46_spill] sm:$0xff] }
 0x645   : > { %2342 = vmatpush1.msra.mxu0 %v2319_v46  ;;  %2413 = vmatpush1.msra.mxu1 %v2321_v63 }
 0x646   : > { %2343 = vmatprep.subr.mxu0 %v2316_v58  ;;  %2414 = vmatprep.subr.mxu1 %v2318_v52 }
 0x647   : > { %2344 = vmatpush1.msra.mxu0 %v2315_v57  ;;  %2415 = vmatpush1.msra.mxu1 %v2317_v60 }
 0x648   : > { %2345 = vmatprep.subr.mxu0 %v2312_v1  ;;  %2416 = vmatprep.subr.mxu1 %v2314_v20 }
 0x649   : > { %2346 = vmatpush1.msra.mxu0 %v2311_v55  ;;  %2417 = vmatpush1.msra.mxu1 %v2313_v38 }
 0x64a   : > { %2347 = vmatprep.subr.mxu0 %v2308_v53  ;;  %2418 = vmatprep.subr.mxu1 %v2310_v4 }
 0x64b   : > { %2348 = vmatpush1.msra.mxu0 %v2307_v54  ;;  %2419 = vmatpush1.msra.mxu1 %v2309_v5 }
 0x64c   : > { %2349 = vmatprep.subr.mxu0 %v2304_v6  ;;  %2420 = vmatprep.subr.mxu1 %v2306_v7 }
 0x64d   : > { %2350 = vmatpush1.msra.mxu0 %v2303_v8  ;;  %2421 = vmatpush1.msra.mxu1 %v2305_v9 }
 0x64e   : > { %2351 = vmatprep.subr.mxu0 %v2300_v10  ;;  %2422 = vmatprep.subr.mxu1 %v2302_v12  ;;  %v4777_v10 = vld [vmem:[#allocation49_spill] sm:$0xff] }
 0x64f   : > { %2352 = vmatpush1.msra.mxu0 %v2299_v13  ;;  %2423 = vmatpush1.msra.mxu1 %v2301_v14 }
 0x650   : > { %2353 = vmatprep.subr.mxu0 %v2296_v15  ;;  %2424 = vmatprep.subr.mxu1 %v2298_v16  ;;  %v4778_v15 = vld [vmem:[#allocation51_spill] sm:$0xff] }
 0x651   : > { %2354 = vmatpush1.msra.mxu0 %v2295_v17  ;;  %2425 = vmatpush1.msra.mxu1 %v2297_v18 }
 0x652   : > { %2355 = vmatprep.subr.mxu0 %v2292_v19  ;;  %2426 = vmatprep.subr.mxu1 %v2294_v21  ;;  %v4779_v19 = vld [vmem:[#allocation52_spill] sm:$0xff] }
 0x653   : > { %2356 = vmatpush1.msra.mxu0 %v2291_v22  ;;  %2427 = vmatpush1.msra.mxu1 %v2293_v23  ;;  %v4780_v22 = vld [vmem:[#allocation50_spill] sm:$0xff] }
 0x654   : > { %2357 = vmatprep.subr.mxu0 %v2288_v24  ;;  %2428 = vmatprep.subr.mxu1 %v2290_v25 }
 0x655   : > { %2358 = vmatpush1.msra.mxu0 %v2287_v27  ;;  %2429 = vmatpush1.msra.mxu1 %v2289_v28 }
 0x656   : > { %2359 = vmatprep.subr.mxu0 %v2284_v30  ;;  %2430 = vmatprep.subr.mxu1 %v2286_v31 }
 0x657   : > { %2360 = vmatpush1.msra.mxu0 %v2283_v32  ;;  %2431 = vmatpush1.msra.mxu1 %v2285_v33 }
 0x658   : > { %2361 = vmatprep.subr.mxu0 %v2280_v34  ;;  %2432 = vmatprep.subr.mxu1 %v2282_v35 }
 0x659   : > { %2362 = vmatpush1.msra.mxu0 %v2279_v36  ;;  %2433 = vmatpush1.msra.mxu1 %v2281_v37 }
 0x65a   : > { %2363 = vmatprep.subr.mxu0 %v2276_v39  ;;  %2434 = vmatprep.subr.mxu1 %v2278_v40 }
 0x65b   : > { %2364 = vmatpush1.msra.mxu0 %v2275_v41  ;;  %2435 = vmatpush1.msra.mxu1 %v2277_v42 }
 0x65c   : > { %2365 = vmatprep.subr.mxu0 %v2272_v29  ;;  %2436 = vmatprep.subr.mxu1 %v2274_v61 }
 0x65d   : > { %2366 = vmatpush1.msra.mxu0 %v2271_v44  ;;  %2437 = vmatpush1.msra.mxu1 %v2273_v51 }
 0x6fd   : > { %v2162_v59 = vpop.f32.mrf.mxu0  ;;  %v2233_v56 = vpop.f32.mrf.mxu1 }
 0x6fe   : > { %v2238_v0 = vadd.f32 %v2162_v59, %v4773_v47  ;;  %v2240_v46 = vadd.f32 %v2233_v56, %v4776_v50 }
 0x6ff   : > { %v2164_v62 = vpop.f32.mrf.mxu0  ;;  %v2235_v3 = vpop.f32.mrf.mxu1 }
 0x700   : > { %v2620_v49 = vmul.f32 -1.442695, %v2238_v0  ;;  %v2239_v11 = vadd.f32 %v2164_v62, %v4774_v45  ;;  %v2241_v26 = vadd.f32 %v2235_v3, %v4775_v48 }
 0x702   : > { %2750 = vpow2.f32 %v2620_v49  ;;  %v2621_v2 = vmul.f32 -1.442695, %v2239_v11  ;;  %v2622_v63 = vmul.f32 -1.442695, %v2241_v26 }
 0x704   : > { %2752 = vpow2.f32 %v2621_v2 }
 0x705   : > { %2754 = vtanh.f32 %v2240_v46 }
 0x706   : > { %2756 = vpow2.f32 %v2622_v63 }
 0x70f   : > { %v2751_v58 = vpop.eup %2750 }
 0x710   : > { %v2245_v52 = vadd.f32 1.0, %v2751_v58 }
 0x711   : > { %v2753_v57 = vpop.eup %2752 }
 0x712   : > { %2758 = vrcp.f32 %v2245_v52  ;;  %v2251_v60 = vadd.f32 1.0, %v2753_v57  ;;  %v2755_v1 = vpop.eup %2754 }
 0x713   : > { %v2757_v20 = vpop.eup %2756 }
 0x714   : > { %2760 = vrcp.f32 %v2251_v60  ;;  %v2258_v4 = vadd.f32 1.0, %v2757_v20 }
 0x716   : > { %2762 = vrcp.f32 %v2258_v4 }
 0x71f   : > { %v2759_v55 = vpop.eup %2758 }
 0x720   : > { %v2262_v38 = vmul.f32 %v2759_v55, %v2755_v1 }
 0x721   : > { %v2761_v53 = vpop.eup %2760 }
 0x722   : > { %v2261_v54 = vmul.f32 %v2761_v53, %v4315_v43 }
 0x723   : > { %v2763_v6 = vpop.eup %2762 }
 0x724   : > { %v2263_v5 = vadd.f32 %v2262_v38, %v2261_v54 }
 0x726   : > { %2764 = vtanh.f32 %v2263_v5 }
 0x733   : > { %v2765_v7 = vpop.eup %2764 }
 0x734   : > { %v2265_v8 = vmul.f32 %v2765_v7, %v2763_v6 }
 0x736   : > { %2266 = vst [vmem:[%s2859_s26 + $0x30] sm:$0xff] %v2265_v8  ;;  %2400 = vmatmul.mubr.f32.vlgmr.msra.gmra.mxu0 %v2265_v8  ;;  %2471 = vmatmul.mubr.f32.vlgmr.msra.gmra.mxu1 %v2265_v8 }
 0x7f6   : > { %v2401_v9 = vpop.f32.mrf.mxu0  ;;  %v2472_v17 = vpop.f32.mrf.mxu1 }
 0x7f7   : > { %v2477_v12 = vadd.f32 %v2401_v9, %v4777_v10  ;;  %v2479_v23 = vadd.f32 %v2472_v17, %v4780_v22 }
 0x7f8   : > { %v2403_v13 = vpop.f32.mrf.mxu0  ;;  %v2474_v43 = vpop.f32.mrf.mxu1 }
 0x7f9   : > { %v2623_v14 = vmul.f32 -1.442695, %v2477_v12  ;;  %v2478_v16 = vadd.f32 %v2403_v13, %v4778_v15  ;;  %v2480_v21 = vadd.f32 %v2474_v43, %v4779_v19 }
 0x7fb   : > { %2766 = vpow2.f32 %v2623_v14  ;;  %v2624_v18 = vmul.f32 -1.442695, %v2478_v16  ;;  %v2625_v24 = vmul.f32 -1.442695, %v2480_v21 }
 0x7fd   : > { %2768 = vpow2.f32 %v2624_v18 }
 0x7fe   : > { %2770 = vtanh.f32 %v2479_v23 }
 0x7ff   : > { %2772 = vpow2.f32 %v2625_v24 }
 0x808   : > { %v2767_v25 = vpop.eup %2766 }
 0x809   : > { %v2484_v27 = vadd.f32 1.0, %v2767_v25 }
 0x80a   : > { %v2769_v28 = vpop.eup %2768 }
 0x80b   : > { %2774 = vrcp.f32 %v2484_v27  ;;  %v2490_v30 = vadd.f32 1.0, %v2769_v28  ;;  %v2771_v31 = vpop.eup %2770 }
 0x80c   : > { %v2773_v32 = vpop.eup %2772 }
 0x80d   : > { %2776 = vrcp.f32 %v2490_v30  ;;  %v2497_v36 = vadd.f32 1.0, %v2773_v32 }
 0x80f   : > { %2778 = vrcp.f32 %v2497_v36 }
 0x818   : > { %v2775_v33 = vpop.eup %2774 }
 0x819   : > { %v2501_v34 = vmul.f32 %v2775_v33, %v2771_v31 }
 0x81a   : > { %v2777_v35 = vpop.eup %2776 }
 0x81b   : > { %v2500_v37 = vmul.f32 %v2777_v35, %v2263_v5 }
 0x81c   : > { %v2779_v40 = vpop.eup %2778 }
 0x81d   : > { %v2502_v39 = vadd.f32 %v2501_v34, %v2500_v37 }
 0x81f   : > { %2780 = vtanh.f32 %v2502_v39  ;;  %2507 = vst [vmem:[#allocation4] sm:$0xff] %v2502_v39 }
 0x82c   : > { %v2781_v41 = vpop.eup %2780 }
 0x82d   : > { %v2504_v42 = vmul.f32 %v2781_v41, %v2779_v40 }
 0x82f   : > { %2505 = vst [vmem:[%s2859_s26 + $0x38] sm:$0xff] %v2504_v42  ;;  %2506 = vst [vmem:[#allocation3] sm:$0xff] %v2504_v42 }
 0x830 PF: > { %s14_s17 = sadd.s32 1, %s2804_s17   ;;  %s4781_s15 = smov %s2800_s16 }
 0x831   : > { %p11_p6 = scmp.ge.s32.totalorder %s14_s17, 4   ;;  %s4782_s16 = smov %s4784_s18 }
 0x833   :  { %13 = sbr.rel (!%p11_p6) target bundleno = 2 (0x2), region = 70 }

</bundles_post_ra>
